<compile_context>
chip_gen: v6e
topology: v6e:2x2x1
jax: 0.10.0
libtpu: 0.0.40
codegen_flags: <defaults>
</compile_context>

<pallas_src>
import jax
import jax.numpy as jnp
from jax.experimental import pallas as pl
from jax.experimental.pallas import tpu as pltpu


# ---------------------------------------------------------------------------
# Fused Pallas kernel: conv1 -> pool -> conv2 -> pool -> fc1 -> fc2 -> softmax
# (one branch per grid step; both images batched along M inside)
# ---------------------------------------------------------------------------

def _fused_model_kernel(x_ref, e24_ref, o24_ref, e8_ref, o8_ref,
                        k1e_ref, k1o_ref, b1_ref,
                        k2e_ref, k2o_ref, b2_ref,
                        f1_ref, bf1_ref, wf2_ref, bf2_ref,
                        out_ref):
    f32 = jnp.float32
    bf16 = jnp.bfloat16
    nb = x_ref.shape[0]                         # batch (static, = 2)

    x = x_ref[...]                              # (B, 28, 28) bf16

    # --- conv1 input: shifted-row concat over the 5 kernel rows, images along M ---
    x5 = jnp.concatenate(
        [jnp.concatenate([x[b, dh:dh + 24, :] for dh in range(5)], axis=-1)
         for b in range(nb)], axis=0)                               # (B*24, 140)

    # --- conv1 (single deep-K matmul) + W-pool folded into weights (VPU max) ------
    c1 = jnp.maximum(
        jnp.dot(x5, k1e_ref[0], preferred_element_type=f32),
        jnp.dot(x5, k1o_ref[0], preferred_element_type=f32))        # (B*24, 384)
    c1 = c1.astype(bf16)
    # H-pool via tiny even/odd row-selection matmuls; bias added after the pool
    # (maxpool commutes with a per-channel constant bias).
    p1 = jnp.maximum(
        jnp.dot(e24_ref[...], c1, preferred_element_type=f32),
        jnp.dot(o24_ref[...], c1, preferred_element_type=f32))      # (B*12, 384)
    p1 = (p1 + b1_ref[0]).astype(bf16)

    # --- conv2 input: per-image shifted-row windows, concat over the 5 rows -------
    x5b = jnp.concatenate(
        [jnp.concatenate([p1[b * 12 + dh: b * 12 + dh + 8, :] for b in range(nb)],
                         axis=0)
         for dh in range(5)], axis=-1)                              # (B*8, 1920)

    # --- conv2 (single deep-K matmul) + folded W-pool ------------------------------
    c2 = jnp.maximum(
        jnp.dot(x5b, k2e_ref[0], preferred_element_type=f32),
        jnp.dot(x5b, k2o_ref[0], preferred_element_type=f32))       # (B*8, 256)
    c2 = c2.astype(bf16)
    p2 = jnp.maximum(
        jnp.dot(e8_ref[...], c2, preferred_element_type=f32),
        jnp.dot(o8_ref[...], c2, preferred_element_type=f32))       # (B*4, 256), row = B*i + b
    p2 = (p2 + b2_ref[0]).astype(bf16)

    # --- fc1 (NCHW flatten permutation baked into f1 blocks), batched over images --
    acc = None
    for i in range(4):
        t = jnp.dot(p2[nb * i: nb * (i + 1), :], f1_ref[0, i],
                    preferred_element_type=f32)
        acc = t if acc is None else acc + t
    y1 = (acc + bf1_ref[0]).astype(bf16)                            # (B, 256)

    # --- fc2 (class dim padded to 128 lanes, pad logits = -1e30) + softmax ---------
    z = jnp.dot(y1, wf2_ref[0], preferred_element_type=f32) + bf2_ref[0]   # (B, 128)
    z = z - jnp.max(z, axis=-1, keepdims=True)
    ez = jnp.exp(z)
    out_ref[0, :, :] = ez / jnp.sum(ez, axis=-1, keepdims=True)     # single lane-dense store


# ---------------------------------------------------------------------------
# Weight-only transforms (done once, outside the kernel)
# ---------------------------------------------------------------------------

def _conv_band_matrix(w_oihw, win):
    """Band matrices with the 5 kernel rows concatenated along K and the 2x W-pool
    folded in: returns (K_even, K_odd), each (kh*win*cin, (wout//2)*cout), so that
       conv_even = X5 @ K_even,  conv_odd = X5 @ K_odd,
       W-pooled conv = max(conv_even, conv_odd),
    where X5[i, dh*win*cin + w*cin + c] = input[c, i+dh, w]."""
    cout, cin, kh, kw = w_oihw.shape
    wout = win - kw + 1
    w_idx = jnp.arange(win)[:, None]                 # (win, 1)
    j_idx = jnp.arange(wout)[None, :]                # (1, wout)
    dw = w_idx - j_idx                               # (win, wout)
    valid = ((dw >= 0) & (dw < kw)).astype(w_oihw.dtype)
    dw_c = jnp.clip(dw, 0, kw - 1)
    wt = jnp.transpose(w_oihw, (3, 2, 1, 0))         # (kw, kh, cin, cout)
    band = wt[dw_c] * valid[:, :, None, None, None]  # (win, wout, kh, cin, cout)
    k = jnp.transpose(band, (2, 0, 3, 1, 4))         # (kh, win, cin, wout, cout)
    k = k.reshape(kh * win * cin, wout, cout)
    k_even = k[:, 0::2, :].reshape(kh * win * cin, (wout // 2) * cout)
    k_odd = k[:, 1::2, :].reshape(kh * win * cin, (wout // 2) * cout)
    return k_even, k_odd


def _row_pool_selectors(n, batch, interleave):
    """0/1 selectors for a stride-2 H max-pool on a (batch*n, C) row-stack.
    interleave=False -> output row = b*(n//2) + i (contiguous per image)
    interleave=True  -> output row = batch*i + b (images interleaved per pooled row)."""
    half = n // 2
    r = jnp.arange(batch * half)
    if interleave:
        b, i = r % batch, r // batch
    else:
        b, i = r // half, r % half
    src_even = b * n + 2 * i
    cols = jnp.arange(batch * n)[None, :]
    even = (cols == src_even[:, None]).astype(jnp.float32)
    odd = (cols == (src_even + 1)[:, None]).astype(jnp.float32)
    return even.astype(jnp.bfloat16), odd.astype(jnp.bfloat16)


def _prepare_branch(p):
    """PyTorch-layout params (OIHW conv, (out,in) linear) -> bf16 kernel operands."""
    bf16 = jnp.bfloat16
    k1e, k1o = _conv_band_matrix(p["conv1_w"], 28)            # (140, 384) each
    k2e, k2o = _conv_band_matrix(p["conv2_w"], 12)            # (1920, 256) each
    b1 = jnp.tile(p["conv1_b"], 12)[None, :].astype(jnp.float32)   # (1, 384)
    b2 = jnp.tile(p["conv2_b"], 4)[None, :].astype(jnp.float32)    # (1, 256)
    # fc1: torch flat index = o*16 + i*4 + j  ->  blocks F1[i][(j*64+o), k]
    f1 = p["fc1_w"].reshape(256, 64, 4, 4)                    # (k, o, i, j)
    f1 = jnp.transpose(f1, (2, 3, 1, 0)).reshape(4, 256, 256)
    bf1 = p["fc1_b"][None, :].astype(jnp.float32)             # (1, 256)
    # fc2: pad class dim to 128 lanes; pad logits forced to -1e30 (exp -> 0 exactly)
    wf2 = jnp.zeros((256, 128), jnp.float32).at[:, :10].set(p["fc2_w"].T)
    bf2 = jnp.full((1, 128), -1e30, jnp.float32).at[0, :10].set(p["fc2_b"])
    return {"k1e": k1e.astype(bf16), "k1o": k1o.astype(bf16), "b1": b1,
            "k2e": k2e.astype(bf16), "k2o": k2o.astype(bf16), "b2": b2,
            "f1": f1.astype(bf16), "bf1": bf1,
            "wf2": wf2.astype(bf16), "bf2": bf2}


# ---------------------------------------------------------------------------
# Forward pass (single pallas_call, grid over the two branches)
# ---------------------------------------------------------------------------

def _const_spec(shape):
    zeros = (0,) * len(shape)
    return pl.BlockSpec(tuple(shape), lambda br: zeros)


def _branch_spec(shape):
    blk = (1,) + tuple(shape[1:])
    zeros = (0,) * (len(shape) - 1)
    return pl.BlockSpec(blk, lambda br: (br,) + zeros)


def model_cpu_forward(x_nchw, params_m1, params_m2):
    B = x_nchw.shape[0]
    x = x_nchw[:, 0, :, :].astype(jnp.bfloat16)               # (B, 28, 28), Cin = 1

    c1 = _prepare_branch(params_m1)
    c2 = _prepare_branch(params_m2)
    stk = {k: jnp.stack([c1[k], c2[k]], axis=0) for k in c1}

    e24, o24 = _row_pool_selectors(24, B, interleave=False)   # (B*12, B*24)
    e8, o8 = _row_pool_selectors(8, B, interleave=True)       # (B*4,  B*8)

    in_specs = [
        _const_spec(x.shape),
        _const_spec(e24.shape), _const_spec(o24.shape),
        _const_spec(e8.shape), _const_spec(o8.shape),
        _branch_spec(stk["k1e"].shape), _branch_spec(stk["k1o"].shape),
        _branch_spec(stk["b1"].shape),
        _branch_spec(stk["k2e"].shape), _branch_spec(stk["k2o"].shape),
        _branch_spec(stk["b2"].shape),
        _branch_spec(stk["f1"].shape), _branch_spec(stk["bf1"].shape),
        _branch_spec(stk["wf2"].shape), _branch_spec(stk["bf2"].shape),
    ]
    out_spec = pl.BlockSpec((1, B, 128), lambda br: (br, 0, 0))

    out = pl.pallas_call(
        _fused_model_kernel,
        out_shape=jax.ShapeDtypeStruct((2, B, 128), jnp.float32),
        grid_spec=pltpu.PrefetchScalarGridSpec(
            num_scalar_prefetch=0,
            grid=(2,),
            in_specs=in_specs,
            out_specs=out_spec,
        ),
        compiler_params=pltpu.CompilerParams(
            dimension_semantics=("parallel",),
            vmem_limit_bytes=32 * 1024 * 1024,
        ),
    )(x, e24, o24, e8, o8,
      stk["k1e"], stk["k1o"], stk["b1"],
      stk["k2e"], stk["k2o"], stk["b2"],
      stk["f1"], stk["bf1"], stk["wf2"], stk["bf2"])

    return out[0, :, :10], out[1, :, :10]


# ---------------------------------------------------------------------------
# Pure-XLA reference (f32 HIGHEST precision) and synthetic params
# ---------------------------------------------------------------------------

def _reference_branch(x_nchw, p):
    dn = ("NCHW", "OIHW", "NCHW")
    hi = jax.lax.Precision.HIGHEST
    y = jax.lax.conv_general_dilated(x_nchw, p["conv1_w"], (1, 1), "VALID",
                                     dimension_numbers=dn, precision=hi)
    y = y + p["conv1_b"][None, :, None, None]
    y = jax.lax.reduce_window(y, -jnp.inf, jax.lax.max,
                              (1, 1, 2, 2), (1, 1, 2, 2), "VALID")
    y = jax.lax.conv_general_dilated(y, p["conv2_w"], (1, 1), "VALID",
                                     dimension_numbers=dn, precision=hi)
    y = y + p["conv2_b"][None, :, None, None]
    y = jax.lax.reduce_window(y, -jnp.inf, jax.lax.max,
                              (1, 1, 2, 2), (1, 1, 2, 2), "VALID")
    flat = y.reshape(y.shape[0], -1)
    h = jnp.dot(flat, p["fc1_w"].T, precision=hi) + p["fc1_b"]
    z = jnp.dot(h, p["fc2_w"].T, precision=hi) + p["fc2_b"]
    return jax.nn.softmax(z, axis=-1)


def init_branch_params(key):
    ks = jax.random.split(key, 8)

    def nrm(k, shape, scale):
        return scale * jax.random.normal(k, shape, dtype=jnp.float32)

    return {
        "conv1_w": nrm(ks[0], (32, 1, 5, 5), 0.10),    # OIHW (PyTorch layout)
        "conv1_b": nrm(ks[1], (32,), 0.10),
        "conv2_w": nrm(ks[2], (64, 32, 5, 5), 0.05),
        "conv2_b": nrm(ks[3], (64,), 0.05),
        "fc1_w":   nrm(ks[4], (256, 1024), 0.03),      # (out, in) (PyTorch layout)
        "fc1_b":   nrm(ks[5], (256,), 0.03),
        "fc2_w":   nrm(ks[6], (10, 256), 0.05),
        "fc2_b":   nrm(ks[7], (10,), 0.05),
    }


if __name__ == "__main__":
    root = jax.random.PRNGKey(0)
    kx, k1, k2 = jax.random.split(root, 3)

    # MNIST-like input implied by the module: 1 channel, 28x28 (flatten -> 1024)
    x = jax.random.normal(kx, (2, 1, 28, 28), dtype=jnp.float32)

    params_m1 = init_branch_params(k1)
    params_m2 = init_branch_params(k2)

    out1, out2 = jax.jit(model_cpu_forward)(x, params_m1, params_m2)
    jax.block_until_ready((out1, out2))

    assert out1.shape == (2, 10) and out2.shape == (2, 10)
    # softmax rows sum to 1 (pad lanes contribute exactly 0)
    assert bool(jnp.allclose(jnp.sum(out1, axis=-1), 1.0, atol=1e-4))
    assert bool(jnp.allclose(jnp.sum(out2, axis=-1), 1.0, atol=1e-4))

    # numerical self-check: bf16-storage / f32-accumulate kernel vs f32-HIGHEST XLA ref
    ref1 = _reference_branch(x, params_m1)
    ref2 = _reference_branch(x, params_m2)
    assert bool(jnp.allclose(out1, ref1, atol=2e-2, rtol=2e-2))
    assert bool(jnp.allclose(out2, ref2, atol=2e-2, rtol=2e-2))

    print("KERNEL_OK")
</pallas_src>

<mosaic_0001>
module attributes {stable_mosaic.version = 11 : i64} {
  func.func @_fused_model_kernel(%arg0: i32, %arg1: memref<2x28x28xbf16, #tpu.memory_space<vmem>>, %arg2: memref<24x48xbf16, #tpu.memory_space<vmem>>, %arg3: memref<24x48xbf16, #tpu.memory_space<vmem>>, %arg4: memref<8x16xbf16, #tpu.memory_space<vmem>>, %arg5: memref<8x16xbf16, #tpu.memory_space<vmem>>, %arg6: memref<1x140x384xbf16, #tpu.memory_space<vmem>>, %arg7: memref<1x140x384xbf16, #tpu.memory_space<vmem>>, %arg8: memref<1x1x384xf32, #tpu.memory_space<vmem>>, %arg9: memref<1x1920x256xbf16, #tpu.memory_space<vmem>>, %arg10: memref<1x1920x256xbf16, #tpu.memory_space<vmem>>, %arg11: memref<1x1x256xf32, #tpu.memory_space<vmem>>, %arg12: memref<1x4x256x256xbf16, #tpu.memory_space<vmem>>, %arg13: memref<1x1x256xf32, #tpu.memory_space<vmem>>, %arg14: memref<1x256x128xbf16, #tpu.memory_space<vmem>>, %arg15: memref<1x1x128xf32, #tpu.memory_space<vmem>>, %arg16: memref<1x2x128xf32, #tpu.memory_space<vmem>>) attributes {dimension_semantics = [#tpu.dimension_semantics<parallel>], iteration_bounds = array<i64: 2>, scalar_prefetch = 0 : i64, scratch_operands = 0 : i64, tpu.core_type = #tpu.core_type<tc>, window_params = [{pipeline_mode = #tpu.pipeline_mode<synchronous>, transform_indices = @transform_0, window_bounds = array<i64: 2, 28, 28>}, {pipeline_mode = #tpu.pipeline_mode<synchronous>, transform_indices = @transform_1, window_bounds = array<i64: 24, 48>}, {pipeline_mode = #tpu.pipeline_mode<synchronous>, transform_indices = @transform_2, window_bounds = array<i64: 24, 48>}, {pipeline_mode = #tpu.pipeline_mode<synchronous>, transform_indices = @transform_3, window_bounds = array<i64: 8, 16>}, {pipeline_mode = #tpu.pipeline_mode<synchronous>, transform_indices = @transform_4, window_bounds = array<i64: 8, 16>}, {transform_indices = @transform_5, window_bounds = array<i64: 1, 140, 384>}, {transform_indices = @transform_6, window_bounds = array<i64: 1, 140, 384>}, {transform_indices = @transform_7, window_bounds = array<i64: 1, 1, 384>}, {transform_indices = @transform_8, window_bounds = array<i64: 1, 1920, 256>}, {transform_indices = @transform_9, window_bounds = array<i64: 1, 1920, 256>}, {transform_indices = @transform_10, window_bounds = array<i64: 1, 1, 256>}, {transform_indices = @transform_11, window_bounds = array<i64: 1, 4, 256, 256>}, {transform_indices = @transform_12, window_bounds = array<i64: 1, 1, 256>}, {transform_indices = @transform_13, window_bounds = array<i64: 1, 256, 128>}, {transform_indices = @transform_14, window_bounds = array<i64: 1, 1, 128>}, {transform_indices = @transform_15, window_bounds = array<i64: 1, 2, 128>}]} {
    %c0 = arith.constant 0 : index
    %c0_0 = arith.constant 0 : index
    %c0_1 = arith.constant 0 : index
    %0 = vector.load %arg1[%c0, %c0_0, %c0_1] : memref<2x28x28xbf16, #tpu.memory_space<vmem>>, vector<2x28x28xbf16>
    %1 = vector.extract_strided_slice %0 {offsets = [0, 0, 0], sizes = [1, 24, 28], strides = [1, 1, 1]} : vector<2x28x28xbf16> to vector<1x24x28xbf16>
    %2 = vector.shape_cast %1 : vector<1x24x28xbf16> to vector<24x28xbf16>
    %3 = vector.extract_strided_slice %0 {offsets = [0, 1, 0], sizes = [1, 24, 28], strides = [1, 1, 1]} : vector<2x28x28xbf16> to vector<1x24x28xbf16>
    %4 = vector.shape_cast %3 : vector<1x24x28xbf16> to vector<24x28xbf16>
    %5 = vector.extract_strided_slice %0 {offsets = [0, 2, 0], sizes = [1, 24, 28], strides = [1, 1, 1]} : vector<2x28x28xbf16> to vector<1x24x28xbf16>
    %6 = vector.shape_cast %5 : vector<1x24x28xbf16> to vector<24x28xbf16>
    %7 = vector.extract_strided_slice %0 {offsets = [0, 3, 0], sizes = [1, 24, 28], strides = [1, 1, 1]} : vector<2x28x28xbf16> to vector<1x24x28xbf16>
    %8 = vector.shape_cast %7 : vector<1x24x28xbf16> to vector<24x28xbf16>
    %9 = vector.extract_strided_slice %0 {offsets = [0, 4, 0], sizes = [1, 24, 28], strides = [1, 1, 1]} : vector<2x28x28xbf16> to vector<1x24x28xbf16>
    %10 = vector.shape_cast %9 : vector<1x24x28xbf16> to vector<24x28xbf16>
    %11 = tpu.concatenate %2, %4, %6, %8, %10 in 1 : vector<24x28xbf16>, vector<24x28xbf16>, vector<24x28xbf16>, vector<24x28xbf16>, vector<24x28xbf16> -> vector<24x140xbf16>
    %12 = vector.extract_strided_slice %0 {offsets = [1, 0, 0], sizes = [1, 24, 28], strides = [1, 1, 1]} : vector<2x28x28xbf16> to vector<1x24x28xbf16>
    %13 = vector.shape_cast %12 : vector<1x24x28xbf16> to vector<24x28xbf16>
    %14 = vector.extract_strided_slice %0 {offsets = [1, 1, 0], sizes = [1, 24, 28], strides = [1, 1, 1]} : vector<2x28x28xbf16> to vector<1x24x28xbf16>
    %15 = vector.shape_cast %14 : vector<1x24x28xbf16> to vector<24x28xbf16>
    %16 = vector.extract_strided_slice %0 {offsets = [1, 2, 0], sizes = [1, 24, 28], strides = [1, 1, 1]} : vector<2x28x28xbf16> to vector<1x24x28xbf16>
    %17 = vector.shape_cast %16 : vector<1x24x28xbf16> to vector<24x28xbf16>
    %18 = vector.extract_strided_slice %0 {offsets = [1, 3, 0], sizes = [1, 24, 28], strides = [1, 1, 1]} : vector<2x28x28xbf16> to vector<1x24x28xbf16>
    %19 = vector.shape_cast %18 : vector<1x24x28xbf16> to vector<24x28xbf16>
    %20 = vector.extract_strided_slice %0 {offsets = [1, 4, 0], sizes = [1, 24, 28], strides = [1, 1, 1]} : vector<2x28x28xbf16> to vector<1x24x28xbf16>
    %21 = vector.shape_cast %20 : vector<1x24x28xbf16> to vector<24x28xbf16>
    %22 = tpu.concatenate %13, %15, %17, %19, %21 in 1 : vector<24x28xbf16>, vector<24x28xbf16>, vector<24x28xbf16>, vector<24x28xbf16>, vector<24x28xbf16> -> vector<24x140xbf16>
    %23 = tpu.concatenate %11, %22 in 0 : vector<24x140xbf16>, vector<24x140xbf16> -> vector<48x140xbf16>
    %c0_2 = arith.constant 0 : index
    %c0_3 = arith.constant 0 : index
    %c0_4 = arith.constant 0 : index
    %24 = vector.load %arg6[%c0_2, %c0_3, %c0_4] : memref<1x140x384xbf16, #tpu.memory_space<vmem>>, vector<1x140x384xbf16>
    %25 = vector.shape_cast %24 : vector<1x140x384xbf16> to vector<140x384xbf16>
    %cst = arith.constant dense<0.000000e+00> : vector<48x384xf32>
    %26 = tpu.matmul %23, %25, %cst {dimension_numbers = #tpu.dot_dimension_numbers<[1], [0], [0], [1], [0, 0, 1, 1], [], []>} : vector<48x140xbf16>, vector<140x384xbf16>, vector<48x384xf32> -> vector<48x384xf32>
    %c0_5 = arith.constant 0 : index
    %c0_6 = arith.constant 0 : index
    %c0_7 = arith.constant 0 : index
    %27 = vector.load %arg7[%c0_5, %c0_6, %c0_7] : memref<1x140x384xbf16, #tpu.memory_space<vmem>>, vector<1x140x384xbf16>
    %28 = vector.shape_cast %27 : vector<1x140x384xbf16> to vector<140x384xbf16>
    %cst_8 = arith.constant dense<0.000000e+00> : vector<48x384xf32>
    %29 = tpu.matmul %23, %28, %cst_8 {dimension_numbers = #tpu.dot_dimension_numbers<[1], [0], [0], [1], [0, 0, 1, 1], [], []>} : vector<48x140xbf16>, vector<140x384xbf16>, vector<48x384xf32> -> vector<48x384xf32>
    %30 = arith.maximumf %26, %29 : vector<48x384xf32>
    %31 = arith.truncf %30 : vector<48x384xf32> to vector<48x384xbf16>
    %c0_9 = arith.constant 0 : index
    %c0_10 = arith.constant 0 : index
    %32 = vector.load %arg2[%c0_9, %c0_10] : memref<24x48xbf16, #tpu.memory_space<vmem>>, vector<24x48xbf16>
    %cst_11 = arith.constant dense<0.000000e+00> : vector<24x384xf32>
    %33 = tpu.matmul %32, %31, %cst_11 {dimension_numbers = #tpu.dot_dimension_numbers<[1], [0], [0], [1], [0, 0, 1, 1], [], []>} : vector<24x48xbf16>, vector<48x384xbf16>, vector<24x384xf32> -> vector<24x384xf32>
    %c0_12 = arith.constant 0 : index
    %c0_13 = arith.constant 0 : index
    %34 = vector.load %arg3[%c0_12, %c0_13] : memref<24x48xbf16, #tpu.memory_space<vmem>>, vector<24x48xbf16>
    %cst_14 = arith.constant dense<0.000000e+00> : vector<24x384xf32>
    %35 = tpu.matmul %34, %31, %cst_14 {dimension_numbers = #tpu.dot_dimension_numbers<[1], [0], [0], [1], [0, 0, 1, 1], [], []>} : vector<24x48xbf16>, vector<48x384xbf16>, vector<24x384xf32> -> vector<24x384xf32>
    %36 = arith.maximumf %33, %35 : vector<24x384xf32>
    %c0_15 = arith.constant 0 : index
    %c0_16 = arith.constant 0 : index
    %c0_17 = arith.constant 0 : index
    %37 = vector.load %arg8[%c0_15, %c0_16, %c0_17] : memref<1x1x384xf32, #tpu.memory_space<vmem>>, vector<1x1x384xf32>
    %38 = vector.shape_cast %37 : vector<1x1x384xf32> to vector<1x384xf32>
    %39 = vector.broadcast %38 : vector<1x384xf32> to vector<24x384xf32>
    %40 = arith.addf %36, %39 : vector<24x384xf32>
    %41 = arith.truncf %40 : vector<24x384xf32> to vector<24x384xbf16>
    %42 = vector.extract_strided_slice %41 {offsets = [0, 0], sizes = [8, 384], strides = [1, 1]} : vector<24x384xbf16> to vector<8x384xbf16>
    %43 = vector.extract_strided_slice %41 {offsets = [12, 0], sizes = [8, 384], strides = [1, 1]} : vector<24x384xbf16> to vector<8x384xbf16>
    %44 = tpu.concatenate %42, %43 in 0 : vector<8x384xbf16>, vector<8x384xbf16> -> vector<16x384xbf16>
    %45 = vector.extract_strided_slice %41 {offsets = [1, 0], sizes = [8, 384], strides = [1, 1]} : vector<24x384xbf16> to vector<8x384xbf16>
    %46 = vector.extract_strided_slice %41 {offsets = [13, 0], sizes = [8, 384], strides = [1, 1]} : vector<24x384xbf16> to vector<8x384xbf16>
    %47 = tpu.concatenate %45, %46 in 0 : vector<8x384xbf16>, vector<8x384xbf16> -> vector<16x384xbf16>
    %48 = vector.extract_strided_slice %41 {offsets = [2, 0], sizes = [8, 384], strides = [1, 1]} : vector<24x384xbf16> to vector<8x384xbf16>
    %49 = vector.extract_strided_slice %41 {offsets = [14, 0], sizes = [8, 384], strides = [1, 1]} : vector<24x384xbf16> to vector<8x384xbf16>
    %50 = tpu.concatenate %48, %49 in 0 : vector<8x384xbf16>, vector<8x384xbf16> -> vector<16x384xbf16>
    %51 = vector.extract_strided_slice %41 {offsets = [3, 0], sizes = [8, 384], strides = [1, 1]} : vector<24x384xbf16> to vector<8x384xbf16>
    %52 = vector.extract_strided_slice %41 {offsets = [15, 0], sizes = [8, 384], strides = [1, 1]} : vector<24x384xbf16> to vector<8x384xbf16>
    %53 = tpu.concatenate %51, %52 in 0 : vector<8x384xbf16>, vector<8x384xbf16> -> vector<16x384xbf16>
    %54 = vector.extract_strided_slice %41 {offsets = [4, 0], sizes = [8, 384], strides = [1, 1]} : vector<24x384xbf16> to vector<8x384xbf16>
    %55 = vector.extract_strided_slice %41 {offsets = [16, 0], sizes = [8, 384], strides = [1, 1]} : vector<24x384xbf16> to vector<8x384xbf16>
    %56 = tpu.concatenate %54, %55 in 0 : vector<8x384xbf16>, vector<8x384xbf16> -> vector<16x384xbf16>
    %57 = tpu.concatenate %44, %47, %50, %53, %56 in 1 : vector<16x384xbf16>, vector<16x384xbf16>, vector<16x384xbf16>, vector<16x384xbf16>, vector<16x384xbf16> -> vector<16x1920xbf16>
    %c0_18 = arith.constant 0 : index
    %c0_19 = arith.constant 0 : index
    %c0_20 = arith.constant 0 : index
    %58 = vector.load %arg9[%c0_18, %c0_19, %c0_20] : memref<1x1920x256xbf16, #tpu.memory_space<vmem>>, vector<1x1920x256xbf16>
    %59 = vector.shape_cast %58 : vector<1x1920x256xbf16> to vector<1920x256xbf16>
    %cst_21 = arith.constant dense<0.000000e+00> : vector<16x256xf32>
    %60 = tpu.matmul %57, %59, %cst_21 {dimension_numbers = #tpu.dot_dimension_numbers<[1], [0], [0], [1], [0, 0, 1, 1], [], []>} : vector<16x1920xbf16>, vector<1920x256xbf16>, vector<16x256xf32> -> vector<16x256xf32>
    %c0_22 = arith.constant 0 : index
    %c0_23 = arith.constant 0 : index
    %c0_24 = arith.constant 0 : index
    %61 = vector.load %arg10[%c0_22, %c0_23, %c0_24] : memref<1x1920x256xbf16, #tpu.memory_space<vmem>>, vector<1x1920x256xbf16>
    %62 = vector.shape_cast %61 : vector<1x1920x256xbf16> to vector<1920x256xbf16>
    %cst_25 = arith.constant dense<0.000000e+00> : vector<16x256xf32>
    %63 = tpu.matmul %57, %62, %cst_25 {dimension_numbers = #tpu.dot_dimension_numbers<[1], [0], [0], [1], [0, 0, 1, 1], [], []>} : vector<16x1920xbf16>, vector<1920x256xbf16>, vector<16x256xf32> -> vector<16x256xf32>
    %64 = arith.maximumf %60, %63 : vector<16x256xf32>
    %65 = arith.truncf %64 : vector<16x256xf32> to vector<16x256xbf16>
    %c0_26 = arith.constant 0 : index
    %c0_27 = arith.constant 0 : index
    %66 = vector.load %arg4[%c0_26, %c0_27] : memref<8x16xbf16, #tpu.memory_space<vmem>>, vector<8x16xbf16>
    %cst_28 = arith.constant dense<0.000000e+00> : vector<8x256xf32>
    %67 = tpu.matmul %66, %65, %cst_28 {dimension_numbers = #tpu.dot_dimension_numbers<[1], [0], [0], [1], [0, 0, 1, 1], [], []>} : vector<8x16xbf16>, vector<16x256xbf16>, vector<8x256xf32> -> vector<8x256xf32>
    %c0_29 = arith.constant 0 : index
    %c0_30 = arith.constant 0 : index
    %68 = vector.load %arg5[%c0_29, %c0_30] : memref<8x16xbf16, #tpu.memory_space<vmem>>, vector<8x16xbf16>
    %cst_31 = arith.constant dense<0.000000e+00> : vector<8x256xf32>
    %69 = tpu.matmul %68, %65, %cst_31 {dimension_numbers = #tpu.dot_dimension_numbers<[1], [0], [0], [1], [0, 0, 1, 1], [], []>} : vector<8x16xbf16>, vector<16x256xbf16>, vector<8x256xf32> -> vector<8x256xf32>
    %70 = arith.maximumf %67, %69 : vector<8x256xf32>
    %c0_32 = arith.constant 0 : index
    %c0_33 = arith.constant 0 : index
    %c0_34 = arith.constant 0 : index
    %71 = vector.load %arg11[%c0_32, %c0_33, %c0_34] : memref<1x1x256xf32, #tpu.memory_space<vmem>>, vector<1x1x256xf32>
    %72 = vector.shape_cast %71 : vector<1x1x256xf32> to vector<1x256xf32>
    %73 = vector.broadcast %72 : vector<1x256xf32> to vector<8x256xf32>
    %74 = arith.addf %70, %73 : vector<8x256xf32>
    %75 = arith.truncf %74 : vector<8x256xf32> to vector<8x256xbf16>
    %76 = vector.extract_strided_slice %75 {offsets = [0, 0], sizes = [2, 256], strides = [1, 1]} : vector<8x256xbf16> to vector<2x256xbf16>
    %c0_35 = arith.constant 0 : index
    %c0_36 = arith.constant 0 : index
    %c0_37 = arith.constant 0 : index
    %c0_38 = arith.constant 0 : index
    %77 = vector.load %arg12[%c0_35, %c0_36, %c0_37, %c0_38] : memref<1x4x256x256xbf16, #tpu.memory_space<vmem>>, vector<1x1x256x256xbf16>
    %78 = vector.shape_cast %77 : vector<1x1x256x256xbf16> to vector<256x256xbf16>
    %cst_39 = arith.constant dense<0.000000e+00> : vector<2x256xf32>
    %79 = tpu.matmul %76, %78, %cst_39 {dimension_numbers = #tpu.dot_dimension_numbers<[1], [0], [0], [1], [0, 0, 1, 1], [], []>} : vector<2x256xbf16>, vector<256x256xbf16>, vector<2x256xf32> -> vector<2x256xf32>
    %80 = vector.extract_strided_slice %75 {offsets = [2, 0], sizes = [2, 256], strides = [1, 1]} : vector<8x256xbf16> to vector<2x256xbf16>
    %c0_40 = arith.constant 0 : index
    %c1 = arith.constant 1 : index
    %c0_41 = arith.constant 0 : index
    %c0_42 = arith.constant 0 : index
    %81 = vector.load %arg12[%c0_40, %c1, %c0_41, %c0_42] : memref<1x4x256x256xbf16, #tpu.memory_space<vmem>>, vector<1x1x256x256xbf16>
    %82 = vector.shape_cast %81 : vector<1x1x256x256xbf16> to vector<256x256xbf16>
    %cst_43 = arith.constant dense<0.000000e+00> : vector<2x256xf32>
    %83 = tpu.matmul %80, %82, %cst_43 {dimension_numbers = #tpu.dot_dimension_numbers<[1], [0], [0], [1], [0, 0, 1, 1], [], []>} : vector<2x256xbf16>, vector<256x256xbf16>, vector<2x256xf32> -> vector<2x256xf32>
    %84 = arith.addf %79, %83 : vector<2x256xf32>
    %85 = vector.extract_strided_slice %75 {offsets = [4, 0], sizes = [2, 256], strides = [1, 1]} : vector<8x256xbf16> to vector<2x256xbf16>
    %c0_44 = arith.constant 0 : index
    %c2 = arith.constant 2 : index
    %c0_45 = arith.constant 0 : index
    %c0_46 = arith.constant 0 : index
    %86 = vector.load %arg12[%c0_44, %c2, %c0_45, %c0_46] : memref<1x4x256x256xbf16, #tpu.memory_space<vmem>>, vector<1x1x256x256xbf16>
    %87 = vector.shape_cast %86 : vector<1x1x256x256xbf16> to vector<256x256xbf16>
    %cst_47 = arith.constant dense<0.000000e+00> : vector<2x256xf32>
    %88 = tpu.matmul %85, %87, %cst_47 {dimension_numbers = #tpu.dot_dimension_numbers<[1], [0], [0], [1], [0, 0, 1, 1], [], []>} : vector<2x256xbf16>, vector<256x256xbf16>, vector<2x256xf32> -> vector<2x256xf32>
    %89 = arith.addf %84, %88 : vector<2x256xf32>
    %90 = vector.extract_strided_slice %75 {offsets = [6, 0], sizes = [2, 256], strides = [1, 1]} : vector<8x256xbf16> to vector<2x256xbf16>
    %c0_48 = arith.constant 0 : index
    %c3 = arith.constant 3 : index
    %c0_49 = arith.constant 0 : index
    %c0_50 = arith.constant 0 : index
    %91 = vector.load %arg12[%c0_48, %c3, %c0_49, %c0_50] : memref<1x4x256x256xbf16, #tpu.memory_space<vmem>>, vector<1x1x256x256xbf16>
    %92 = vector.shape_cast %91 : vector<1x1x256x256xbf16> to vector<256x256xbf16>
    %cst_51 = arith.constant dense<0.000000e+00> : vector<2x256xf32>
    %93 = tpu.matmul %90, %92, %cst_51 {dimension_numbers = #tpu.dot_dimension_numbers<[1], [0], [0], [1], [0, 0, 1, 1], [], []>} : vector<2x256xbf16>, vector<256x256xbf16>, vector<2x256xf32> -> vector<2x256xf32>
    %94 = arith.addf %89, %93 : vector<2x256xf32>
    %c0_52 = arith.constant 0 : index
    %c0_53 = arith.constant 0 : index
    %c0_54 = arith.constant 0 : index
    %95 = vector.load %arg13[%c0_52, %c0_53, %c0_54] : memref<1x1x256xf32, #tpu.memory_space<vmem>>, vector<1x1x256xf32>
    %96 = vector.shape_cast %95 : vector<1x1x256xf32> to vector<1x256xf32>
    %97 = vector.broadcast %96 : vector<1x256xf32> to vector<2x256xf32>
    %98 = arith.addf %94, %97 : vector<2x256xf32>
    %99 = arith.truncf %98 : vector<2x256xf32> to vector<2x256xbf16>
    %c0_55 = arith.constant 0 : index
    %c0_56 = arith.constant 0 : index
    %c0_57 = arith.constant 0 : index
    %100 = vector.load %arg14[%c0_55, %c0_56, %c0_57] : memref<1x256x128xbf16, #tpu.memory_space<vmem>>, vector<1x256x128xbf16>
    %101 = vector.shape_cast %100 : vector<1x256x128xbf16> to vector<256x128xbf16>
    %cst_58 = arith.constant dense<0.000000e+00> : vector<2x128xf32>
    %102 = tpu.matmul %99, %101, %cst_58 {dimension_numbers = #tpu.dot_dimension_numbers<[1], [0], [0], [1], [0, 0, 1, 1], [], []>} : vector<2x256xbf16>, vector<256x128xbf16>, vector<2x128xf32> -> vector<2x128xf32>
    %c0_59 = arith.constant 0 : index
    %c0_60 = arith.constant 0 : index
    %c0_61 = arith.constant 0 : index
    %103 = vector.load %arg15[%c0_59, %c0_60, %c0_61] : memref<1x1x128xf32, #tpu.memory_space<vmem>>, vector<1x1x128xf32>
    %104 = vector.shape_cast %103 : vector<1x1x128xf32> to vector<1x128xf32>
    %105 = vector.broadcast %104 : vector<1x128xf32> to vector<2x128xf32>
    %106 = arith.addf %102, %105 : vector<2x128xf32>
    %cst_62 = arith.constant dense<0xFF800000> : vector<2xf32>
    %107 = vector.multi_reduction <maximumf>, %106, %cst_62 [1] : vector<2x128xf32> to vector<2xf32>
    %108 = vector.shape_cast %107 : vector<2xf32> to vector<2x1xf32>
    %109 = vector.broadcast %108 : vector<2x1xf32> to vector<2x128xf32>
    %110 = arith.subf %106, %109 : vector<2x128xf32>
    %111 = math.exp %110 : vector<2x128xf32>
    %cst_63 = arith.constant dense<0.000000e+00> : vector<2xf32>
    %112 = vector.multi_reduction <add>, %111, %cst_63 [1] : vector<2x128xf32> to vector<2xf32>
    %113 = vector.shape_cast %112 : vector<2xf32> to vector<2x1xf32>
    %114 = vector.broadcast %113 : vector<2x1xf32> to vector<2x128xf32>
    %115 = arith.divf %111, %114 : vector<2x128xf32>
    %c0_64 = arith.constant 0 : index
    %c0_65 = arith.constant 0 : index
    %c0_66 = arith.constant 0 : index
    %116 = vector.load %arg16[%c0_64, %c0_65, %c0_66] : memref<1x2x128xf32, #tpu.memory_space<vmem>>, vector<1x2x128xf32>
    %117 = vector.shape_cast %116 : vector<1x2x128xf32> to vector<2x128xf32>
    %118 = vector.shape_cast %115 : vector<2x128xf32> to vector<1x2x128xf32>
    tpu.vector_store %arg16[%c0_64, %c0_65, %c0_66], %118 {strides = array<i32>} : memref<1x2x128xf32, #tpu.memory_space<vmem>>, vector<1x2x128xf32>,
    return
  }
  func.func @transform_0(%arg0: i32) -> (i32, i32, i32) {
    %c0_i32 = arith.constant 0 : i32
    %c0_i32_0 = arith.constant 0 : i32
    %c0_i32_1 = arith.constant 0 : i32
    %c0_i32_2 = arith.constant 0 : i32
    return %c0_i32, %c0_i32_0, %c0_i32_1 : i32, i32, i32
  }
  func.func @transform_1(%arg0: i32) -> (i32, i32) {
    %c0_i32 = arith.constant 0 : i32
    %c0_i32_0 = arith.constant 0 : i32
    %c0_i32_1 = arith.constant 0 : i32
    return %c0_i32, %c0_i32_0 : i32, i32
  }
  func.func @transform_2(%arg0: i32) -> (i32, i32) {
    %c0_i32 = arith.constant 0 : i32
    %c0_i32_0 = arith.constant 0 : i32
    %c0_i32_1 = arith.constant 0 : i32
    return %c0_i32, %c0_i32_0 : i32, i32
  }
  func.func @transform_3(%arg0: i32) -> (i32, i32) {
    %c0_i32 = arith.constant 0 : i32
    %c0_i32_0 = arith.constant 0 : i32
    %c0_i32_1 = arith.constant 0 : i32
    return %c0_i32, %c0_i32_0 : i32, i32
  }
  func.func @transform_4(%arg0: i32) -> (i32, i32) {
    %c0_i32 = arith.constant 0 : i32
    %c0_i32_0 = arith.constant 0 : i32
    %c0_i32_1 = arith.constant 0 : i32
    return %c0_i32, %c0_i32_0 : i32, i32
  }
  func.func @transform_5(%arg0: i32) -> (i32, i32, i32) {
    %c0_i32 = arith.constant 0 : i32
    %c0_i32_0 = arith.constant 0 : i32
    %c0_i32_1 = arith.constant 0 : i32
    return %arg0, %c0_i32, %c0_i32_0 : i32, i32, i32
  }
  func.func @transform_6(%arg0: i32) -> (i32, i32, i32) {
    %c0_i32 = arith.constant 0 : i32
    %c0_i32_0 = arith.constant 0 : i32
    %c0_i32_1 = arith.constant 0 : i32
    return %arg0, %c0_i32, %c0_i32_0 : i32, i32, i32
  }
  func.func @transform_7(%arg0: i32) -> (i32, i32, i32) {
    %c0_i32 = arith.constant 0 : i32
    %c0_i32_0 = arith.constant 0 : i32
    %c0_i32_1 = arith.constant 0 : i32
    return %arg0, %c0_i32, %c0_i32_0 : i32, i32, i32
  }
  func.func @transform_8(%arg0: i32) -> (i32, i32, i32) {
    %c0_i32 = arith.constant 0 : i32
    %c0_i32_0 = arith.constant 0 : i32
    %c0_i32_1 = arith.constant 0 : i32
    return %arg0, %c0_i32, %c0_i32_0 : i32, i32, i32
  }
  func.func @transform_9(%arg0: i32) -> (i32, i32, i32) {
    %c0_i32 = arith.constant 0 : i32
    %c0_i32_0 = arith.constant 0 : i32
    %c0_i32_1 = arith.constant 0 : i32
    return %arg0, %c0_i32, %c0_i32_0 : i32, i32, i32
  }
  func.func @transform_10(%arg0: i32) -> (i32, i32, i32) {
    %c0_i32 = arith.constant 0 : i32
    %c0_i32_0 = arith.constant 0 : i32
    %c0_i32_1 = arith.constant 0 : i32
    return %arg0, %c0_i32, %c0_i32_0 : i32, i32, i32
  }
  func.func @transform_11(%arg0: i32) -> (i32, i32, i32, i32) {
    %c0_i32 = arith.constant 0 : i32
    %c0_i32_0 = arith.constant 0 : i32
    %c0_i32_1 = arith.constant 0 : i32
    %c0_i32_2 = arith.constant 0 : i32
    return %arg0, %c0_i32, %c0_i32_0, %c0_i32_1 : i32, i32, i32, i32
  }
  func.func @transform_12(%arg0: i32) -> (i32, i32, i32) {
    %c0_i32 = arith.constant 0 : i32
    %c0_i32_0 = arith.constant 0 : i32
    %c0_i32_1 = arith.constant 0 : i32
    return %arg0, %c0_i32, %c0_i32_0 : i32, i32, i32
  }
  func.func @transform_13(%arg0: i32) -> (i32, i32, i32) {
    %c0_i32 = arith.constant 0 : i32
    %c0_i32_0 = arith.constant 0 : i32
    %c0_i32_1 = arith.constant 0 : i32
    return %arg0, %c0_i32, %c0_i32_0 : i32, i32, i32
  }
  func.func @transform_14(%arg0: i32) -> (i32, i32, i32) {
    %c0_i32 = arith.constant 0 : i32
    %c0_i32_0 = arith.constant 0 : i32
    %c0_i32_1 = arith.constant 0 : i32
    return %arg0, %c0_i32, %c0_i32_0 : i32, i32, i32
  }
  func.func @transform_15(%arg0: i32) -> (i32, i32, i32) {
    %c0_i32 = arith.constant 0 : i32
    %c0_i32_0 = arith.constant 0 : i32
    %c0_i32_1 = arith.constant 0 : i32
    return %arg0, %c0_i32, %c0_i32_0 : i32, i32, i32
  }
}

</mosaic_0001>

<bundles_post_ra>
// kernel: tile.27
= control target key start
LH: loop header
LB: loop body
LE: loop exit
PB: predicated region body
PF: predicated region fallthrough
CT: control target
= control target key end

     0   :  { %s22_s0 = inlined_call_operand.vmem [shape: f32[64], index: 0, kind: input, shape index: {}]   ;;  %s23_s1 = inlined_call_operand.vmem [shape: f32[4,64], index: 1, kind: output, shape index: {}]  }
   0x1   :  { %v4_v0 = vld [vmem:[%s22_s0] ss:$0 sm:$0xff] }
   0x2   :  { %5 = vst [vmem:[%s23_s1] sm:$0xf] %v4_v0 }

// kernel: tile.38
= control target key start
LH: loop header
LB: loop body
LE: loop exit
PB: predicated region body
PF: predicated region fallthrough
CT: control target
= control target key end

     0   :  { %s7_s8 = smov 3  ;;  %vm9_vm0 = vcmask 523264   ;;  %s34_s9 = smov 64   ;;  %vm16_vm1 = vcmask 1048064   ;;  %s54_s0 = inlined_call_operand.vmem [shape: f32[4,64], index: 0, kind: input, shape index: {}]   ;;  %s55_s1 = inlined_call_operand.vmem [shape: f32[1,1,256], index: 1, kind: output, shape index: {}]  }
   0x1   :  { %v5_v0 = vld [vmem:[%s54_s0] sm:$0xf]  ;;  %s12_s0 = smov 3 }
   0x2   :  { %6 = vst [vmem:[#allocation1] sm:$0xf] %v5_v0 }
   0x9   :  { %v13_v1 = vld [vmem:[#allocation1 + $0x1] ss:$2 sm:%s12_s0]   ;;  %v8_v2 = vld [vmem:[#allocation1] ss:$2 sm:%s7_s8]  }
   0xa   :  { %14 = vrot.lane.b32.xlu0 %v13_v1, %s34_s9  ;;  %10 = vst.msk [vmem:[#allocation0] ss:$8 sm:$0x3] %vm9_vm0, %v8_v2  }
  0x7c   :  { %v15_v3 = vpop.permute.xlu0 %14  }
  0x7d   :  { %17 = vst.msk [vmem:[#allocation0] ss:$8 sm:$0x3] %vm16_vm1, %v15_v3  }
  0x84   :  { %v22_v4 = vld [vmem:[#allocation0] sm:$0x1]  ;;  %v27_v5 = vld [vmem:[#allocation0 + $0x8] sm:$0x1] }
  0x85   :  { %25 = vst [vmem:[%s55_s1] sm:$0x1] %v22_v4  ;;  %32 = vst [vmem:[%s55_s1 + $0x1] sm:$0x1] %v27_v5 }

// kernel: tile.23
= control target key start
LH: loop header
LB: loop body
LE: loop exit
PB: predicated region body
PF: predicated region fallthrough
CT: control target
= control target key end

     0   :  { %s28_s0 = inlined_call_operand.vmem [shape: f32[32], index: 0, kind: input, shape index: {}]   ;;  %s29_s1 = inlined_call_operand.vmem [shape: f32[12,32], index: 1, kind: output, shape index: {}]  }
   0x1   :  { %v4_v0 = vld [vmem:[%s28_s0] ss:$0 sm:$0xff] }
   0x2   :  { %5 = vst [vmem:[%s29_s1] sm:$0xff] %v4_v0  ;;  %8 = vst [vmem:[%s29_s1 + $0x8] sm:$0xff] %v4_v0 }

// kernel: tile.36
= control target key start
LH: loop header
LB: loop body
LE: loop exit
PB: predicated region body
PF: predicated region fallthrough
CT: control target
= control target key end

     0   :  { %s53_s8 = smov 96   ;;  %vm3_vm0 = vcmask 261120   ;;  %s55_s15 = smov 64   ;;  %vm9_vm1 = vcmask 1048320   ;;  %vm15_vm2 = vcmask 785920   ;;  %vm21_vm3 = vcmask 523520   ;;  %s87_s0 = inlined_call_operand.vmem [shape: f32[12,32], index: 0, kind: input, shape index: {}]   ;;  %s88_s1 = inlined_call_operand.vmem [shape: f32[1,1,384], index: 1, kind: output, shape index: {}]  }
   0x1   :  { %v45_v0 = vld [vmem:[%s87_s0 + $0x3] ss:$4 sm:$0x7]   ;;  %v46_v1 = vld [vmem:[%s87_s0 + $0x2] ss:$4 sm:$0x7]  }
   0x2   :  { %7 = vrot.lane.b32.xlu0 %v45_v0, %s53_s8  ;;  %v47_v2 = vld [vmem:[%s87_s0 + $0x1] ss:$4 sm:$0x7]   ;;  %v2_v3 = vld [vmem:[%s87_s0] ss:$4 sm:$0x7]  }
   0x3   :  { %s54_s0 = smov 32   ;;  %4 = vst.msk [vmem:[#allocation0] ss:$8 sm:$0x7] %vm3_vm0, %v2_v3  }
   0x4   :  { %19 = vrot.lane.b32.xlu1 %v47_v2, %s54_s0 }
   0x6   :  { %13 = vrot.lane.b32.xlu0 %v46_v1, %s55_s15 }
  0x74   :  { %v8_v4 = vpop.permute.xlu0 %7  }
  0x75   :  { %10 = vst.msk [vmem:[#allocation0] ss:$8 sm:$0x7] %vm9_vm1, %v8_v4  }
  0x76   :  { %v20_v5 = vpop.permute.xlu1 %19  }
  0x78   :  { %v14_v6 = vpop.permute.xlu0 %13  }
  0x79   :  { %16 = vst.msk [vmem:[#allocation0] ss:$8 sm:$0x7] %vm15_vm2, %v14_v6  }
  0x7a   :  { %22 = vst.msk [vmem:[#allocation0] ss:$8 sm:$0x7] %vm21_vm3, %v20_v5  }
  0x81   :  { %v27_v7 = vld [vmem:[#allocation0] sm:$0x1]  ;;  %v32_v8 = vld [vmem:[#allocation0 + $0x8] sm:$0x1]  ;;  %v38_v9 = vld [vmem:[#allocation0 + $0x10] sm:$0x1] }
  0x82   :  { %30 = vst [vmem:[%s88_s1] sm:$0x1] %v27_v7  ;;  %48 = vst [vmem:[%s88_s1 + $0x1] sm:$0x1] %v32_v8 }
  0x83   :  { %49 = vst [vmem:[%s88_s1 + $0x2] sm:$0x1] %v38_v9 }

// kernel: model_cpu_forward.1
= control target key start
LH: loop header
LB: loop body
LE: loop exit
PB: predicated region body
PF: predicated region fallthrough
CT: control target
= control target key end

     0   :  { %s8933_s18 = smov 0   ;;  %s10159_s0 = inlined_call_operand.vmem [shape: bf16[2,28,28], index: 0, kind: input, shape index: {}]   ;;  %s10160_s1 = inlined_call_operand.vmem [shape: bf16[24,48], index: 1, kind: input, shape index: {}]   ;;  %s10161_s2 = inlined_call_operand.vmem [shape: bf16[24,48], index: 2, kind: input, shape index: {}]   ;;  %s10162_s3 = inlined_call_operand.vmem [shape: bf16[8,16], index: 3, kind: input, shape index: {}]   ;;  %s10163_s4 = inlined_call_operand.vmem [shape: bf16[8,16], index: 4, kind: input, shape index: {}]   ;;  %s10164_s5 = inlined_call_operand.vmem [shape: bf16[2,140,384], index: 5, kind: input, shape index: {}]   ;;  %s10165_s6 = inlined_call_operand.vmem [shape: bf16[2,140,384], index: 6, kind: input, shape index: {}]   ;;  %s10166_s7 = inlined_call_operand.vmem [shape: f32[2,1,384], index: 7, kind: input, shape index: {}]   ;;  %s10167_s8 = inlined_call_operand.vmem [shape: bf16[2,1920,256], index: 8, kind: input, shape index: {}]   ;;  %s10168_s9 = inlined_call_operand.vmem [shape: bf16[2,1920,256], index: 9, kind: input, shape index: {}]   ;;  %s10169_s10 = inlined_call_operand.vmem [shape: f32[2,1,256], index: 10, kind: input, shape index: {}]   ;;  %s10170_s11 = inlined_call_operand.vmem [shape: bf16[2,4,256,256], index: 11, kind: input, shape index: {}]   ;;  %s10171_s12 = inlined_call_operand.vmem [shape: f32[2,1,256], index: 12, kind: input, shape index: {}]   ;;  %s10172_s13 = inlined_call_operand.vmem [shape: bf16[2,256,128], index: 13, kind: input, shape index: {}]   ;;  %s10173_s14 = inlined_call_operand.vmem [shape: f32[2,1,128], index: 14, kind: input, shape index: {}]   ;;  %s10174_s15 = inlined_call_operand.vmem [shape: f32[2,2,128], index: 15, kind: output, shape index: {}]  }
   0x1 LB: > { %s6927_s19 = sadd.s32 4294967295, %s8846_s18   ;;  %p6931_p0 = scmp.ge.s32.totalorder %s8846_s18, 1  ;;  %s8846_s18 = sphi %s8933_s18, %s25_s18  }
   0x2   : > { %p522_p1 = scmp.lt.s32.totalorder %s8846_s18, 3 }
   0x4   : > { %p523_p2 = pnand %p6931_p0, %p522_p1 }
   0x6   : > { %526 = sbr.rel (%p523_p2) target bundleno = 2258 (0x8d2), region = 80 }
   0xb   : > { %v661_v0 = vld [vmem:[%s10159_s0 + $0x8] sm:$0xf]  ;;  %v662_v1 = vld [vmem:[%s10159_s0 + $0xc] sm:$0x3]  ;;  %v8950_v2 = vld [vmem:[%s10159_s0] sm:$0xff]   ;;  %vm698_vm2 = vcmask 1046528  }
   0xc   : > { %v8952_v3 = vcombine.low %v661_v0, %v662_v1  ;;  %vm706_vm0 = vsmask.f32 6400  ;;  %vm678_vm1 = vsmask.f32 7424  ;;  %v680_v4 = vshrl.u32 %v8950_v2, 16  ;;  %v8963_v10 = vld [vmem:[%s10159_s0 + $0x10] sm:$0xff]  }
   0xd   : > { %v682_v5 = vshll.u32 %v8950_v2, 16  ;;  %v719_v6 = vrot.slane %v8950_v2, 2  ;;  %v699_v9 = vrot.slane %v8950_v2, 1  ;;  %v665_v18 = vld [vmem:[%s10159_s0 + $0x18] sm:$0xf]  ;;  %p609_p3 = scmp.lt.s32.totalorder %s6927_s19, 1 }
   0xe   : > { %v687_v7 = vshll.u32 %v8952_v3, 16  ;;  %v691_v8 = vshrl.u32 %v8952_v3, 16  ;;  %v707_v11 = vrot.slane %v680_v4, 1  ;;  %v700_v14 = vrot.slane %v8952_v3, 1  ;;  %v666_v22 = vld [vmem:[%s10159_s0 + $0x1c] sm:$0x3] }
   0xf   : > { %v708_v12 = vrot.slane %v682_v5, 2  ;;  %v684_v13 = vrot.slane %v682_v5, 1  ;;  %v720_v21 = vrot.slane %v8952_v3, 2  ;;  %v760_v23 = vshrl.u32 %v8963_v10, 16  ;;  %s10200_s19 = smov (!%p609_p3, %s6927_s19), 1  ;;  %s8848_s17 = smov 28  }
  0x10   : > { %v710_v15 = vrot.slane %v691_v8, 1  ;;  %v711_v16 = vrot.slane %v687_v7, 2  ;;  %v689_v17 = vrot.slane %v687_v7, 1  ;;  %v8980_v25 = vcombine.low %v665_v18, %v666_v22  ;;  %s7808_s20 = smul.u32 216, %s10200_s19  ;;  %s8850_s21 = smov 84  }
  0x11   : > { %v709_v19 = vor.u32 %v708_v12, %v707_v11  ;;  %v685_v20 = vor.u32 %v684_v13, %v680_v4  ;;  %v762_v26 = vshll.u32 %v8963_v10, 16  ;;  %vm718_vm3 = vcmask 1045504   ;;  %s8851_s25 = smov 56   ;;  %s8852_s26 = smov 112  }
  0x12   : > { %v8978_v24 = vor.u32 %v711_v16, %v710_v15  ;;  %v778_v28 = vrot.slane %v8963_v10, 1  ;;  %v701_v30 = vsel %vm698_vm2, %v699_v9, %v700_v14  ;;  %v767_v32 = vshll.u32 %v8980_v25, 16  ;;  %s9009_s24 = scalar_lea.vmem %s10164_s5, %s7808_s20  ;;  %s9062_s29 = scalar_lea.vmem %s10165_s6, %s7808_s20 }
  0x13   : > { %v690_v27 = vsel %vm678_vm1, %v685_v20, %v689_v17  ;;  %v764_v31 = vrot.slane %v762_v26, 1  ;;  %v8849_v33 = vmov 0   ;;  %v779_v34 = vrot.slane %v8980_v25, 1  ;;  %v7828_v43 = vld [vmem:[%s9009_s24 + $0xac] ss:$12 sps:$4 sm:$0xff]   ;;  %s7810_s30 = smul.u32 1920, %s10200_s19 }
  0x14   : > { %v713_v29 = vsel %vm706_vm0, %v709_v19, %v8978_v24  ;;  %694 = vrot.lane.b32.xlu0 %v690_v27, %s8848_s17  ;;  %1094 = vmatprep.subr.bf16.mxu1 %v8849_v33  ;;  %v771_v35 = vshrl.u32 %v8980_v25, 16  ;;  %v785_v36 = vrot.slane %v760_v23, 1  ;;  %v786_v37 = vrot.slane %v762_v26, 2  ;;  %v7830_v44 = vld [vmem:[%s9009_s24 + $0xa8] ss:$12 sps:$4 sm:$0xff]   ;;  %s7754_s28 = sshll.u32 %s10200_s19, 10 }
  0x15   : > { %714 = vrot.lane.b32.xlu1 %v713_v29, %s8850_s21  ;;  %v721_v38 = vsel %vm718_vm3, %v719_v6, %v720_v21  ;;  %v765_v39 = vor.u32 %v764_v31, %v760_v23  ;;  %v769_v40 = vrot.slane %v767_v32, 1  ;;  %v789_v41 = vrot.slane %v767_v32, 2  ;;  %1031 = vmatprep.subr.bf16.mxu0 %v7828_v43  ;;  %v7831_v46 = vld [vmem:[%s9009_s24 + $0xb0] ss:$12 sps:$4 sm:$0xff]   ;;  %v7832_v50 = vld [vmem:[%s9009_s24 + $0x94] ss:$12 sps:$4 sm:$0xff]   ;;  %s9093_s20 = scalar_lea.vmem %s10167_s8, %s7810_s30  ;;  %s9117_s23 = scalar_lea.vmem %s10168_s9, %s7810_s30 }
  0x16   : > { %v788_v42 = vrot.slane %v771_v35, 1  ;;  %v780_v47 = vsel %vm698_vm2, %v778_v28, %v779_v34  ;;  %v787_v48 = vor.u32 %v786_v37, %v785_v36  ;;  %1032 = vmatpush1.bf16.msra.mxu0 %v7830_v44  ;;  %v7834_v51 = vld [vmem:[%s9009_s24 + $0x90] ss:$12 sps:$4 sm:$0xff]   ;;  %1095 = vmatpush1.bf16.msra.mxu1 %v7831_v46  ;;  %v7835_v52 = vld [vmem:[%s9009_s24 + $0x98] ss:$12 sps:$4 sm:$0xff]   ;;  %v693_v53 = vor.u32 %v691_v8, %v689_v17  ;;  %s9196_s16 = scalar_lea.vmem %s10170_s11, %s7754_s28 }
  0x17   : > { %v770_v45 = vsel %vm678_vm1, %v765_v39, %v769_v40  ;;  %1033 = vmatprep.subr.bf16.mxu0 %v7832_v50  ;;  %v7836_v54 = vld [vmem:[%s9009_s24 + $0x7c] ss:$12 sps:$4 sm:$0xff]   ;;  %1096 = vmatprep.subr.bf16.mxu1 %v8849_v33  ;;  %v7838_v55 = vld [vmem:[%s9009_s24 + $0x78] ss:$12 sps:$4 sm:$0xff]   ;;  %v796_v57 = vrot.slane %v8963_v10, 2  ;;  %v797_v58 = vrot.slane %v8980_v25, 2  ;;  %v773_v6 = vor.u32 %v771_v35, %v769_v40 }
  0x18   : > { %702 = vrot.lane.b32.xlu0 %v701_v30, %s8851_s25  ;;  %v790_v49 = vor.u32 %v789_v41, %v788_v42  ;;  %v7839_v59 = vld [vmem:[%s9009_s24 + $0x80] ss:$12 sps:$4 sm:$0xff]   ;;  %v7840_v60 = vld [vmem:[%s9009_s24 + $0x64] ss:$12 sps:$4 sm:$0xff]   ;;  %v7843_v63 = vld [vmem:[%s9009_s24 + $0x68] ss:$12 sps:$4 sm:$0xff]  }
  0x19   : > { %722 = vrot.lane.b32.xlu1 %v721_v38, %s8852_s26  ;;  %v798_v61 = vsel %vm718_vm3, %v796_v57, %v797_v58  ;;  %v7842_v62 = vld [vmem:[%s9009_s24 + $0x60] ss:$12 sps:$4 sm:$0xff]   ;;  %v7846_v1 = vld [vmem:[%s9009_s24 + $0x48] ss:$12 sps:$4 sm:$0xff]   ;;  %v7847_v4 = vld [vmem:[%s9009_s24 + $0x50] ss:$12 sps:$4 sm:$0xff]  }
  0x1a   : > { %v791_v56 = vsel %vm706_vm0, %v787_v48, %v790_v49  ;;  %1034 = vmatpush1.bf16.msra.mxu0 %v7834_v51  ;;  %1097 = vmatpush1.bf16.msra.mxu1 %v7835_v52  ;;  %v7844_v0 = vld [vmem:[%s9009_s24 + $0x4c] ss:$12 sps:$4 sm:$0xff]   ;;  %v7848_v5 = vld [vmem:[%s9009_s24 + $0x34] ss:$12 sps:$4 sm:$0xff]   ;;  %v7850_v7 = vld [vmem:[%s9009_s24 + $0x30] ss:$12 sps:$4 sm:$0xff]  }
  0x1b   : > { %1035 = vmatprep.subr.bf16.mxu0 %v7836_v54  ;;  %1098 = vmatprep.subr.bf16.mxu1 %v8849_v33  ;;  %v7851_v8 = vld [vmem:[%s9009_s24 + $0x38] ss:$12 sps:$4 sm:$0xff]   ;;  %v7852_v9 = vld [vmem:[%s9009_s24 + $0x1c] ss:$12 sps:$4 sm:$0xff]   ;;  %v7855_v11 = vld [vmem:[%s9009_s24 + $0x20] ss:$12 sps:$4 sm:$0xff]  }
  0x1c   : > { %774 = vrot.lane.b32.xlu0 %v770_v45, %s8848_s17  ;;  %v7854_v3 = vld [vmem:[%s9009_s24 + $0x18] ss:$12 sps:$4 sm:$0xff]   ;;  %v7858_v13 = vld [vmem:[%s9009_s24] ss:$12 sps:$4 sm:$0xff]   ;;  %v7859_v16 = vld [vmem:[%s9009_s24 + $0x8] ss:$12 sps:$4 sm:$0xff]  }
  0x1d   : > { %781 = vrot.lane.b32.xlu1 %v780_v47, %s8851_s25  ;;  %v7856_v12 = vld [vmem:[%s9009_s24 + $0x4] ss:$12 sps:$4 sm:$0xff]   ;;  %v7862_v15 = vld [vmem:[%s9009_s24 + $0xc0] ss:$12 sps:$4 sm:$0x3f]   ;;  %vm726_vm4 = vcmask 228352  }
  0x1e   : > { %1036 = vmatpush1.bf16.msra.mxu0 %v7838_v55  ;;  %1099 = vmatpush1.bf16.msra.mxu1 %v7839_v59  ;;  %v7863_v17 = vld [vmem:[%s9009_s24 + $0xc8] ss:$12 sps:$4 sm:$0x3f]   ;;  %v1023_v18 = vsel %vm718_vm3, %v7862_v15, 0  ;;  %v7866_v19 = vld [vmem:[%s9062_s29 + $0xac] ss:$12 sps:$4 sm:$0xff]  }
  0x1f   : > { %1037 = vmatprep.subr.bf16.mxu0 %v7840_v60  ;;  %1100 = vmatprep.subr.bf16.mxu1 %v8849_v33  ;;  %v1029_v20 = vsel %vm718_vm3, %v7863_v17, 0  ;;  %vm732_vm5 = vcmask 457728   ;;  %vm737_vm6 = vcmask 687104   ;;  %vm1013_vm7 = vcmask 97280   ;;  %v7864_v23 = vld [vmem:[%s9062_s29 + $0xa8] ss:$12 sps:$4 sm:$0xff]  }
  0x20   : > { %696 = vrot.lane.b32.xlu0 %v693_v53, %s8848_s17  ;;  %vm742_vm8 = vcmask 916480   ;;  %v7870_v27 = vld [vmem:[%s9062_s29 + $0x94] ss:$12 sps:$4 sm:$0xff]   ;;  %v7868_v31 = vld [vmem:[%s9062_s29 + $0x90] ss:$12 sps:$4 sm:$0xff]   ;;  %vm822_vm9 = vcmask 1043456  }
  0x21   : > { %792 = vrot.lane.b32.xlu1 %v791_v56, %s8850_s21  ;;  %v7872_v32 = vld [vmem:[%s9062_s29 + $0x98] ss:$12 sps:$4 sm:$0xff]   ;;  %v7875_v35 = vld [vmem:[%s9062_s29 + $0x7c] ss:$12 sps:$4 sm:$0xff]   ;;  %v7876_v38 = vld [vmem:[%s9062_s29 + $0x80] ss:$12 sps:$4 sm:$0xff]  }
  0x22   : > { %1038 = vmatpush1.bf16.msra.mxu0 %v7842_v62  ;;  %1101 = vmatpush1.bf16.msra.mxu1 %v7843_v63  ;;  %v7873_v37 = vld [vmem:[%s9062_s29 + $0x78] ss:$12 sps:$4 sm:$0xff]   ;;  %v8838_v43 = vld [vmem:[%s10159_s0 + $0x8] sm:$0xf]  ;;  %v7877_v45 = vld [vmem:[%s9062_s29 + $0x60] ss:$12 sps:$4 sm:$0xff]  }
  0x23   : > { %1039 = vmatprep.subr.bf16.mxu0 %v7844_v0  ;;  %1102 = vmatprep.subr.bf16.mxu1 %v8849_v33  ;;  %v7879_v40 = vld [vmem:[%s9062_s29 + $0x64] ss:$12 sps:$4 sm:$0xff]   ;;  %v6944_v44 = vcombine.low %v8838_v43, %v8838_v43  ;;  %v7880_v46 = vld [vmem:[%s9062_s29 + $0x68] ss:$12 sps:$4 sm:$0xff]   ;;  %v8839_v62 = vld [vmem:[%s10159_s0 + $0x18] sm:$0xf] }
  0x24   : > { %704 = vrot.lane.b32.xlu0 %v700_v14, %s8851_s25  ;;  %v7860_v14 = vld [vmem:[%s9009_s24 + $0xc4] ss:$12 sps:$4 sm:$0x3f]   ;;  %v7881_v54 = vld [vmem:[%s9062_s29 + $0x48] ss:$12 sps:$4 sm:$0xff]   ;;  %v6947_v63 = vcombine.low %v8839_v62, %v8839_v62  ;;  %vm1495_vm10 = vcmask 392192  }
  0x25   : > { %799 = vrot.lane.b32.xlu1 %v798_v61, %s8852_s26  ;;  %v7885_v55 = vld [vmem:[%s9062_s29 + $0x50] ss:$12 sps:$4 sm:$0xff]   ;;  %vm1803_vm11 = vsmask.f32 5376  ;;  %vm1855_vm12 = vcmask 1044480   ;;  %vm5504_vm14 = vcmask 130048  }
  0x26   : > { %1040 = vmatpush1.bf16.msra.mxu0 %v7846_v1  ;;  %1103 = vmatpush1.bf16.msra.mxu1 %v7847_v4  ;;  %vm1886_vm13 = vsmask.f32 4352  ;;  %vm6756_vm15 = vcmask 1041408  }
  0x27   : > { %1041 = vmatprep.subr.bf16.mxu0 %v7848_v5  ;;  %1104 = vmatprep.subr.bf16.mxu1 %v8849_v33  ;;  %v7886_v5 = vld [vmem:[%s9062_s29 + $0x30] ss:$12 sps:$4 sm:$0xff]  }
  0x28   : > { %716 = vrot.lane.b32.xlu0 %v8978_v24, %s8850_s21  ;;  %v7867_v24 = vld [vmem:[%s9062_s29 + $0xb0] ss:$12 sps:$4 sm:$0xff]  }
  0x29   : > { %724 = vrot.lane.b32.xlu1 %v720_v21, %s8852_s26 }
  0x2a   : > { %1042 = vmatpush1.bf16.msra.mxu0 %v7850_v7  ;;  %1105 = vmatpush1.bf16.msra.mxu1 %v7851_v8  ;;  %v7892_v8 = vld [vmem:[%s9062_s29 + $0x1c] ss:$12 sps:$4 sm:$0xff]  }
  0x2b   : > { %1043 = vmatprep.subr.bf16.mxu0 %v7852_v9  ;;  %1106 = vmatprep.subr.bf16.mxu1 %v8849_v33 }
  0x2c   : > { %776 = vrot.lane.b32.xlu0 %v773_v6, %s8848_s17  ;;  %v7889_v6 = vld [vmem:[%s9062_s29 + $0x38] ss:$12 sps:$4 sm:$0xff]  }
  0x2d   : > { %783 = vrot.lane.b32.xlu1 %v779_v34, %s8851_s25  ;;  %s10062_s25 = sshll.u32 %s10200_s19, 1 }
  0x2e   : > { %1044 = vmatpush1.bf16.msra.mxu0 %v7854_v3  ;;  %1107 = vmatpush1.bf16.msra.mxu1 %v7855_v11  ;;  %s636_s28 = scalar_lea.vmem %s10169_s10, %s10062_s25 }
  0x2f   : > { %1045 = vmatprep.subr.bf16.mxu0 %v7856_v12  ;;  %1108 = vmatprep.subr.bf16.mxu1 %v8849_v33 }
  0x30   : > { %794 = vrot.lane.b32.xlu0 %v790_v49, %s8850_s21 }
  0x31   : > { %801 = vrot.lane.b32.xlu1 %v797_v58, %s8852_s26  ;;  %v7888_v58 = vld [vmem:[%s9062_s29 + $0x34] ss:$12 sps:$4 sm:$0xff]   ;;  %s653_s26 = scalar_lea.vmem %s10173_s14, %s10200_s19 }
  0x32   : > { %1046 = vmatpush1.bf16.msra.mxu0 %v7858_v13  ;;  %1109 = vmatpush1.bf16.msra.mxu1 %v7859_v16  ;;  %v7890_v13 = vld [vmem:[%s9062_s29 + $0x18] ss:$12 sps:$4 sm:$0xff]  }
  0x33   : > { %6976 = vmatprep.subr.msk.bf16.mxu0 %vm718_vm3, %v7860_v14  ;;  %1124 = vmatprep.subr.bf16.mxu1 %v8849_v33  ;;  %v7893_v14 = vld [vmem:[%s9062_s29 + $0x20] ss:$12 sps:$4 sm:$0xff]  }
  0x36   : > { %1062 = vmatpush2.bf16.msra.mxu0 %v1023_v18  ;;  %1125 = vmatpush2.bf16.msra.mxu1 %v1029_v20 }
  0x37   : > { %1337 = vmatprep.subr.bf16.mxu0 %v7866_v19  ;;  %1400 = vmatprep.subr.bf16.mxu1 %v8849_v33  ;;  %v7896_v19 = vld [vmem:[%s9062_s29 + $0x4] ss:$12 sps:$4 sm:$0xff]  }
  0x86   : > { %v695_v21 = vpop.permute.xlu0 %694 }
  0x87   : > { %v715_v22 = vpop.permute.xlu1 %714  ;;  %v728_v25 = vsel %vm726_vm4, %v8950_v2, %v695_v21 }
  0x8a   : > { %v703_v26 = vpop.permute.xlu0 %702 }
  0x8b   : > { %v9100_v28 = vpop.permute.xlu1 %722  ;;  %v734_v29 = vsel %vm732_vm5, %v728_v25, %v703_v26  ;;  %v7898_v25 = vld [vmem:[%s9062_s29 + $0xc4] ss:$12 sps:$4 sm:$0x3f]   ;;  %v7900_v26 = vld [vmem:[%s9062_s29 + $0xc0] ss:$12 sps:$4 sm:$0x3f]  }
  0x8c   : > { %v739_v30 = vsel %vm737_vm6, %v734_v29, %v715_v22  ;;  %6977 = vmatprep.mubr.msk.bf16.mxu0 %vm1013_vm7, %v9100_v28  ;;  %6980 = vmatprep.mubr.msk.bf16.mxu1 %vm1013_vm7, %v9100_v28  ;;  %v7894_v22 = vld [vmem:[%s9062_s29] ss:$12 sps:$4 sm:$0xff]   ;;  %v1329_v29 = vsel %vm718_vm3, %v7900_v26, 0 }
  0x8d   : > { %v9110_v2 = vsel %vm742_vm8, %v739_v30, %v9100_v28 }
  0x8e   : > { %v775_v34 = vpop.permute.xlu0 %774  ;;  %1064 = vmatmul.mubr.bf16.vlgmr.msra.gmra.mxu0 %v9110_v2  ;;  %1127 = vmatmul.mubr.bf16.vlgmr.msra.gmra.mxu1 %v9110_v2 }
  0x8f   : > { %v782_v36 = vpop.permute.xlu1 %781  ;;  %1338 = vmatpush1.bf16.msra.mxu0 %v7864_v23  ;;  %1401 = vmatpush1.bf16.msra.mxu1 %v7867_v24  ;;  %v804_v41 = vsel %vm726_vm4, %v8963_v10, %v775_v34  ;;  %v7883_v10 = vld [vmem:[%s9062_s29 + $0x4c] ss:$12 sps:$4 sm:$0xff]   ;;  %v7897_v23 = vld [vmem:[%s9062_s29 + $0x8] ss:$12 sps:$4 sm:$0xff]  }
  0x90   : > { %1339 = vmatprep.subr.bf16.mxu0 %v7870_v27  ;;  %1402 = vmatprep.subr.bf16.mxu1 %v8849_v33  ;;  %v809_v47 = vsel %vm732_vm5, %v804_v41, %v782_v36  ;;  %v7901_v27 = vld [vmem:[%s9062_s29 + $0xc8] ss:$12 sps:$4 sm:$0x3f]   ;;  %s7809_s29 = smul.u32 3, %s10200_s19 }
  0x91   : > { %v1335_v30 = vsel %vm718_vm3, %v7901_v27, 0 }
  0x92   : > { %v697_v39 = vpop.permute.xlu0 %696  ;;  %s622_s21 = scalar_lea.vmem %s10166_s7, %s7809_s29  ;;  %s7755_s29 = sshll.u32 %s10200_s19, 7 }
  0x93   : > { %v793_v42 = vpop.permute.xlu1 %792  ;;  %1340 = vmatpush1.bf16.msra.mxu0 %v7868_v31  ;;  %1403 = vmatpush1.bf16.msra.mxu1 %v7872_v32  ;;  %v731_v53 = vsel %vm726_vm4, %v6944_v44, %v697_v39 }
  0x94   : > { %1341 = vmatprep.subr.bf16.mxu0 %v7875_v35  ;;  %1404 = vmatprep.subr.bf16.mxu1 %v8849_v33  ;;  %v813_v49 = vsel %vm737_vm6, %v809_v47, %v793_v42 }
  0x96   : > { %v705_v48 = vpop.permute.xlu0 %704 }
  0x97   : > { %v800_v50 = vpop.permute.xlu1 %799  ;;  %1342 = vmatpush1.bf16.msra.mxu0 %v7873_v37  ;;  %1405 = vmatpush1.bf16.msra.mxu1 %v7876_v38  ;;  %v736_v56 = vsel %vm732_vm5, %v731_v53, %v705_v48 }
  0x98   : > { %v817_v51 = vsel %vm742_vm8, %v813_v49, %v800_v50  ;;  %v824_v52 = vrot.slane %v800_v50, 4  ;;  %1343 = vmatprep.subr.bf16.mxu0 %v7879_v40  ;;  %1406 = vmatprep.subr.bf16.mxu1 %v8849_v33 }
  0x99   : > { %v823_v59 = vrot.slane %v817_v51, 4 }
  0x9a   : > { %v717_v57 = vpop.permute.xlu0 %716 }
  0x9b   : > { %v725_v60 = vpop.permute.xlu1 %724  ;;  %v741_v61 = vsel %vm737_vm6, %v736_v56, %v717_v57  ;;  %1344 = vmatpush1.bf16.msra.mxu0 %v7877_v45  ;;  %1407 = vmatpush1.bf16.msra.mxu1 %v7880_v46 }
  0x9c   : > { %v835_v0 = vsel %vm822_vm9, %v725_v60, %v824_v52  ;;  %v747_v1 = vsel %vm742_vm8, %v741_v61, %v725_v60  ;;  %1345 = vmatprep.subr.bf16.mxu0 %v7883_v10  ;;  %1408 = vmatprep.subr.bf16.mxu1 %v8849_v33 }
  0x9d   : > { %6978 = vmatprep.mubr.msk.bf16.mxu0 %vm1013_vm7, %v835_v0  ;;  %6981 = vmatprep.mubr.msk.bf16.mxu1 %vm1013_vm7, %v835_v0  ;;  %v832_v4 = vsel %vm822_vm9, %v747_v1, %v823_v59 }
  0x9e   : > { %v777_v7 = vpop.permute.xlu0 %776  ;;  %1074 = vmatmul.mubr.bf16.gmra.mxu0 %v832_v4  ;;  %1135 = vmatmul.mubr.bf16.gmra.mxu1 %v832_v4 }
  0x9f   : > { %v784_v9 = vpop.permute.xlu1 %783  ;;  %v807_v3 = vsel %vm726_vm4, %v6947_v63, %v777_v7  ;;  %1346 = vmatpush1.bf16.msra.mxu0 %v7881_v54  ;;  %1409 = vmatpush1.bf16.msra.mxu1 %v7885_v55 }
  0xa0   : > { %1347 = vmatprep.subr.bf16.mxu0 %v7888_v58  ;;  %1410 = vmatprep.subr.bf16.mxu1 %v8849_v33  ;;  %v811_v11 = vsel %vm732_vm5, %v807_v3, %v784_v9 }
  0xa2   : > { %v795_v12 = vpop.permute.xlu0 %794 }
  0xa3   : > { %v802_v15 = vpop.permute.xlu1 %801  ;;  %v815_v16 = vsel %vm737_vm6, %v811_v11, %v795_v12  ;;  %1348 = vmatpush1.bf16.msra.mxu0 %v7886_v5  ;;  %1411 = vmatpush1.bf16.msra.mxu1 %v7889_v6 }
  0xa4   : > { %v827_v17 = vrot.slane %v802_v15, 4  ;;  %v819_v18 = vsel %vm742_vm8, %v815_v16, %v802_v15  ;;  %1349 = vmatprep.subr.bf16.mxu0 %v7892_v8  ;;  %1412 = vmatprep.subr.bf16.mxu1 %v8849_v33 }
  0xa5   : > { %v825_v20 = vrot.slane %v819_v18, 4 }
  0xa6   : > { %v828_v21 = vsel %vm822_vm9, %v824_v52, %v827_v17 }
  0xa7   : > { %6979 = vmatprep.mubr.msk.bf16.mxu0 %vm1013_vm7, %v828_v21  ;;  %6982 = vmatprep.mubr.msk.bf16.mxu1 %vm1013_vm7, %v828_v21  ;;  %v826_v24 = vsel %vm822_vm9, %v823_v59, %v825_v20 }
  0xa8   : > { %1350 = vmatpush1.bf16.msra.mxu0 %v7890_v13  ;;  %1413 = vmatpush1.bf16.msra.mxu1 %v7893_v14 }
  0xa9   : > { %1084 = vmatmul.mubr.bf16.gmra.mxu0 %v826_v24  ;;  %1143 = vmatmul.mubr.bf16.gmra.mxu1 %v826_v24 }
  0xaa   : > { %1351 = vmatprep.subr.bf16.mxu0 %v7896_v19  ;;  %7011 = vmatprep.mubr.msk.bf16.mxu0 %vm1013_vm7, %v9100_v28 }
  0xab   : > { %1414 = vmatprep.subr.bf16.mxu1 %v8849_v33  ;;  %7014 = vmatprep.mubr.msk.bf16.mxu1 %vm1013_vm7, %v9100_v28 }
  0xac   : > { %1352 = vmatpush1.bf16.msra.mxu0 %v7894_v22  ;;  %1415 = vmatpush1.bf16.msra.mxu1 %v7897_v23 }
  0xad   : > { %7010 = vmatprep.subr.msk.bf16.mxu0 %vm718_vm3, %v7898_v25  ;;  %1430 = vmatprep.subr.bf16.mxu1 %v8849_v33 }
  0xb0   : > { %1368 = vmatpush2.bf16.msra.mxu0 %v1329_v29  ;;  %1431 = vmatpush2.bf16.msra.mxu1 %v1335_v30 }
  0xb3   : > { %1370 = vmatmul.mubr.bf16.vlgmr.msra.gmra.mxu0 %v9110_v2  ;;  %1433 = vmatmul.mubr.bf16.vlgmr.msra.gmra.mxu1 %v9110_v2 }
  0xb4   : > { %7012 = vmatprep.mubr.msk.bf16.mxu0 %vm1013_vm7, %v835_v0  ;;  %7015 = vmatprep.mubr.msk.bf16.mxu1 %vm1013_vm7, %v835_v0 }
  0xbb   : > { %1380 = vmatmul.mubr.bf16.gmra.mxu0 %v832_v4  ;;  %1441 = vmatmul.mubr.bf16.gmra.mxu1 %v832_v4 }
  0xbc   : > { %7013 = vmatprep.mubr.msk.bf16.mxu0 %vm1013_vm7, %v828_v21  ;;  %7016 = vmatprep.mubr.msk.bf16.mxu1 %vm1013_vm7, %v828_v21 }
  0xc3   : > { %1390 = vmatmul.mubr.bf16.gmra.mxu0 %v826_v24  ;;  %1449 = vmatmul.mubr.bf16.gmra.mxu1 %v826_v24 }
  0xc4   : > { %1534 = vmatprep.mubr.bf16.mxu0 %v8849_v33  ;;  %1650 = vmatprep.mubr.bf16.mxu1 %v8849_v33 }
 0x14e   : > { %v1128_v28 = vpop.f32.mrf.mxu1  ;;  %v9198_v2 = vpop.f32.mrf.mxu0 }
 0x150   : > { %v1130_v31 = vpop.f32.mrf.mxu1  ;;  %v9200_v34 = vpop.f32.mrf.mxu0 }
 0x152   : > { %v1131_v32 = vpop.f32.mrf.mxu1  ;;  %v9202_v36 = vpop.f32.mrf.mxu0 }
 0x154   : > { %v1133_v35 = vpop.f32.mrf.mxu1  ;;  %v9204_v37 = vpop.f32.mrf.mxu0 }
 0x15e   : > { %v9206_v38 = vpop.f32.mrf.mxu0  ;;  %v9208_v39 = vpop.f32.mrf.mxu1 }
 0x160   : > { %v1077_v40 = vpop.f32.mrf.mxu0  ;;  %v1138_v41 = vpop.f32.mrf.mxu1 }
 0x161   : > { %v7908_v41 = vld [vmem:[%s9093_s20 + $0x74] ss:$8 sps:$4 sm:$0xff]  }
 0x162   : > { %v9210_v42 = vpop.f32.mrf.mxu1  ;;  %v1079_v43 = vpop.f32.mrf.mxu0 }
 0x164   : > { %v1141_v44 = vpop.f32.mrf.mxu1  ;;  %v1081_v45 = vpop.f32.mrf.mxu0 }
 0x169   : > { %v1085_v46 = vpop.f32.mrf.mxu0  ;;  %v9212_v47 = vpop.f32.mrf.mxu1 }
 0x16b   : > { %v1087_v48 = vpop.f32.mrf.mxu0  ;;  %v1146_v10 = vpop.f32.mrf.mxu1 }
 0x16c   : > { %v7905_v10 = vld [vmem:[%s10161_s2 + $0x8] ss:$0 sps:$4 sm:$0xff]  }
 0x16d   : > { %v1089_v49 = vpop.f32.mrf.mxu0  ;;  %v9214_v50 = vpop.f32.mrf.mxu1 }
 0x16f   : > { %v1091_v51 = vpop.f32.mrf.mxu0  ;;  %v1149_v52 = vpop.f32.mrf.mxu1 }
 0x170   : > { %v7915_v52 = vld [vmem:[%s9093_s20 + $0x40] ss:$8 sps:$4 sm:$0xff]  }
 0x173   : > { %v1371_v53 = vpop.f32.mrf.mxu0  ;;  %v1434_v54 = vpop.f32.mrf.mxu1 }
 0x174   : > { %v1459_v59 = vmax.f32 %v1128_v28, %v1434_v54  ;;  %v7918_v54 = vld [vmem:[%s9093_s20 + $0x30] ss:$8 sps:$4 sm:$0xff]  }
 0x175   : > { %v1373_v55 = vpop.f32.mrf.mxu0  ;;  %v1436_v56 = vpop.f32.mrf.mxu1 }
 0x176   : > { %v1458_v28 = vmax.f32 %v9200_v34, %v1373_v55  ;;  %v7923_v55 = vld [vmem:[%s9093_s20 + $0x24] ss:$8 sps:$4 sm:$0xff]   ;;  %v7921_v56 = vld [vmem:[%s9093_s20 + $0x20] ss:$8 sps:$4 sm:$0xff]  }
 0x177   : > { %v1375_v57 = vpop.f32.mrf.mxu0  ;;  %v1437_v58 = vpop.f32.mrf.mxu1 }
 0x178   : > { %v1462_v60 = vmax.f32 %v1131_v32, %v1437_v58  ;;  %v1460_v31 = vmax.f32 %v9202_v36, %v1375_v57  ;;  %v7902_v36 = vld [vmem:[%s10160_s1] sm:$0xff]   ;;  %v7929_v57 = vld [vmem:[%s9093_s20 + $0x14] ss:$8 sps:$4 sm:$0xff]  }
 0x179   : > { %v1377_v61 = vpop.f32.mrf.mxu0  ;;  %v1439_v62 = vpop.f32.mrf.mxu1  ;;  %v7926_v58 = vld [vmem:[%s9093_s20 + $0x174] ss:$8 sps:$4 sm:$0xff]  }
 0x17a   : > { %v9216_v63 = vpack.c.bf16 %v1462_v60, %v1459_v59  ;;  %v1461_v27 = vmax.f32 %v9204_v37, %v1377_v61  ;;  %v1457_v37 = vmax.f32 %v9198_v2, %v1371_v53  ;;  %v7903_v2 = vld [vmem:[%s10161_s2] sm:$0xff]   ;;  %v7920_v53 = vld [vmem:[%s9093_s20 + $0x34] ss:$8 sps:$4 sm:$0xff]   ;;  %v7927_v59 = vld [vmem:[%s9093_s20 + $0x10] ss:$8 sps:$4 sm:$0xff]  }
 0x17b   : > { %v1381_v0 = vpop.f32.mrf.mxu0  ;;  %v1442_v1 = vpop.f32.mrf.mxu1  ;;  %v7935_v60 = vld [vmem:[%s9093_s20 + $0x4] ss:$8 sps:$4 sm:$0xff]   ;;  %v7924_v61 = vld [vmem:[%s9093_s20 + $0x170] ss:$8 sps:$4 sm:$0xff]  }
 0x17c   : > { %v1463_v30 = vmax.f32 %v9206_v38, %v1381_v0  ;;  %v1476_v35 = vpack.c.bf16 %v1461_v27, %v1458_v28  ;;  %v1475_v34 = vpack.c.bf16 %v1460_v31, %v1457_v37  ;;  %v7932_v62 = vld [vmem:[%s9093_s20 + $0x164] ss:$8 sps:$4 sm:$0xff]   ;;  %v7933_v0 = vld [vmem:[%s9093_s20] ss:$8 sps:$4 sm:$0xff]   ;;  %v7974_v27 = vld [vmem:[%s9093_s20 + $0x1f4] ss:$8 sps:$4 sm:$0xff]  }
 0x17d   : > { %v1383_v4 = vpop.f32.mrf.mxu0  ;;  %v1444_v5 = vpop.f32.mrf.mxu1  ;;  %v7975_v28 = vld [vmem:[%s9093_s20 + $0x90] ss:$8 sps:$4 sm:$0xff]   ;;  %v7980_v31 = vld [vmem:[%s9093_s20 + $0x1e4] ss:$8 sps:$4 sm:$0xff]   ;;  %v7986_v37 = vld [vmem:[%s9093_s20 + $0x1d4] ss:$8 sps:$4 sm:$0xff]  }
 0x17e   : > { %v1464_v23 = vmax.f32 %v1077_v40, %v1383_v4  ;;  %v7930_v4 = vld [vmem:[%s9093_s20 + $0x160] ss:$8 sps:$4 sm:$0xff]   ;;  %v7938_v5 = vld [vmem:[%s9093_s20 + $0x154] ss:$8 sps:$4 sm:$0xff]  }
 0x17f   : > { %v1385_v6 = vpop.f32.mrf.mxu0  ;;  %v1445_v7 = vpop.f32.mrf.mxu1 }
 0x180   : > { %v1466_v25 = vmax.f32 %v1079_v43, %v1385_v6  ;;  %v1468_v43 = vmax.f32 %v9210_v42, %v1445_v7  ;;  %v7947_v6 = vld [vmem:[%s9093_s20 + $0xe4] ss:$8 sps:$4 sm:$0xff]   ;;  %v7936_v7 = vld [vmem:[%s9093_s20 + $0x150] ss:$8 sps:$4 sm:$0xff]  }
 0x181   : > { %v1387_v8 = vpop.f32.mrf.mxu0  ;;  %v1447_v9 = vpop.f32.mrf.mxu1 }
 0x182   : > { %v1467_v19 = vmax.f32 %v1081_v45, %v1387_v8  ;;  %v1478_v32 = vpack.c.bf16 %v1466_v25, %v1463_v30  ;;  %v1465_v45 = vmax.f32 %v9208_v39, %v1442_v1  ;;  %v7909_v39 = vld [vmem:[%s9093_s20 + $0x60] ss:$8 sps:$4 sm:$0xff]   ;;  %v7941_v1 = vld [vmem:[%s9093_s20 + $0xf4] ss:$8 sps:$4 sm:$0xff]   ;;  %v7944_v8 = vld [vmem:[%s9093_s20 + $0x144] ss:$8 sps:$4 sm:$0xff]  }
 0x183   : > { %v1391_v3 = vpop.f32.mrf.mxu0  ;;  %v1450_v11 = vpop.f32.mrf.mxu1  ;;  %v7945_v9 = vld [vmem:[%s9093_s20 + $0xe0] ss:$8 sps:$4 sm:$0xff]   ;;  %v7971_v25 = vld [vmem:[%s9093_s20 + $0xa4] ss:$8 sps:$4 sm:$0xff]   ;;  %v7977_v30 = vld [vmem:[%s9093_s20 + $0x94] ss:$8 sps:$4 sm:$0xff]  }
 0x184   : > { %v1469_v22 = vmax.f32 %v1085_v46, %v1391_v3  ;;  %v1479_v29 = vpack.c.bf16 %v1467_v19, %v1464_v23  ;;  %v1471_v38 = vmax.f32 %v9212_v47, %v1450_v11  ;;  %v7906_v46 = vld [vmem:[%s9093_s20 + $0x70] ss:$8 sps:$4 sm:$0xff]   ;;  %v1480_v42 = vpack.c.bf16 %v1468_v43, %v1465_v45  ;;  %v7911_v47 = vld [vmem:[%s9093_s20 + $0x64] ss:$8 sps:$4 sm:$0xff]   ;;  %v7953_v3 = vld [vmem:[%s9093_s20 + $0xd4] ss:$8 sps:$4 sm:$0xff]  }
 0x185   : > { %v1393_v12 = vpop.f32.mrf.mxu0  ;;  %v1452_v13 = vpop.f32.mrf.mxu1  ;;  %v7942_v11 = vld [vmem:[%s9093_s20 + $0x140] ss:$8 sps:$4 sm:$0xff]   ;;  %v7962_v19 = vld [vmem:[%s9093_s20 + $0x114] ss:$8 sps:$4 sm:$0xff]   ;;  %v7968_v23 = vld [vmem:[%s9093_s20 + $0x104] ss:$8 sps:$4 sm:$0xff]  }
 0x186   : > { %v1470_v20 = vmax.f32 %v1087_v48, %v1393_v12  ;;  %v7904_v48 = vld [vmem:[%s10160_s1 + $0x8] ss:$0 sps:$4 sm:$0xff]   ;;  %v7950_v12 = vld [vmem:[%s9093_s20 + $0x134] ss:$8 sps:$4 sm:$0xff]   ;;  %v7951_v13 = vld [vmem:[%s9093_s20 + $0xd0] ss:$8 sps:$4 sm:$0xff]  }
 0x187   : > { %v1395_v14 = vpop.f32.mrf.mxu0  ;;  %v1453_v15 = vpop.f32.mrf.mxu1  ;;  %v7990_v43 = vld [vmem:[%s9093_s20 + $0x1c0] ss:$8 sps:$4 sm:$0xff]  }
 0x188   : > { %v1472_v16 = vmax.f32 %v1089_v49, %v1395_v14  ;;  %v1474_v40 = vmax.f32 %v9214_v50, %v1453_v15  ;;  %v7914_v49 = vld [vmem:[%s9093_s20 + $0x54] ss:$8 sps:$4 sm:$0xff]   ;;  %v7912_v50 = vld [vmem:[%s9093_s20 + $0x50] ss:$8 sps:$4 sm:$0xff]   ;;  %v7956_v15 = vld [vmem:[%s9093_s20 + $0x124] ss:$8 sps:$4 sm:$0xff]  }
 0x189   : > { %v1397_v17 = vpop.f32.mrf.mxu0  ;;  %v1455_v18 = vpop.f32.mrf.mxu1  ;;  %v7948_v14 = vld [vmem:[%s9093_s20 + $0x130] ss:$8 sps:$4 sm:$0xff]   ;;  %v8002_v45 = vld [vmem:[%s9093_s20 + $0x1a0] ss:$8 sps:$4 sm:$0xff]  }
 0x18a   : > { %v1473_v21 = vmax.f32 %v1091_v51, %v1397_v17  ;;  %v1481_v26 = vpack.c.bf16 %v1472_v16, %v1469_v22  ;;  %v1483_v44 = vpack.c.bf16 %v1474_v40, %v1471_v38  ;;  %v7917_v51 = vld [vmem:[%s9093_s20 + $0x44] ss:$8 sps:$4 sm:$0xff]   ;;  %v7954_v16 = vld [vmem:[%s9093_s20 + $0x120] ss:$8 sps:$4 sm:$0xff]   ;;  %v7963_v22 = vld [vmem:[%s9093_s20 + $0xb0] ss:$8 sps:$4 sm:$0xff]  }
 0x18b   : > { %v7959_v17 = vld [vmem:[%s9093_s20 + $0xc4] ss:$8 sps:$4 sm:$0xff]   ;;  %v7957_v18 = vld [vmem:[%s9093_s20 + $0xc0] ss:$8 sps:$4 sm:$0xff]   ;;  %v7984_v38 = vld [vmem:[%s9093_s20 + $0x1d0] ss:$8 sps:$4 sm:$0xff]  }
 0x18c   : > { %v1482_v24 = vpack.c.bf16 %v1473_v21, %v1470_v20  ;;  %v7960_v20 = vld [vmem:[%s9093_s20 + $0x110] ss:$8 sps:$4 sm:$0xff]   ;;  %v7965_v21 = vld [vmem:[%s9093_s20 + $0xb4] ss:$8 sps:$4 sm:$0xff]   ;;  %v7983_v40 = vld [vmem:[%s9093_s20 + $0x84] ss:$8 sps:$4 sm:$0xff]  }
 0x18e   : > { %1512 = vmatprep.subr.bf16.mxu0 %v1482_v24  ;;  %1628 = vmatprep.subr.bf16.mxu1 %v1482_v24  ;;  %v7966_v24 = vld [vmem:[%s9093_s20 + $0x100] ss:$8 sps:$4 sm:$0xff]  }
 0x18f   : > { %1513 = vmatpush1.bf16.msra.mxu0 %v1481_v26  ;;  %1629 = vmatpush1.bf16.msra.mxu1 %v1481_v26  ;;  %v7969_v26 = vld [vmem:[%s9093_s20 + $0xa0] ss:$8 sps:$4 sm:$0xff]  }
 0x190   : > { %1514 = vmatprep.subr.bf16.mxu0 %v1479_v29  ;;  %1630 = vmatprep.subr.bf16.mxu1 %v1479_v29  ;;  %v7972_v29 = vld [vmem:[%s9093_s20 + $0x1f0] ss:$8 sps:$4 sm:$0xff]  }
 0x193   : > { %1515 = vmatpush1.bf16.msra.mxu0 %v1478_v32  ;;  %1631 = vmatpush1.bf16.msra.mxu1 %v1478_v32  ;;  %v7978_v32 = vld [vmem:[%s9093_s20 + $0x1e0] ss:$8 sps:$4 sm:$0xff]  }
 0x194   : > { %1516 = vmatprep.subr.bf16.mxu0 %v1476_v35  ;;  %1632 = vmatprep.subr.bf16.mxu1 %v1476_v35  ;;  %v7981_v35 = vld [vmem:[%s9093_s20 + $0x80] ss:$8 sps:$4 sm:$0xff]  }
 0x197   : > { %1517 = vmatpush1.bf16.msra.mxu0 %v1475_v34  ;;  %1633 = vmatpush1.bf16.msra.mxu1 %v1475_v34  ;;  %v7992_v34 = vld [vmem:[%s9093_s20 + $0x1c4] ss:$8 sps:$4 sm:$0xff]  }
 0x198   : > { %7788 = vmatprep.subr.bf16.mxu0 %v1483_v44  ;;  %3369 = vmatprep.subr.bf16.mxu1 %v7908_v41  ;;  %v7989_v41 = vld [vmem:[%s9093_s20 + $0x274] ss:$8 sps:$4 sm:$0xff]  }
 0x19a   : > { %7019 = vmatmul.mubr.msk.bf16.vlgmr.msra.gmra.mxu0 %vm1495_vm10, %v7902_v36  ;;  %7025 = vmatmul.mubr.msk.bf16.vlgmr.msra.gmra.mxu1 %vm1495_vm10, %v7903_v2 }
 0x19b   : > { %7789 = vmatpush3.bf16.msra.mxu0 %v1483_v44  ;;  %1544 = vmatprep.mubr.bf16.mxu0 %v8849_v33 }
 0x19c   : > { %7790 = vmatprep.subr.bf16.mxu0 %v1480_v42  ;;  %1660 = vmatprep.mubr.bf16.mxu1 %v8849_v33 }
 0x19d   : > { %3370 = vmatpush1.bf16.msra.mxu1 %v7906_v46  ;;  %v8010_v46 = vld [vmem:[%s9093_s20 + $0x194] ss:$8 sps:$4 sm:$0xff]  }
 0x19e   : > { %3371 = vmatprep.subr.bf16.mxu1 %v7911_v47  ;;  %v8016_v47 = vld [vmem:[%s9093_s20 + $0x184] ss:$8 sps:$4 sm:$0xff]  }
 0x19f   : > { %7791 = vmatpush3.bf16.msra.mxu0 %v1480_v42 }
 0x1a0   : > { %7792 = vmatprep.subr.bf16.mxu0 %v9216_v63 }
 0x1a1   : > { %3372 = vmatpush1.bf16.msra.mxu1 %v7909_v39  ;;  %v8014_v39 = vld [vmem:[%s9093_s20 + $0x180] ss:$8 sps:$4 sm:$0xff]  }
 0x1a2   : > { %7020 = vmatmul.mubr.msk.bf16.gmra.mxu0 %vm1495_vm10, %v7904_v48  ;;  %7026 = vmatmul.mubr.msk.bf16.gmra.mxu1 %vm1495_vm10, %v7905_v10 }
 0x1a3   : > { %7793 = vmatpush3.bf16.msra.mxu0 %v9216_v63  ;;  %7794 = vmatprep.mubr.msk.bf16.mxu0 %vm1495_vm10, %v7902_v36  ;;  %v7996_v36 = vld [vmem:[%s9093_s20 + $0x1b0] ss:$8 sps:$4 sm:$0xff]  }
 0x1a4   : > { %7798 = vmatprep.subr.bf16.mxu0 %v1483_v44  ;;  %3373 = vmatprep.subr.bf16.mxu1 %v7914_v49 }
 0x1a5   : > { %3374 = vmatpush1.bf16.msra.mxu1 %v7912_v50 }
 0x1a6   : > { %3375 = vmatprep.subr.bf16.mxu1 %v7917_v51 }
 0x1a9   : > { %3376 = vmatpush1.bf16.msra.mxu1 %v7915_v52 }
 0x1aa   : > { %7795 = vmatmul.mubr.msk.bf16.vlgmr.msra.gmra.mxu0 %vm1495_vm10, %v7904_v48  ;;  %3377 = vmatprep.subr.bf16.mxu1 %v7920_v53  ;;  %v8022_v48 = vld [vmem:[%s9093_s20 + $0x374] ss:$8 sps:$4 sm:$0xff]   ;;  %v9328_v53 = vld [vmem:[%s622_s21] sm:$0x7]  ;;  %s650_s21 = scalar_lea.vmem %s10172_s13, %s7755_s29 }
 0x1ab   : > { %7799 = vmatpush3.bf16.msra.mxu0 %v1483_v44  ;;  %7804 = vmatprep.mubr.msk.bf16.mxu0 %vm1495_vm10, %v7903_v2  ;;  %v7998_v44 = vld [vmem:[%s9093_s20 + $0x1b4] ss:$8 sps:$4 sm:$0xff]   ;;  %v8004_v2 = vld [vmem:[%s9093_s20 + $0x1a4] ss:$8 sps:$4 sm:$0xff]  }
 0x1ac   : > { %7800 = vmatprep.subr.bf16.mxu0 %v1480_v42 }
 0x1ad   : > { %3378 = vmatpush1.bf16.msra.mxu1 %v7918_v54 }
 0x1ae   : > { %3379 = vmatprep.subr.bf16.mxu1 %v7923_v55 }
 0x1af   : > { %7801 = vmatpush3.bf16.msra.mxu0 %v1480_v42  ;;  %v8008_v42 = vld [vmem:[%s9093_s20 + $0x190] ss:$8 sps:$4 sm:$0xff]  }
 0x1b0   : > { %7802 = vmatprep.subr.bf16.mxu0 %v9216_v63 }
 0x1b1   : > { %3380 = vmatpush1.bf16.msra.mxu1 %v7921_v56 }
 0x1b2   : > { %3381 = vmatprep.subr.bf16.mxu1 %v7929_v57 }
 0x1b3   : > { %7803 = vmatpush3.bf16.msra.mxu0 %v9216_v63  ;;  %v7939_v63 = vld [vmem:[%s9093_s20 + $0xf0] ss:$8 sps:$4 sm:$0xff]  }
 0x1b4   : > { %3412 = vmatprep.subr.bf16.mxu0 %v7926_v58 }
 0x1b5   : > { %3382 = vmatpush1.bf16.msra.mxu1 %v7927_v59 }
 0x1b6   : > { %7805 = vmatmul.mubr.msk.bf16.vlgmr.msra.gmra.mxu0 %vm1495_vm10, %v7905_v10  ;;  %3383 = vmatprep.subr.bf16.mxu1 %v7935_v60  ;;  %v1728_v10 = vlaneseq }
 0x1b7   : > { %3413 = vmatpush1.bf16.msra.mxu0 %v7924_v61 }
 0x1b8   : > { %3414 = vmatprep.subr.bf16.mxu0 %v7932_v62  ;;  %v9320_v49 = vshrl.u32 %v1728_v10, 7  ;;  %v7995_v10 = vld [vmem:[%s9093_s20 + $0x264] ss:$8 sps:$4 sm:$0xff]  }
 0x1b9   : > { %3384 = vmatpush1.bf16.msra.mxu1 %v7933_v0 }
 0x1ba   : > { %3385 = vmatprep.subr.bf16.mxu1 %v7941_v1  ;;  %v9326_v50 = vsub.s32 0, %v9320_v49  ;;  %v9331_v56 = vsub.s32 1, %v9320_v49 }
 0x1bb   : > { %3415 = vmatpush1.bf16.msra.mxu0 %v7930_v4 }
 0x1bc   : > { %3416 = vmatprep.subr.bf16.mxu0 %v7938_v5  ;;  %10179 = vst [vmem:[#allocation2_spill] sm:$0xff] %v9326_v50  ;;  %10180 = vst [vmem:[#allocation3_spill] sm:$0xff] %v9331_v56  ;;  %v1731_v58 = vrot.slane %v9328_v53, %v9326_v50  ;;  %v1735_v62 = vrot.slane %v9328_v53, %v9331_v56 }
 0x1bd   : > { %3386 = vmatpush2.bf16.msra.mxu1 %v7939_v63 }
 0x1be   : > { %3387 = vmatprep.subr.bf16.mxu1 %v7947_v6 }
 0x1bf   : > { %3417 = vmatpush1.bf16.msra.mxu0 %v7936_v7 }
 0x1c0   : > { %3418 = vmatprep.subr.bf16.mxu0 %v7944_v8 }
 0x1c1   : > { %3388 = vmatpush2.bf16.msra.mxu1 %v7945_v9 }
 0x1c2   : > { %3389 = vmatprep.subr.bf16.mxu1 %v7953_v3 }
 0x1c3   : > { %3419 = vmatpush1.bf16.msra.mxu0 %v7942_v11 }
 0x1c4   : > { %3420 = vmatprep.subr.bf16.mxu0 %v7950_v12 }
 0x1c5   : > { %3390 = vmatpush2.bf16.msra.mxu1 %v7951_v13 }
 0x1c6   : > { %3391 = vmatprep.subr.bf16.mxu1 %v7959_v17 }
 0x1c7   : > { %3421 = vmatpush1.bf16.msra.mxu0 %v7948_v14 }
 0x1c8   : > { %3422 = vmatprep.subr.bf16.mxu0 %v7956_v15 }
 0x1c9   : > { %3392 = vmatpush2.bf16.msra.mxu1 %v7957_v18 }
 0x1ca   : > { %3393 = vmatprep.subr.bf16.mxu1 %v7965_v21 }
 0x1cb   : > { %3423 = vmatpush1.bf16.msra.mxu0 %v7954_v16 }
 0x1cc   : > { %3424 = vmatprep.subr.bf16.mxu0 %v7962_v19 }
 0x1cd   : > { %3394 = vmatpush2.bf16.msra.mxu1 %v7963_v22 }
 0x1ce   : > { %3395 = vmatprep.subr.bf16.mxu1 %v7971_v25 }
 0x1cf   : > { %3425 = vmatpush1.bf16.msra.mxu0 %v7960_v20 }
 0x1d0   : > { %3426 = vmatprep.subr.bf16.mxu0 %v7968_v23 }
 0x1d1   : > { %3396 = vmatpush2.bf16.msra.mxu1 %v7969_v26 }
 0x1d2   : > { %3397 = vmatprep.subr.bf16.mxu1 %v7977_v30 }
 0x1d3   : > { %3427 = vmatpush1.bf16.msra.mxu0 %v7966_v24 }
 0x1d4   : > { %3428 = vmatprep.subr.bf16.mxu0 %v7974_v27 }
 0x1d5   : > { %3398 = vmatpush2.bf16.msra.mxu1 %v7975_v28 }
 0x1d6   : > { %3399 = vmatprep.subr.bf16.mxu1 %v7983_v40 }
 0x1d7   : > { %3429 = vmatpush2.bf16.msra.mxu0 %v7972_v29 }
 0x1d8   : > { %3430 = vmatprep.subr.bf16.mxu0 %v7980_v31 }
 0x1d9   : > { %3400 = vmatpush2.bf16.msra.mxu1 %v7981_v35 }
 0x1da   : > { %3455 = vmatprep.subr.bf16.mxu1 %v7989_v41 }
 0x1db   : > { %3431 = vmatpush2.bf16.msra.mxu0 %v7978_v32 }
 0x1dc   : > { %3432 = vmatprep.subr.bf16.mxu0 %v7986_v37 }
 0x1df   : > { %3433 = vmatpush2.bf16.msra.mxu0 %v7984_v38 }
 0x1e0   : > { %3434 = vmatprep.subr.bf16.mxu0 %v7992_v34 }
 0x1e3   : > { %3435 = vmatpush2.bf16.msra.mxu0 %v7990_v43 }
 0x1e4   : > { %3436 = vmatprep.subr.bf16.mxu0 %v7998_v44 }
 0x1e7   : > { %3437 = vmatpush2.bf16.msra.mxu0 %v7996_v36 }
 0x1e8   : > { %3438 = vmatprep.subr.bf16.mxu0 %v8004_v2  ;;  %v7987_v2 = vld [vmem:[%s9093_s20 + $0x270] ss:$8 sps:$4 sm:$0xff]  }
 0x1eb   : > { %3439 = vmatpush2.bf16.msra.mxu0 %v8002_v45 }
 0x1ec   : > { %3440 = vmatprep.subr.bf16.mxu0 %v8010_v46 }
 0x1ef   : > { %3441 = vmatpush2.bf16.msra.mxu0 %v8008_v42  ;;  %v1738_v42 = vsub.s32 2, %v9320_v49 }
 0x1f0   : > { %3442 = vmatprep.subr.bf16.mxu0 %v8016_v47 }
 0x1f3   : > { %3443 = vmatpush2.bf16.msra.mxu0 %v8014_v39 }
 0x1f4   : > { %3498 = vmatprep.subr.bf16.mxu0 %v8022_v48 }
 0x25a   : > { %v1536_v51 = vpop.f32.mrf.mxu0  ;;  %v1652_v52 = vpop.f32.mrf.mxu1 }
 0x25b   : > { %v1717_v57 = vmax.f32 %v1536_v51, %v1652_v52 }
 0x25c   : > { %v1538_v54 = vpop.f32.mrf.mxu0  ;;  %v1654_v55 = vpop.f32.mrf.mxu1 }
 0x25d   : > { %v1743_v4 = vadd.f32 %v1731_v58, %v1717_v57  ;;  %v1718_v5 = vmax.f32 %v1538_v54, %v1654_v55 }
 0x25e   : > { %v1540_v59 = vpop.f32.mrf.mxu0  ;;  %v1656_v60 = vpop.f32.mrf.mxu1 }
 0x25f   : > { %v1720_v61 = vmax.f32 %v1540_v59, %v1656_v60  ;;  %v1744_v14 = vadd.f32 %v1735_v62, %v1718_v5  ;;  %v8001_v5 = vld [vmem:[%s9093_s20 + $0x254] ss:$8 sps:$4 sm:$0xff]  }
 0x260   : > { %v1542_v0 = vpop.f32.mrf.mxu0  ;;  %v1658_v1 = vpop.f32.mrf.mxu1 }
 0x261   : > { %v1746_v63 = vadd.f32 %v1731_v58, %v1720_v61  ;;  %v1721_v6 = vmax.f32 %v1542_v0, %v1658_v1  ;;  %v7993_v61 = vld [vmem:[%s9093_s20 + $0x260] ss:$8 sps:$4 sm:$0xff]  }
 0x262   : > { %v1546_v7 = vpop.f32.mrf.mxu0  ;;  %v1662_v8 = vpop.f32.mrf.mxu1 }
 0x263   : > { %v9337_v9 = vpack.c.bf16 %v1746_v63, %v1743_v4  ;;  %v1747_v3 = vadd.f32 %v1735_v62, %v1721_v6  ;;  %v1723_v11 = vmax.f32 %v1546_v7, %v1662_v8 }
 0x264   : > { %v1548_v12 = vpop.f32.mrf.mxu0  ;;  %v1664_v13 = vpop.f32.mrf.mxu1 }
 0x265   : > { %v1749_v15 = vadd.f32 %v1731_v58, %v1723_v11  ;;  %v1724_v16 = vmax.f32 %v1548_v12, %v1664_v13  ;;  %v9340_v18 = vshrl.u32 %v9337_v9, 16  ;;  %v1787_v19 = vshll.u32 %v9337_v9, 16 }
 0x266   : > { %v1550_v17 = vpop.f32.mrf.mxu0  ;;  %v1666_v20 = vpop.f32.mrf.mxu1  ;;  %v9343_v21 = vpack.c.bf16 %v1747_v3, %v1744_v14  ;;  %v1764_v35 = vrot.slane %v9337_v9, 2  ;;  %v1856_v55 = vrot.slane %v9337_v9, 3  ;;  %v1852_v6 = vrot.slane %v9337_v9, 1 }
 0x267   : > { %v9345_v22 = vpack.c.bf16 %v1749_v15, %v1749_v15  ;;  %v1750_v23 = vadd.f32 %v1735_v62, %v1724_v16  ;;  %v1804_v25 = vrot.slane %v9340_v18, 2  ;;  %v1805_v26 = vrot.slane %v1787_v19, 3 }
 0x268   : > { %v1551_v24 = vpop.f32.mrf.mxu0  ;;  %v1667_v27 = vpop.f32.mrf.mxu1  ;;  %v1789_v40 = vrot.slane %v1787_v19, 1  ;;  %v1767_v37 = vrot.slane %v9343_v21, 2  ;;  %v9373_v51 = vshrl.u32 %v9343_v21, 16  ;;  %v9382_v54 = vshll.u32 %v9343_v21, 16 }
 0x269   : > { %v9348_v29 = vpack.c.bf16 %v1750_v23, %v1750_v23  ;;  %v1765_v30 = vrot.slane %v9345_v22, 2  ;;  %v1808_v28 = vshrl.u32 %v9345_v22, 16  ;;  %v1811_v31 = vshll.u32 %v9345_v22, 16 }
 0x26a   : > { %v9353_v32 = vpop.f32.mrf.mxu0  ;;  %v1806_v45 = vor.u32 %v1805_v26, %v1804_v25  ;;  %v1790_v48 = vor.u32 %v1789_v40, %v9340_v18  ;;  %v1877_v59 = vrot.slane %v9340_v18, 1  ;;  %v1878_v60 = vrot.slane %v1787_v19, 2  ;;  %v8007_v26 = vld [vmem:[%s9093_s20 + $0x244] ss:$8 sps:$4 sm:$0xff]  }
 0x26b   : > { %v1768_v38 = vrot.slane %v9348_v29, 2  ;;  %v1810_v41 = vrot.slane %v1808_v28, 2  ;;  %v1813_v34 = vrot.slane %v1811_v31, 3  ;;  %v1766_v44 = vsel %vm718_vm3, %v1764_v35, %v1765_v30 }
 0x26c   : > { %v9358_v43 = vpop.f32.mrf.mxu0  ;;  %v9378_v52 = vsel %vm822_vm9, %v9337_v9, %v1766_v44  ;;  %v1820_v58 = vshrl.u32 %v9348_v29, 16  ;;  %v1823_v62 = vshll.u32 %v9348_v29, 16  ;;  %v1888_v0 = vrot.slane %v1808_v28, 3 }
 0x26d   : > { %v1769_v36 = vsel %vm718_vm3, %v1767_v37, %v1768_v38  ;;  %v1814_v46 = vor.u32 %v1813_v34, %v1810_v41  ;;  %v1889_v1 = vrot.slane %v1811_v31, 4  ;;  %v1857_v4 = vrot.slane %v9345_v22, 3  ;;  %v8005_v41 = vld [vmem:[%s9093_s20 + $0x240] ss:$8 sps:$4 sm:$0xff]  }
 0x26e   : > { %v9368_v47 = vsel %vm822_vm9, %v9343_v21, %v1769_v36  ;;  %v7797_v39 = vpop.f32.mrf.mxu0  ;;  %v1879_v63 = vor.u32 %v1878_v60, %v1877_v59  ;;  %v1915_v7 = vrot.slane %v9348_v29, 4  ;;  %v1880_v8 = vrot.slane %v9373_v51, 1  ;;  %v8017_v59 = vld [vmem:[%s9093_s20 + $0x220] ss:$8 sps:$4 sm:$0xff]   ;;  %v8025_v60 = vld [vmem:[%s9093_s20 + $0x214] ss:$8 sps:$4 sm:$0xff]  }
 0x26f   : > { %3401 = vmatprep.mubr.bf16.mxu1 %v9368_v47  ;;  %v1815_v49 = vsel %vm1803_vm11, %v1806_v45, %v1814_v46  ;;  %v1887_v3 = vrot.slane %v9340_v18, 3  ;;  %v1890_v11 = vor.u32 %v1889_v1, %v1888_v0  ;;  %v1858_v12 = vsel %vm1855_vm12, %v1856_v55, %v1857_v4  ;;  %v7999_v18 = vld [vmem:[%s9093_s20 + $0x250] ss:$8 sps:$4 sm:$0xff]   ;;  %v8019_v46 = vld [vmem:[%s9093_s20 + $0x224] ss:$8 sps:$4 sm:$0xff]  }
 0x270   : > { %3402 = vmatmul.mubr.bf16.vlgmr.msra.gmra.mxu1 %v9378_v52  ;;  %v9387_v57 = vsel %vm822_vm9, %v1790_v48, %v1815_v49  ;;  %v1881_v13 = vrot.slane %v9382_v54, 2  ;;  %v1590_v14 = vpop.f32.mrf.mxu0  ;;  %v9403_v15 = vsel %vm822_vm9, %v1852_v6, %v1858_v12  ;;  %v9406_v16 = vsel %vm822_vm9, %v1767_v37, %v1915_v7  ;;  %v8011_v45 = vld [vmem:[%s9093_s20 + $0x230] ss:$8 sps:$4 sm:$0xff]  }
 0x271   : > { %3456 = vmatpush1.bf16.msra.mxu1 %v7987_v2  ;;  %3444 = vmatprep.mubr.bf16.mxu0 %v9387_v57  ;;  %v1893_v17 = vrot.slane %v1820_v58, 3  ;;  %v1739_v19 = vrot.slane %v9328_v53, %v1738_v42  ;;  %v1891_v20 = vsel %vm1886_vm13, %v1887_v3, %v1890_v11  ;;  %v1894_v24 = vrot.slane %v1823_v62, 4  ;;  %v8023_v3 = vld [vmem:[%s9093_s20 + $0x210] ss:$8 sps:$4 sm:$0xff]  }
 0x272   : > { %3457 = vmatprep.subr.bf16.mxu1 %v7995_v10  ;;  %v1882_v23 = vor.u32 %v1881_v13, %v1880_v8  ;;  %v9417_v27 = vsel %vm822_vm9, %v1879_v63, %v1891_v20  ;;  %v1914_v30 = vrot.slane %v9345_v22, 4  ;;  %v1892_v53 = vrot.slane %v9373_v51, 3  ;;  %v8013_v22 = vld [vmem:[%s9093_s20 + $0x234] ss:$8 sps:$4 sm:$0xff]  }
 0x273   : > { %v1895_v31 = vor.u32 %v1894_v24, %v1893_v17  ;;  %v1860_v42 = vrot.slane %v9348_v29, 3  ;;  %v1859_v55 = vrot.slane %v9343_v21, 3  ;;  %v8028_v17 = vld [vmem:[%s9093_s20 + $0x364] ss:$8 sps:$4 sm:$0xff]   ;;  %v8077_v29 = vld [vmem:[%s9093_s20 + $0x280] ss:$8 sps:$4 sm:$0xff]  }
 0x274   : > { %v9425_v37 = vsel %vm822_vm9, %v1764_v35, %v1914_v30 }
 0x275   : > { %3458 = vmatpush1.bf16.msra.mxu1 %v7993_v61  ;;  %v1896_v34 = vsel %vm1886_vm13, %v1892_v53, %v1895_v31  ;;  %v1853_v61 = vrot.slane %v9343_v21, 1  ;;  %v1861_v0 = vsel %vm1855_vm12, %v1859_v55, %v1860_v42  ;;  %v8038_v42 = vld [vmem:[%s9093_s20 + $0x340] ss:$8 sps:$4 sm:$0xff]   ;;  %v8049_v55 = vld [vmem:[%s9093_s20 + $0x2d4] ss:$8 sps:$4 sm:$0xff]  }
 0x276   : > { %v7806_v25 = vpop.f32.mrf.mxu0  ;;  %3459 = vmatprep.subr.bf16.mxu1 %v8001_v5  ;;  %v8020_v5 = vld [vmem:[%s9093_s20 + $0x370] ss:$8 sps:$4 sm:$0xff]  }
 0x277   : > { %v1725_v28 = vmax.f32 %v9353_v32, %v7806_v25  ;;  %v9431_v32 = vsel %vm822_vm9, %v1882_v23, %v1896_v34  ;;  %v9468_v24 = vsel %vm822_vm9, %v1853_v61, %v1861_v0  ;;  %v8029_v34 = vld [vmem:[%s9093_s20 + $0x200] ss:$8 sps:$4 sm:$0xff]   ;;  %v8055_v61 = vld [vmem:[%s9093_s20 + $0x2c4] ss:$8 sps:$4 sm:$0xff]  }
 0x278   : > { %v1703_v40 = vpop.f32.mrf.mxu0  ;;  %v8050_v0 = vld [vmem:[%s9093_s20 + $0x320] ss:$8 sps:$4 sm:$0xff]  }
 0x279   : > { %v1751_v38 = vadd.f32 %v1739_v19, %v1725_v28  ;;  %3460 = vmatpush1.bf16.msra.mxu1 %v7999_v18  ;;  %v1719_v9 = vmax.f32 %v9358_v43, %v1703_v40  ;;  %v8026_v40 = vld [vmem:[%s9093_s20 + $0x360] ss:$8 sps:$4 sm:$0xff]  }
 0x27a   : > { %v7807_v44 = vpop.f32.mrf.mxu0  ;;  %3461 = vmatprep.subr.bf16.mxu1 %v8007_v26  ;;  %v8031_v26 = vld [vmem:[%s9093_s20 + $0x204] ss:$8 sps:$4 sm:$0xff]  }
 0x27b   : > { %v9433_v36 = vpack.c.bf16 %v1751_v38, %v1751_v38  ;;  %v1745_v10 = vadd.f32 %v1739_v19, %v1719_v9  ;;  %v8034_v44 = vld [vmem:[%s9093_s20 + $0x354] ss:$8 sps:$4 sm:$0xff]  }
 0x27c   : > { %v1706_v2 = vpop.f32.mrf.mxu0  ;;  %v8037_v9 = vld [vmem:[%s9093_s20 + $0x2f4] ss:$8 sps:$4 sm:$0xff]  }
 0x27d   : > { %v1722_v35 = vmax.f32 %v1590_v14, %v1706_v2  ;;  %3462 = vmatpush1.bf16.msra.mxu1 %v8005_v41  ;;  %v1832_v39 = vshrl.u32 %v9433_v36, 16  ;;  %v1835_v48 = vshll.u32 %v9433_v36, 16  ;;  %v1771_v6 = vrot.slane %v9433_v36, 2  ;;  %v8032_v2 = vld [vmem:[%s9093_s20 + $0x350] ss:$8 sps:$4 sm:$0xff]  }
 0x27e   : > { %3463 = vmatprep.subr.bf16.mxu1 %v8013_v22  ;;  %v1863_v12 = vrot.slane %v9433_v36, 3  ;;  %v1916_v13 = vrot.slane %v9433_v36, 4  ;;  %v8121_v36 = vld [vmem:[%s9093_s20 + $0x414] ss:$8 sps:$4 sm:$0xff]  }
 0x27f   : > { %v1748_v49 = vadd.f32 %v1739_v19, %v1722_v35  ;;  %v1834_v1 = vrot.slane %v1832_v39, 2  ;;  %v1837_v4 = vrot.slane %v1835_v48, 3  ;;  %v8035_v35 = vld [vmem:[%s9093_s20 + $0x2f0] ss:$8 sps:$4 sm:$0xff]  }
 0x281   : > { %v1754_v43 = vpack.c.bf16 %v1748_v49, %v1745_v10  ;;  %3464 = vmatpush1.bf16.msra.mxu1 %v8011_v45  ;;  %v1838_v25 = vor.u32 %v1837_v4, %v1834_v1  ;;  %v8040_v45 = vld [vmem:[%s9093_s20 + $0x344] ss:$8 sps:$4 sm:$0xff]   ;;  %v8041_v10 = vld [vmem:[%s9093_s20 + $0x2e0] ss:$8 sps:$4 sm:$0xff]   ;;  %v8046_v49 = vld [vmem:[%s9093_s20 + $0x334] ss:$8 sps:$4 sm:$0xff]  }
 0x282   : > { %3465 = vmatprep.subr.bf16.mxu1 %v8019_v46  ;;  %v8043_v46 = vld [vmem:[%s9093_s20 + $0x2e4] ss:$8 sps:$4 sm:$0xff]   ;;  %v8053_v1 = vld [vmem:[%s9093_s20 + $0x2c0] ss:$8 sps:$4 sm:$0xff]   ;;  %v8058_v4 = vld [vmem:[%s9093_s20 + $0x314] ss:$8 sps:$4 sm:$0xff]  }
 0x283   : > { %v1770_v63 = vrot.slane %v1754_v43, 2  ;;  %v9452_v7 = vshrl.u32 %v1754_v43, 16  ;;  %v9454_v8 = vshll.u32 %v1754_v43, 16  ;;  %v1854_v21 = vrot.slane %v1754_v43, 1 }
 0x284   : > { %v1862_v11 = vrot.slane %v1754_v43, 3 }
 0x285   : > { %3466 = vmatpush1.bf16.msra.mxu1 %v8017_v59  ;;  %v1772_v14 = vsel %vm718_vm3, %v1770_v63, %v1771_v6  ;;  %v1801_v19 = vrot.slane %v9454_v8, 1  ;;  %v1828_v18 = vrot.slane %v9452_v7, 2  ;;  %v1829_v20 = vrot.slane %v9454_v8, 3  ;;  %v8047_v59 = vld [vmem:[%s9093_s20 + $0x2d0] ss:$8 sps:$4 sm:$0xff]  }
 0x286   : > { %v9465_v23 = vsel %vm822_vm9, %v1754_v43, %v1772_v14  ;;  %3467 = vmatprep.subr.bf16.mxu1 %v8025_v60  ;;  %v1864_v53 = vsel %vm1855_vm12, %v1862_v11, %v1863_v12  ;;  %v9475_v31 = vsel %vm822_vm9, %v1770_v63, %v1916_v13  ;;  %v8044_v43 = vld [vmem:[%s9093_s20 + $0x330] ss:$8 sps:$4 sm:$0xff]   ;;  %v8052_v60 = vld [vmem:[%s9093_s20 + $0x324] ss:$8 sps:$4 sm:$0xff]   ;;  %v8062_v11 = vld [vmem:[%s9093_s20 + $0x300] ss:$8 sps:$4 sm:$0xff]  }
 0x287   : > { %3445 = vmatmul.mubr.bf16.vlgmr.msra.gmra.mxu0 %v9465_v23  ;;  %v1802_v30 = vor.u32 %v1801_v19, %v9452_v7  ;;  %v1830_v28 = vor.u32 %v1829_v20, %v1828_v18  ;;  %v9480_v38 = vsel %vm822_vm9, %v1854_v21, %v1864_v53  ;;  %v8056_v63 = vld [vmem:[%s9093_s20 + $0x310] ss:$8 sps:$4 sm:$0xff]   ;;  %v8067_v21 = vld [vmem:[%s9093_s20 + $0x2a4] ss:$8 sps:$4 sm:$0xff]   ;;  %v8065_v12 = vld [vmem:[%s9093_s20 + $0x2a0] ss:$8 sps:$4 sm:$0xff]  }
 0x288   : > { %3499 = vmatpush1.bf16.msra.mxu0 %v8020_v5  ;;  %3530 = vmatprep.mubr.bf16.mxu0 %v9468_v24  ;;  %v8061_v5 = vld [vmem:[%s9093_s20 + $0x2b4] ss:$8 sps:$4 sm:$0xff]   ;;  %v8059_v6 = vld [vmem:[%s9093_s20 + $0x2b0] ss:$8 sps:$4 sm:$0xff]   ;;  %v1822_v19 = vrot.slane %v1820_v58, 2  ;;  %v1825_v18 = vrot.slane %v1823_v62, 3 }
 0x289   : > { %3468 = vmatpush1.bf16.msra.mxu1 %v8023_v3  ;;  %3500 = vmatprep.subr.bf16.mxu0 %v8028_v17  ;;  %v1839_v41 = vsel %vm1803_vm11, %v1830_v28, %v1838_v25  ;;  %v8064_v3 = vld [vmem:[%s9093_s20 + $0x304] ss:$8 sps:$4 sm:$0xff]   ;;  %v8070_v13 = vld [vmem:[%s9093_s20 + $0x3f4] ss:$8 sps:$4 sm:$0xff]   ;;  %v8068_v17 = vld [vmem:[%s9093_s20 + $0x3f0] ss:$8 sps:$4 sm:$0xff]  }
 0x28a   : > { %v9486_v22 = vsel %vm822_vm9, %v1802_v30, %v1839_v41  ;;  %3469 = vmatprep.subr.bf16.mxu1 %v8031_v26  ;;  %v8073_v14 = vld [vmem:[%s9093_s20 + $0x294] ss:$8 sps:$4 sm:$0xff]   ;;  %v8071_v20 = vld [vmem:[%s9093_s20 + $0x290] ss:$8 sps:$4 sm:$0xff]   ;;  %v8076_v25 = vld [vmem:[%s9093_s20 + $0x3e4] ss:$8 sps:$4 sm:$0xff]   ;;  %v1826_v58 = vor.u32 %v1825_v18, %v1822_v19 }
 0x28b   : > { %3487 = vmatprep.mubr.bf16.mxu1 %v9486_v22  ;;  %v8079_v26 = vld [vmem:[%s9093_s20 + $0x284] ss:$8 sps:$4 sm:$0xff]   ;;  %v1816_v30 = vrot.slane %v9373_v51, 2  ;;  %v1817_v28 = vrot.slane %v9382_v54, 3  ;;  %v8074_v53 = vld [vmem:[%s9093_s20 + $0x3e0] ss:$8 sps:$4 sm:$0xff]  }
 0x28c   : > { %3501 = vmatpush1.bf16.msra.mxu0 %v8026_v40  ;;  %v8082_v62 = vld [vmem:[%s9093_s20 + $0x3d4] ss:$8 sps:$4 sm:$0xff]   ;;  %v1795_v40 = vrot.slane %v9382_v54, 1  ;;  %v8091_v54 = vld [vmem:[%s9093_s20 + $0x464] ss:$8 sps:$4 sm:$0xff]  }
 0x28d   : > { %3470 = vmatpush1.bf16.msra.mxu1 %v8029_v34  ;;  %3502 = vmatprep.subr.bf16.mxu0 %v8034_v44  ;;  %v1818_v41 = vor.u32 %v1817_v28, %v1816_v30  ;;  %v8085_v34 = vld [vmem:[%s9093_s20 + $0x474] ss:$8 sps:$4 sm:$0xff]   ;;  %v8080_v44 = vld [vmem:[%s9093_s20 + $0x3d0] ss:$8 sps:$4 sm:$0xff]   ;;  %v8113_v19 = vld [vmem:[%s9093_s20 + $0x420] ss:$8 sps:$4 sm:$0xff]  }
 0x28e   : > { %3471 = vmatprep.subr.bf16.mxu1 %v8037_v9  ;;  %v8118_v18 = vld [vmem:[%s9093_s20 + $0x574] ss:$8 sps:$4 sm:$0xff]   ;;  %v8122_v28 = vld [vmem:[%s9093_s20 + $0x560] ss:$8 sps:$4 sm:$0xff]  }
 0x28f   : > { %v1827_v9 = vsel %vm1803_vm11, %v1818_v41, %v1826_v58  ;;  %v8130_v58 = vld [vmem:[%s9093_s20 + $0x554] ss:$8 sps:$4 sm:$0xff]   ;;  %v8136_v41 = vld [vmem:[%s9093_s20 + $0x544] ss:$8 sps:$4 sm:$0xff]  }
 0x290   : > { %3503 = vmatpush1.bf16.msra.mxu0 %v8032_v2  ;;  %v1796_v2 = vor.u32 %v1795_v40, %v9373_v51  ;;  %v8089_v51 = vld [vmem:[%s9093_s20 + $0x460] ss:$8 sps:$4 sm:$0xff]   ;;  %v8131_v40 = vld [vmem:[%s9093_s20 + $0x4f0] ss:$8 sps:$4 sm:$0xff]  }
 0x291   : > { %3472 = vmatpush2.bf16.msra.mxu1 %v8035_v35  ;;  %3504 = vmatprep.subr.bf16.mxu0 %v8040_v45  ;;  %v8083_v35 = vld [vmem:[%s9093_s20 + $0x470] ss:$8 sps:$4 sm:$0xff]   ;;  %v8088_v45 = vld [vmem:[%s9093_s20 + $0x3c4] ss:$8 sps:$4 sm:$0xff]  }
 0x292   : > { %3473 = vmatprep.subr.bf16.mxu1 %v8043_v46  ;;  %v9536_v46 = vsel %vm822_vm9, %v1796_v2, %v1827_v9  ;;  %v8137_v9 = vld [vmem:[%s9093_s20 + $0x4e0] ss:$8 sps:$4 sm:$0xff]   ;;  %v8142_v2 = vld [vmem:[%s9093_s20 + $0x534] ss:$8 sps:$4 sm:$0xff]  }
 0x294   : > { %3505 = vmatpush1.bf16.msra.mxu0 %v8038_v42  ;;  %v8086_v42 = vld [vmem:[%s9093_s20 + $0x3c0] ss:$8 sps:$4 sm:$0xff]  }
 0x295   : > { %3474 = vmatpush2.bf16.msra.mxu1 %v8041_v10  ;;  %3506 = vmatprep.subr.bf16.mxu0 %v8046_v49  ;;  %v8094_v10 = vld [vmem:[%s9093_s20 + $0x3b4] ss:$8 sps:$4 sm:$0xff]  }
 0x296   : > { %3475 = vmatprep.subr.bf16.mxu1 %v8049_v55  ;;  %v8097_v49 = vld [vmem:[%s9093_s20 + $0x454] ss:$8 sps:$4 sm:$0xff]   ;;  %v8092_v55 = vld [vmem:[%s9093_s20 + $0x3b0] ss:$8 sps:$4 sm:$0xff]  }
 0x298   : > { %3507 = vmatpush1.bf16.msra.mxu0 %v8044_v43  ;;  %v8095_v43 = vld [vmem:[%s9093_s20 + $0x450] ss:$8 sps:$4 sm:$0xff]  }
 0x299   : > { %3476 = vmatpush2.bf16.msra.mxu1 %v8047_v59  ;;  %3508 = vmatprep.subr.bf16.mxu0 %v8052_v60  ;;  %v8100_v59 = vld [vmem:[%s9093_s20 + $0x3a4] ss:$8 sps:$4 sm:$0xff]  }
 0x29a   : > { %3477 = vmatprep.subr.bf16.mxu1 %v8055_v61  ;;  %v8103_v60 = vld [vmem:[%s9093_s20 + $0x444] ss:$8 sps:$4 sm:$0xff]   ;;  %v8098_v61 = vld [vmem:[%s9093_s20 + $0x3a0] ss:$8 sps:$4 sm:$0xff]  }
 0x29c   : > { %3509 = vmatpush1.bf16.msra.mxu0 %v8050_v0  ;;  %v8101_v0 = vld [vmem:[%s9093_s20 + $0x440] ss:$8 sps:$4 sm:$0xff]  }
 0x29d   : > { %3478 = vmatpush2.bf16.msra.mxu1 %v8053_v1  ;;  %3510 = vmatprep.subr.bf16.mxu0 %v8058_v4  ;;  %v8106_v1 = vld [vmem:[%s9093_s20 + $0x394] ss:$8 sps:$4 sm:$0xff]  }
 0x29e   : > { %3479 = vmatprep.subr.bf16.mxu1 %v8061_v5  ;;  %v8109_v4 = vld [vmem:[%s9093_s20 + $0x434] ss:$8 sps:$4 sm:$0xff]   ;;  %v8104_v5 = vld [vmem:[%s9093_s20 + $0x390] ss:$8 sps:$4 sm:$0xff]  }
 0x2a0   : > { %3511 = vmatpush1.bf16.msra.mxu0 %v8056_v63  ;;  %v8107_v63 = vld [vmem:[%s9093_s20 + $0x430] ss:$8 sps:$4 sm:$0xff]  }
 0x2a1   : > { %3480 = vmatpush2.bf16.msra.mxu1 %v8059_v6  ;;  %3512 = vmatprep.subr.bf16.mxu0 %v8064_v3  ;;  %v8112_v6 = vld [vmem:[%s9093_s20 + $0x384] ss:$8 sps:$4 sm:$0xff]  }
 0x2a2   : > { %3481 = vmatprep.subr.bf16.mxu1 %v8067_v21  ;;  %v8115_v3 = vld [vmem:[%s9093_s20 + $0x424] ss:$8 sps:$4 sm:$0xff]   ;;  %v1898_v21 = vrot.slane %v1832_v39, 3 }
 0x2a4   : > { %3513 = vmatpush1.bf16.msra.mxu0 %v8062_v11  ;;  %v1899_v11 = vrot.slane %v1835_v48, 4 }
 0x2a5   : > { %3482 = vmatpush2.bf16.msra.mxu1 %v8065_v12  ;;  %3514 = vmatprep.subr.bf16.mxu0 %v8070_v13  ;;  %v1883_v12 = vrot.slane %v9452_v7, 1  ;;  %v1884_v13 = vrot.slane %v9454_v8, 2 }
 0x2a6   : > { %3483 = vmatprep.subr.bf16.mxu1 %v8073_v14  ;;  %v8110_v14 = vld [vmem:[%s9093_s20 + $0x380] ss:$8 sps:$4 sm:$0xff]   ;;  %v1900_v39 = vor.u32 %v1899_v11, %v1898_v21  ;;  %v8172_v21 = vld [vmem:[%s9093_s20 + $0x5e4] ss:$8 sps:$4 sm:$0xff]  }
 0x2a7   : > { %v1885_v48 = vor.u32 %v1884_v13, %v1883_v12  ;;  %v8175_v11 = vld [vmem:[%s9093_s20 + $0x484] ss:$8 sps:$4 sm:$0xff]   ;;  %v8170_v12 = vld [vmem:[%s9093_s20 + $0x5e0] ss:$8 sps:$4 sm:$0xff]  }
 0x2a8   : > { %3515 = vmatpush2.bf16.msra.mxu0 %v8068_v17  ;;  %v1897_v17 = vrot.slane %v9452_v7, 3  ;;  %v8119_v7 = vld [vmem:[%s9093_s20 + $0x410] ss:$8 sps:$4 sm:$0xff]   ;;  %v8173_v13 = vld [vmem:[%s9093_s20 + $0x480] ss:$8 sps:$4 sm:$0xff]  }
 0x2a9   : > { %3484 = vmatpush2.bf16.msra.mxu1 %v8071_v20  ;;  %3516 = vmatprep.subr.bf16.mxu0 %v8076_v25  ;;  %v8116_v20 = vld [vmem:[%s9093_s20 + $0x570] ss:$8 sps:$4 sm:$0xff]   ;;  %v8124_v25 = vld [vmem:[%s9093_s20 + $0x564] ss:$8 sps:$4 sm:$0xff]  }
 0x2aa   : > { %3485 = vmatprep.subr.bf16.mxu1 %v8079_v26  ;;  %v1901_v8 = vsel %vm1886_vm13, %v1897_v17, %v1900_v39  ;;  %v8127_v26 = vld [vmem:[%s9093_s20 + $0x404] ss:$8 sps:$4 sm:$0xff]   ;;  %v8181_v17 = vld [vmem:[%s9093_s20 + $0x674] ss:$8 sps:$4 sm:$0xff]  }
 0x2ab   : > { %v9574_v30 = vsel %vm822_vm9, %v1885_v48, %v1901_v8  ;;  %v8184_v39 = vld [vmem:[%s9093_s20 + $0x5c4] ss:$8 sps:$4 sm:$0xff]   ;;  %v8182_v48 = vld [vmem:[%s9093_s20 + $0x5c0] ss:$8 sps:$4 sm:$0xff]   ;;  %v8190_v8 = vld [vmem:[%s9093_s20 + $0x5b4] ss:$8 sps:$4 sm:$0xff]  }
 0x2ac   : > { %3517 = vmatpush2.bf16.msra.mxu0 %v8074_v53  ;;  %v8125_v53 = vld [vmem:[%s9093_s20 + $0x400] ss:$8 sps:$4 sm:$0xff]  }
 0x2ad   : > { %3486 = vmatpush2.bf16.msra.mxu1 %v8077_v29  ;;  %3518 = vmatprep.subr.bf16.mxu0 %v8082_v62  ;;  %v8133_v29 = vld [vmem:[%s9093_s20 + $0x4f4] ss:$8 sps:$4 sm:$0xff]   ;;  %v8128_v62 = vld [vmem:[%s9093_s20 + $0x550] ss:$8 sps:$4 sm:$0xff]  }
 0x2ae   : > { %3541 = vmatprep.subr.bf16.mxu1 %v8085_v34  ;;  %v8139_v34 = vld [vmem:[%s9093_s20 + $0x4e4] ss:$8 sps:$4 sm:$0xff]  }
 0x2b0   : > { %3519 = vmatpush2.bf16.msra.mxu0 %v8080_v44  ;;  %3488 = vmatmul.mubr.bf16.vlgmr.msra.gmra.mxu1 %v9536_v46  ;;  %v8134_v44 = vld [vmem:[%s9093_s20 + $0x540] ss:$8 sps:$4 sm:$0xff]  }
 0x2b1   : > { %3542 = vmatpush1.bf16.msra.mxu1 %v8083_v35  ;;  %3573 = vmatprep.mubr.bf16.mxu1 %v9417_v27  ;;  %v8145_v35 = vld [vmem:[%s9093_s20 + $0x4d4] ss:$8 sps:$4 sm:$0xff]  }
 0x2b2   : > { %3520 = vmatprep.subr.bf16.mxu0 %v8088_v45  ;;  %3543 = vmatprep.subr.bf16.mxu1 %v8091_v54  ;;  %v8140_v45 = vld [vmem:[%s9093_s20 + $0x530] ss:$8 sps:$4 sm:$0xff]  }
 0x2b3   : > { %v8143_v54 = vld [vmem:[%s9093_s20 + $0x4d0] ss:$8 sps:$4 sm:$0xff]  }
 0x2b4   : > { %3521 = vmatpush2.bf16.msra.mxu0 %v8086_v42  ;;  %v8148_v42 = vld [vmem:[%s9093_s20 + $0x524] ss:$8 sps:$4 sm:$0xff]  }
 0x2b5   : > { %3544 = vmatpush1.bf16.msra.mxu1 %v8089_v51  ;;  %3522 = vmatprep.subr.bf16.mxu0 %v8094_v10  ;;  %v8151_v51 = vld [vmem:[%s9093_s20 + $0x4c4] ss:$8 sps:$4 sm:$0xff]   ;;  %v8146_v10 = vld [vmem:[%s9093_s20 + $0x520] ss:$8 sps:$4 sm:$0xff]  }
 0x2b6   : > { %3545 = vmatprep.subr.bf16.mxu1 %v8097_v49  ;;  %v8149_v49 = vld [vmem:[%s9093_s20 + $0x4c0] ss:$8 sps:$4 sm:$0xff]  }
 0x2b8   : > { %3523 = vmatpush2.bf16.msra.mxu0 %v8092_v55  ;;  %v8154_v55 = vld [vmem:[%s9093_s20 + $0x514] ss:$8 sps:$4 sm:$0xff]  }
 0x2b9   : > { %3546 = vmatpush1.bf16.msra.mxu1 %v8095_v43  ;;  %3524 = vmatprep.subr.bf16.mxu0 %v8100_v59  ;;  %v8157_v43 = vld [vmem:[%s9093_s20 + $0x4b4] ss:$8 sps:$4 sm:$0xff]   ;;  %v8152_v59 = vld [vmem:[%s9093_s20 + $0x510] ss:$8 sps:$4 sm:$0xff]  }
 0x2ba   : > { %3547 = vmatprep.subr.bf16.mxu1 %v8103_v60  ;;  %v8155_v60 = vld [vmem:[%s9093_s20 + $0x4b0] ss:$8 sps:$4 sm:$0xff]  }
 0x2bc   : > { %3525 = vmatpush2.bf16.msra.mxu0 %v8098_v61  ;;  %v8160_v61 = vld [vmem:[%s9093_s20 + $0x504] ss:$8 sps:$4 sm:$0xff]  }
 0x2bd   : > { %3548 = vmatpush1.bf16.msra.mxu1 %v8101_v0  ;;  %3526 = vmatprep.subr.bf16.mxu0 %v8106_v1  ;;  %v8163_v0 = vld [vmem:[%s9093_s20 + $0x4a4] ss:$8 sps:$4 sm:$0xff]   ;;  %v8158_v1 = vld [vmem:[%s9093_s20 + $0x500] ss:$8 sps:$4 sm:$0xff]  }
 0x2be   : > { %3549 = vmatprep.subr.bf16.mxu1 %v8109_v4  ;;  %v8161_v4 = vld [vmem:[%s9093_s20 + $0x4a0] ss:$8 sps:$4 sm:$0xff]  }
 0x2c0   : > { %3527 = vmatpush2.bf16.msra.mxu0 %v8104_v5  ;;  %v8166_v5 = vld [vmem:[%s9093_s20 + $0x5f4] ss:$8 sps:$4 sm:$0xff]  }
 0x2c1   : > { %3550 = vmatpush1.bf16.msra.mxu1 %v8107_v63  ;;  %3528 = vmatprep.subr.bf16.mxu0 %v8112_v6  ;;  %v8169_v63 = vld [vmem:[%s9093_s20 + $0x494] ss:$8 sps:$4 sm:$0xff]   ;;  %v8164_v6 = vld [vmem:[%s9093_s20 + $0x5f0] ss:$8 sps:$4 sm:$0xff]  }
 0x2c2   : > { %3551 = vmatprep.subr.bf16.mxu1 %v8115_v3  ;;  %v8167_v3 = vld [vmem:[%s9093_s20 + $0x490] ss:$8 sps:$4 sm:$0xff]  }
 0x2c4   : > { %3529 = vmatpush2.bf16.msra.mxu0 %v8110_v14  ;;  %v8178_v14 = vld [vmem:[%s9093_s20 + $0x5d4] ss:$8 sps:$4 sm:$0xff]  }
 0x2c5   : > { %3552 = vmatpush1.bf16.msra.mxu1 %v8113_v19  ;;  %3584 = vmatprep.subr.bf16.mxu0 %v8118_v18  ;;  %v8176_v19 = vld [vmem:[%s9093_s20 + $0x5d0] ss:$8 sps:$4 sm:$0xff]  }
 0x2c6   : > { %3553 = vmatprep.subr.bf16.mxu1 %v8121_v36  ;;  %v8179_v18 = vld [vmem:[%s9093_s20 + $0x670] ss:$8 sps:$4 sm:$0xff]   ;;  %v8187_v36 = vld [vmem:[%s9093_s20 + $0x664] ss:$8 sps:$4 sm:$0xff]  }
 0x2c7   : > { %3531 = vmatmul.mubr.bf16.vlgmr.msra.gmra.mxu0 %v9403_v15 }
 0x2c8   : > { %3585 = vmatpush1.bf16.msra.mxu0 %v8116_v20  ;;  %3616 = vmatprep.mubr.bf16.mxu0 %v9574_v30  ;;  %v8185_v20 = vld [vmem:[%s9093_s20 + $0x660] ss:$8 sps:$4 sm:$0xff]  }
 0x2c9   : > { %3554 = vmatpush1.bf16.msra.mxu1 %v8119_v7  ;;  %3586 = vmatprep.subr.bf16.mxu0 %v8124_v25  ;;  %v8193_v7 = vld [vmem:[%s9093_s20 + $0x654] ss:$8 sps:$4 sm:$0xff]   ;;  %v8188_v25 = vld [vmem:[%s9093_s20 + $0x5b0] ss:$8 sps:$4 sm:$0xff]  }
 0x2ca   : > { %3555 = vmatprep.subr.bf16.mxu1 %v8127_v26  ;;  %v8191_v26 = vld [vmem:[%s9093_s20 + $0x650] ss:$8 sps:$4 sm:$0xff]  }
 0x2cc   : > { %3587 = vmatpush1.bf16.msra.mxu0 %v8122_v28  ;;  %v8196_v28 = vld [vmem:[%s9093_s20 + $0x5a4] ss:$8 sps:$4 sm:$0xff]  }
 0x2cd   : > { %3556 = vmatpush1.bf16.msra.mxu1 %v8125_v53  ;;  %3588 = vmatprep.subr.bf16.mxu0 %v8130_v58  ;;  %v8199_v53 = vld [vmem:[%s9093_s20 + $0x644] ss:$8 sps:$4 sm:$0xff]   ;;  %v8194_v58 = vld [vmem:[%s9093_s20 + $0x5a0] ss:$8 sps:$4 sm:$0xff]  }
 0x2ce   : > { %3557 = vmatprep.subr.bf16.mxu1 %v8133_v29  ;;  %v8197_v29 = vld [vmem:[%s9093_s20 + $0x640] ss:$8 sps:$4 sm:$0xff]  }
 0x2d0   : > { %3589 = vmatpush1.bf16.msra.mxu0 %v8128_v62  ;;  %v8202_v62 = vld [vmem:[%s9093_s20 + $0x594] ss:$8 sps:$4 sm:$0xff]  }
 0x2d1   : > { %3558 = vmatpush2.bf16.msra.mxu1 %v8131_v40  ;;  %3590 = vmatprep.subr.bf16.mxu0 %v8136_v41  ;;  %v8205_v40 = vld [vmem:[%s9093_s20 + $0x634] ss:$8 sps:$4 sm:$0xff]   ;;  %v8200_v41 = vld [vmem:[%s9093_s20 + $0x590] ss:$8 sps:$4 sm:$0xff]  }
 0x2d2   : > { %3559 = vmatprep.subr.bf16.mxu1 %v8139_v34  ;;  %v8203_v34 = vld [vmem:[%s9093_s20 + $0x630] ss:$8 sps:$4 sm:$0xff]  }
 0x2d4   : > { %3591 = vmatpush1.bf16.msra.mxu0 %v8134_v44  ;;  %v8208_v44 = vld [vmem:[%s9093_s20 + $0x584] ss:$8 sps:$4 sm:$0xff]  }
 0x2d5   : > { %3560 = vmatpush2.bf16.msra.mxu1 %v8137_v9  ;;  %3592 = vmatprep.subr.bf16.mxu0 %v8142_v2  ;;  %v8211_v9 = vld [vmem:[%s9093_s20 + $0x624] ss:$8 sps:$4 sm:$0xff]   ;;  %v8206_v2 = vld [vmem:[%s9093_s20 + $0x580] ss:$8 sps:$4 sm:$0xff]  }
 0x2d6   : > { %3561 = vmatprep.subr.bf16.mxu1 %v8145_v35  ;;  %v8209_v35 = vld [vmem:[%s9093_s20 + $0x620] ss:$8 sps:$4 sm:$0xff]  }
 0x2d8   : > { %3593 = vmatpush1.bf16.msra.mxu0 %v8140_v45  ;;  %v8214_v45 = vld [vmem:[%s9093_s20 + $0x774] ss:$8 sps:$4 sm:$0xff]  }
 0x2d9   : > { %3562 = vmatpush2.bf16.msra.mxu1 %v8143_v54  ;;  %3594 = vmatprep.subr.bf16.mxu0 %v8148_v42  ;;  %v8217_v54 = vld [vmem:[%s9093_s20 + $0x614] ss:$8 sps:$4 sm:$0xff]   ;;  %v8212_v42 = vld [vmem:[%s9093_s20 + $0x770] ss:$8 sps:$4 sm:$0xff]  }
 0x2da   : > { %3563 = vmatprep.subr.bf16.mxu1 %v8151_v51  ;;  %v8215_v51 = vld [vmem:[%s9093_s20 + $0x610] ss:$8 sps:$4 sm:$0xff]  }
 0x2dc   : > { %3595 = vmatpush1.bf16.msra.mxu0 %v8146_v10  ;;  %v8220_v10 = vld [vmem:[%s9093_s20 + $0x764] ss:$8 sps:$4 sm:$0xff]  }
 0x2dd   : > { %3564 = vmatpush2.bf16.msra.mxu1 %v8149_v49  ;;  %3596 = vmatprep.subr.bf16.mxu0 %v8154_v55  ;;  %v8223_v49 = vld [vmem:[%s9093_s20 + $0x604] ss:$8 sps:$4 sm:$0xff]   ;;  %v8218_v55 = vld [vmem:[%s9093_s20 + $0x760] ss:$8 sps:$4 sm:$0xff]  }
 0x2de   : > { %3565 = vmatprep.subr.bf16.mxu1 %v8157_v43  ;;  %v8221_v43 = vld [vmem:[%s9093_s20 + $0x600] ss:$8 sps:$4 sm:$0xff]  }
 0x2e0   : > { %3597 = vmatpush1.bf16.msra.mxu0 %v8152_v59  ;;  %v8226_v59 = vld [vmem:[%s9093_s20 + $0x754] ss:$8 sps:$4 sm:$0xff]  }
 0x2e1   : > { %3566 = vmatpush2.bf16.msra.mxu1 %v8155_v60  ;;  %3598 = vmatprep.subr.bf16.mxu0 %v8160_v61  ;;  %v8229_v60 = vld [vmem:[%s9093_s20 + $0x6f4] ss:$8 sps:$4 sm:$0xff]   ;;  %v8224_v61 = vld [vmem:[%s9093_s20 + $0x750] ss:$8 sps:$4 sm:$0xff]  }
 0x2e2   : > { %3567 = vmatprep.subr.bf16.mxu1 %v8163_v0  ;;  %v8227_v0 = vld [vmem:[%s9093_s20 + $0x6f0] ss:$8 sps:$4 sm:$0xff]  }
 0x2e4   : > { %3599 = vmatpush1.bf16.msra.mxu0 %v8158_v1  ;;  %v8232_v1 = vld [vmem:[%s9093_s20 + $0x744] ss:$8 sps:$4 sm:$0xff]  }
 0x2e5   : > { %3568 = vmatpush2.bf16.msra.mxu1 %v8161_v4  ;;  %3600 = vmatprep.subr.bf16.mxu0 %v8166_v5  ;;  %v8235_v4 = vld [vmem:[%s9093_s20 + $0x6e4] ss:$8 sps:$4 sm:$0xff]   ;;  %v8230_v5 = vld [vmem:[%s9093_s20 + $0x740] ss:$8 sps:$4 sm:$0xff]  }
 0x2e6   : > { %3569 = vmatprep.subr.bf16.mxu1 %v8169_v63  ;;  %v8233_v63 = vld [vmem:[%s9093_s20 + $0x6e0] ss:$8 sps:$4 sm:$0xff]  }
 0x2e8   : > { %3601 = vmatpush2.bf16.msra.mxu0 %v8164_v6  ;;  %v8238_v6 = vld [vmem:[%s9093_s20 + $0x734] ss:$8 sps:$4 sm:$0xff]  }
 0x2e9   : > { %3570 = vmatpush2.bf16.msra.mxu1 %v8167_v3  ;;  %3602 = vmatprep.subr.bf16.mxu0 %v8172_v21  ;;  %v8241_v3 = vld [vmem:[%s9093_s20 + $0x6d4] ss:$8 sps:$4 sm:$0xff]   ;;  %v8236_v21 = vld [vmem:[%s9093_s20 + $0x730] ss:$8 sps:$4 sm:$0xff]  }
 0x2ea   : > { %3571 = vmatprep.subr.bf16.mxu1 %v8175_v11  ;;  %v8239_v11 = vld [vmem:[%s9093_s20 + $0x6d0] ss:$8 sps:$4 sm:$0xff]  }
 0x2ec   : > { %3603 = vmatpush2.bf16.msra.mxu0 %v8170_v12  ;;  %v8244_v12 = vld [vmem:[%s9093_s20 + $0x724] ss:$8 sps:$4 sm:$0xff]  }
 0x2ed   : > { %3572 = vmatpush2.bf16.msra.mxu1 %v8173_v13  ;;  %3604 = vmatprep.subr.bf16.mxu0 %v8178_v14  ;;  %v8247_v13 = vld [vmem:[%s9093_s20 + $0x6c4] ss:$8 sps:$4 sm:$0xff]   ;;  %v8242_v14 = vld [vmem:[%s9093_s20 + $0x720] ss:$8 sps:$4 sm:$0xff]  }
 0x2ee   : > { %3627 = vmatprep.subr.bf16.mxu1 %v8181_v17  ;;  %v8245_v17 = vld [vmem:[%s9093_s20 + $0x6c0] ss:$8 sps:$4 sm:$0xff]  }
 0x2f0   : > { %3605 = vmatpush2.bf16.msra.mxu0 %v8176_v19  ;;  %3574 = vmatmul.mubr.bf16.vlgmr.msra.gmra.mxu1 %v9480_v38  ;;  %v8250_v19 = vld [vmem:[%s9093_s20 + $0x714] ss:$8 sps:$4 sm:$0xff]  }
 0x2f1   : > { %3628 = vmatpush1.bf16.msra.mxu1 %v8179_v18  ;;  %3659 = vmatprep.mubr.bf16.mxu1 %v9406_v16  ;;  %v8253_v18 = vld [vmem:[%s9093_s20 + $0x6b4] ss:$8 sps:$4 sm:$0xff]  }
 0x2f2   : > { %3606 = vmatprep.subr.bf16.mxu0 %v8184_v39  ;;  %3629 = vmatprep.subr.bf16.mxu1 %v8187_v36  ;;  %v8248_v39 = vld [vmem:[%s9093_s20 + $0x710] ss:$8 sps:$4 sm:$0xff]  }
 0x2f3   : > { %v8251_v36 = vld [vmem:[%s9093_s20 + $0x6b0] ss:$8 sps:$4 sm:$0xff]  }
 0x2f4   : > { %3607 = vmatpush2.bf16.msra.mxu0 %v8182_v48  ;;  %v8256_v48 = vld [vmem:[%s9093_s20 + $0x704] ss:$8 sps:$4 sm:$0xff]  }
 0x2f5   : > { %3630 = vmatpush1.bf16.msra.mxu1 %v8185_v20  ;;  %3608 = vmatprep.subr.bf16.mxu0 %v8190_v8  ;;  %v8259_v20 = vld [vmem:[%s9093_s20 + $0x6a4] ss:$8 sps:$4 sm:$0xff]   ;;  %v8254_v8 = vld [vmem:[%s9093_s20 + $0x700] ss:$8 sps:$4 sm:$0xff]  }
 0x2f6   : > { %3631 = vmatprep.subr.bf16.mxu1 %v8193_v7  ;;  %v8257_v7 = vld [vmem:[%s9093_s20 + $0x6a0] ss:$8 sps:$4 sm:$0xff]  }
 0x2f8   : > { %3609 = vmatpush2.bf16.msra.mxu0 %v8188_v25  ;;  %v8262_v25 = vld [vmem:[%s9117_s23 + $0x74] ss:$8 sps:$4 sm:$0xff]  }
 0x2f9   : > { %3632 = vmatpush1.bf16.msra.mxu1 %v8191_v26  ;;  %3610 = vmatprep.subr.bf16.mxu0 %v8196_v28  ;;  %v8265_v26 = vld [vmem:[%s9093_s20 + $0x694] ss:$8 sps:$4 sm:$0xff]   ;;  %v8260_v28 = vld [vmem:[%s9117_s23 + $0x70] ss:$8 sps:$4 sm:$0xff]  }
 0x2fa   : > { %3633 = vmatprep.subr.bf16.mxu1 %v8199_v53  ;;  %v8263_v53 = vld [vmem:[%s9093_s20 + $0x690] ss:$8 sps:$4 sm:$0xff]  }
 0x2fc   : > { %3611 = vmatpush2.bf16.msra.mxu0 %v8194_v58  ;;  %v8268_v58 = vld [vmem:[%s9117_s23 + $0x64] ss:$8 sps:$4 sm:$0xff]  }
 0x2fd   : > { %3634 = vmatpush1.bf16.msra.mxu1 %v8197_v29  ;;  %3612 = vmatprep.subr.bf16.mxu0 %v8202_v62  ;;  %v8271_v29 = vld [vmem:[%s9093_s20 + $0x684] ss:$8 sps:$4 sm:$0xff]   ;;  %v8266_v62 = vld [vmem:[%s9117_s23 + $0x60] ss:$8 sps:$4 sm:$0xff]  }
 0x2fe   : > { %3635 = vmatprep.subr.bf16.mxu1 %v8205_v40  ;;  %v8269_v40 = vld [vmem:[%s9093_s20 + $0x680] ss:$8 sps:$4 sm:$0xff]  }
 0x300   : > { %3613 = vmatpush2.bf16.msra.mxu0 %v8200_v41  ;;  %v8274_v41 = vld [vmem:[%s9117_s23 + $0x54] ss:$8 sps:$4 sm:$0xff]  }
 0x301   : > { %3636 = vmatpush1.bf16.msra.mxu1 %v8203_v34  ;;  %3614 = vmatprep.subr.bf16.mxu0 %v8208_v44  ;;  %v8277_v34 = vld [vmem:[%s9117_s23 + $0x174] ss:$8 sps:$4 sm:$0xff]   ;;  %v8272_v44 = vld [vmem:[%s9117_s23 + $0x50] ss:$8 sps:$4 sm:$0xff]  }
 0x302   : > { %3637 = vmatprep.subr.bf16.mxu1 %v8211_v9  ;;  %v8275_v9 = vld [vmem:[%s9117_s23 + $0x170] ss:$8 sps:$4 sm:$0xff]  }
 0x304   : > { %3615 = vmatpush2.bf16.msra.mxu0 %v8206_v2  ;;  %v8280_v2 = vld [vmem:[%s9117_s23 + $0x44] ss:$8 sps:$4 sm:$0xff]  }
 0x305   : > { %3638 = vmatpush1.bf16.msra.mxu1 %v8209_v35  ;;  %3670 = vmatprep.subr.bf16.mxu0 %v8214_v45  ;;  %v8278_v35 = vld [vmem:[%s9117_s23 + $0x40] ss:$8 sps:$4 sm:$0xff]  }
 0x306   : > { %3639 = vmatprep.subr.bf16.mxu1 %v8217_v54  ;;  %v8281_v45 = vld [vmem:[%s9117_s23 + $0x160] ss:$8 sps:$4 sm:$0xff]   ;;  %v8286_v54 = vld [vmem:[%s9117_s23 + $0x34] ss:$8 sps:$4 sm:$0xff]  }
 0x307   : > { %3617 = vmatmul.mubr.bf16.vlgmr.msra.gmra.mxu0 %v9431_v32 }
 0x308   : > { %3671 = vmatpush1.bf16.msra.mxu0 %v8212_v42  ;;  %3702 = vmatprep.mubr.bf16.mxu0 %v8849_v33  ;;  %v8289_v42 = vld [vmem:[%s9117_s23 + $0x154] ss:$8 sps:$4 sm:$0xff]  }
 0x309   : > { %3640 = vmatpush1.bf16.msra.mxu1 %v8215_v51  ;;  %3672 = vmatprep.subr.bf16.mxu0 %v8220_v10  ;;  %v8284_v51 = vld [vmem:[%s9117_s23 + $0x30] ss:$8 sps:$4 sm:$0xff]  }
 0x30a   : > { %3641 = vmatprep.subr.bf16.mxu1 %v8223_v49  ;;  %v8287_v10 = vld [vmem:[%s9117_s23 + $0x150] ss:$8 sps:$4 sm:$0xff]   ;;  %v8292_v49 = vld [vmem:[%s9117_s23 + $0x24] ss:$8 sps:$4 sm:$0xff]  }
 0x30c   : > { %3673 = vmatpush1.bf16.msra.mxu0 %v8218_v55  ;;  %v8295_v55 = vld [vmem:[%s9117_s23 + $0x144] ss:$8 sps:$4 sm:$0xff]  }
 0x30d   : > { %3642 = vmatpush1.bf16.msra.mxu1 %v8221_v43  ;;  %3674 = vmatprep.subr.bf16.mxu0 %v8226_v59  ;;  %v8293_v43 = vld [vmem:[%s9117_s23 + $0x140] ss:$8 sps:$4 sm:$0xff]   ;;  %v8298_v59 = vld [vmem:[%s9117_s23 + $0x14] ss:$8 sps:$4 sm:$0xff]  }
 0x30e   : > { %3643 = vmatprep.subr.bf16.mxu1 %v8229_v60  ;;  %v8301_v60 = vld [vmem:[%s9117_s23 + $0x134] ss:$8 sps:$4 sm:$0xff]  }
 0x310   : > { %3675 = vmatpush1.bf16.msra.mxu0 %v8224_v61  ;;  %v8296_v61 = vld [vmem:[%s9117_s23 + $0x10] ss:$8 sps:$4 sm:$0xff]  }
 0x311   : > { %3644 = vmatpush2.bf16.msra.mxu1 %v8227_v0  ;;  %3676 = vmatprep.subr.bf16.mxu0 %v8232_v1  ;;  %v8299_v0 = vld [vmem:[%s9117_s23 + $0x130] ss:$8 sps:$4 sm:$0xff]   ;;  %v8304_v1 = vld [vmem:[%s9117_s23 + $0x4] ss:$8 sps:$4 sm:$0xff]  }
 0x312   : > { %3645 = vmatprep.subr.bf16.mxu1 %v8235_v4  ;;  %v8307_v4 = vld [vmem:[%s9117_s23 + $0x124] ss:$8 sps:$4 sm:$0xff]  }
 0x314   : > { %3677 = vmatpush1.bf16.msra.mxu0 %v8230_v5  ;;  %v8302_v5 = vld [vmem:[%s9117_s23] ss:$8 sps:$4 sm:$0xff]  }
 0x315   : > { %3646 = vmatpush2.bf16.msra.mxu1 %v8233_v63  ;;  %3678 = vmatprep.subr.bf16.mxu0 %v8238_v6  ;;  %v8305_v63 = vld [vmem:[%s9117_s23 + $0x120] ss:$8 sps:$4 sm:$0xff]   ;;  %v8310_v6 = vld [vmem:[%s9117_s23 + $0xf4] ss:$8 sps:$4 sm:$0xff]  }
 0x316   : > { %3647 = vmatprep.subr.bf16.mxu1 %v8241_v3  ;;  %v8313_v3 = vld [vmem:[%s9117_s23 + $0x114] ss:$8 sps:$4 sm:$0xff]  }
 0x318   : > { %3679 = vmatpush1.bf16.msra.mxu0 %v8236_v21  ;;  %v8308_v21 = vld [vmem:[%s9117_s23 + $0xf0] ss:$8 sps:$4 sm:$0xff]  }
 0x319   : > { %3648 = vmatpush2.bf16.msra.mxu1 %v8239_v11  ;;  %3680 = vmatprep.subr.bf16.mxu0 %v8244_v12  ;;  %v8311_v11 = vld [vmem:[%s9117_s23 + $0x110] ss:$8 sps:$4 sm:$0xff]   ;;  %v8316_v12 = vld [vmem:[%s9117_s23 + $0xe4] ss:$8 sps:$4 sm:$0xff]  }
 0x31a   : > { %3649 = vmatprep.subr.bf16.mxu1 %v8247_v13  ;;  %v8319_v13 = vld [vmem:[%s9117_s23 + $0x104] ss:$8 sps:$4 sm:$0xff]  }
 0x31c   : > { %3681 = vmatpush1.bf16.msra.mxu0 %v8242_v14  ;;  %v8314_v14 = vld [vmem:[%s9117_s23 + $0xe0] ss:$8 sps:$4 sm:$0xff]  }
 0x31d   : > { %3650 = vmatpush2.bf16.msra.mxu1 %v8245_v17  ;;  %3682 = vmatprep.subr.bf16.mxu0 %v8250_v19  ;;  %v8317_v17 = vld [vmem:[%s9117_s23 + $0x100] ss:$8 sps:$4 sm:$0xff]   ;;  %v8322_v19 = vld [vmem:[%s9117_s23 + $0xd4] ss:$8 sps:$4 sm:$0xff]  }
 0x31e   : > { %3651 = vmatprep.subr.bf16.mxu1 %v8253_v18  ;;  %v8325_v18 = vld [vmem:[%s9117_s23 + $0x1f4] ss:$8 sps:$4 sm:$0xff]  }
 0x320   : > { %3683 = vmatpush1.bf16.msra.mxu0 %v8248_v39  ;;  %v8320_v39 = vld [vmem:[%s9117_s23 + $0xd0] ss:$8 sps:$4 sm:$0xff]  }
 0x321   : > { %3652 = vmatpush2.bf16.msra.mxu1 %v8251_v36  ;;  %3684 = vmatprep.subr.bf16.mxu0 %v8256_v48  ;;  %v8323_v36 = vld [vmem:[%s9117_s23 + $0x1f0] ss:$8 sps:$4 sm:$0xff]   ;;  %v8328_v48 = vld [vmem:[%s9117_s23 + $0xc4] ss:$8 sps:$4 sm:$0xff]  }
 0x322   : > { %3653 = vmatprep.subr.bf16.mxu1 %v8259_v20  ;;  %v8331_v20 = vld [vmem:[%s9117_s23 + $0x1e4] ss:$8 sps:$4 sm:$0xff]  }
 0x324   : > { %3685 = vmatpush1.bf16.msra.mxu0 %v8254_v8  ;;  %v8326_v8 = vld [vmem:[%s9117_s23 + $0xc0] ss:$8 sps:$4 sm:$0xff]  }
 0x325   : > { %3654 = vmatpush2.bf16.msra.mxu1 %v8257_v7  ;;  %5153 = vmatprep.subr.bf16.mxu0 %v8262_v25  ;;  %v8329_v7 = vld [vmem:[%s9117_s23 + $0x1e0] ss:$8 sps:$4 sm:$0xff]   ;;  %v8334_v25 = vld [vmem:[%s9117_s23 + $0xb4] ss:$8 sps:$4 sm:$0xff]  }
 0x326   : > { %3655 = vmatprep.subr.bf16.mxu1 %v8265_v26  ;;  %v8337_v26 = vld [vmem:[%s9117_s23 + $0x1d4] ss:$8 sps:$4 sm:$0xff]  }
 0x327   : > { %3703 = vmatmul.mubr.bf16.vlgmr.msra.gmra.mxu0 %v9475_v31 }
 0x328   : > { %5154 = vmatpush1.bf16.msra.mxu0 %v8260_v28  ;;  %5185 = vmatprep.mubr.bf16.mxu0 %v9368_v47  ;;  %v8283_v47 = vld [vmem:[%s9117_s23 + $0x164] ss:$8 sps:$4 sm:$0xff]   ;;  %v8332_v28 = vld [vmem:[%s9117_s23 + $0xb0] ss:$8 sps:$4 sm:$0xff]  }
 0x329   : > { %3656 = vmatpush2.bf16.msra.mxu1 %v8263_v53  ;;  %5155 = vmatprep.subr.bf16.mxu0 %v8268_v58  ;;  %v8335_v53 = vld [vmem:[%s9117_s23 + $0x1d0] ss:$8 sps:$4 sm:$0xff]   ;;  %v8340_v58 = vld [vmem:[%s9117_s23 + $0xa4] ss:$8 sps:$4 sm:$0xff]  }
 0x32a   : > { %3657 = vmatprep.subr.bf16.mxu1 %v8271_v29  ;;  %v8343_v29 = vld [vmem:[%s9117_s23 + $0x1c4] ss:$8 sps:$4 sm:$0xff]  }
 0x32c   : > { %5156 = vmatpush1.bf16.msra.mxu0 %v8266_v62  ;;  %v8338_v62 = vld [vmem:[%s9117_s23 + $0xa0] ss:$8 sps:$4 sm:$0xff]  }
 0x32d   : > { %3658 = vmatpush2.bf16.msra.mxu1 %v8269_v40  ;;  %5157 = vmatprep.subr.bf16.mxu0 %v8274_v41  ;;  %v8341_v40 = vld [vmem:[%s9117_s23 + $0x1c0] ss:$8 sps:$4 sm:$0xff]   ;;  %v8346_v41 = vld [vmem:[%s9117_s23 + $0x94] ss:$8 sps:$4 sm:$0xff]  }
 0x32e   : > { %5196 = vmatprep.subr.bf16.mxu1 %v8277_v34  ;;  %v8349_v34 = vld [vmem:[%s9117_s23 + $0x1b4] ss:$8 sps:$4 sm:$0xff]  }
 0x330   : > { %5158 = vmatpush1.bf16.msra.mxu0 %v8272_v44  ;;  %3660 = vmatmul.mubr.bf16.vlgmr.msra.gmra.mxu1 %v9425_v37  ;;  %v8344_v44 = vld [vmem:[%s9117_s23 + $0x90] ss:$8 sps:$4 sm:$0xff]  }
 0x331   : > { %5197 = vmatpush1.bf16.msra.mxu1 %v8275_v9  ;;  %5228 = vmatprep.mubr.bf16.mxu1 %v9387_v57  ;;  %v8290_v57 = vld [vmem:[%s9117_s23 + $0x20] ss:$8 sps:$4 sm:$0xff]   ;;  %v8347_v9 = vld [vmem:[%s9117_s23 + $0x1b0] ss:$8 sps:$4 sm:$0xff]  }
 0x332   : > { %5159 = vmatprep.subr.bf16.mxu0 %v8280_v2  ;;  %5198 = vmatprep.subr.bf16.mxu1 %v8283_v47  ;;  %v8352_v2 = vld [vmem:[%s9117_s23 + $0x84] ss:$8 sps:$4 sm:$0xff]  }
 0x333   : > { %v8355_v47 = vld [vmem:[%s9117_s23 + $0x1a4] ss:$8 sps:$4 sm:$0xff]  }
 0x334   : > { %5160 = vmatpush1.bf16.msra.mxu0 %v8278_v35  ;;  %v8350_v35 = vld [vmem:[%s9117_s23 + $0x80] ss:$8 sps:$4 sm:$0xff]  }
 0x335   : > { %5199 = vmatpush1.bf16.msra.mxu1 %v8281_v45  ;;  %5161 = vmatprep.subr.bf16.mxu0 %v8286_v54  ;;  %v8353_v45 = vld [vmem:[%s9117_s23 + $0x1a0] ss:$8 sps:$4 sm:$0xff]   ;;  %v8358_v54 = vld [vmem:[%s9117_s23 + $0x274] ss:$8 sps:$4 sm:$0xff]  }
 0x336   : > { %5200 = vmatprep.subr.bf16.mxu1 %v8289_v42  ;;  %v8361_v42 = vld [vmem:[%s9117_s23 + $0x194] ss:$8 sps:$4 sm:$0xff]  }
 0x338   : > { %5162 = vmatpush1.bf16.msra.mxu0 %v8284_v51  ;;  %v8356_v51 = vld [vmem:[%s9117_s23 + $0x270] ss:$8 sps:$4 sm:$0xff]  }
 0x339   : > { %5201 = vmatpush1.bf16.msra.mxu1 %v8287_v10  ;;  %5163 = vmatprep.subr.bf16.mxu0 %v8292_v49  ;;  %v8359_v10 = vld [vmem:[%s9117_s23 + $0x190] ss:$8 sps:$4 sm:$0xff]   ;;  %v8364_v49 = vld [vmem:[%s9117_s23 + $0x264] ss:$8 sps:$4 sm:$0xff]  }
 0x33a   : > { %5202 = vmatprep.subr.bf16.mxu1 %v8295_v55  ;;  %v8367_v55 = vld [vmem:[%s9117_s23 + $0x184] ss:$8 sps:$4 sm:$0xff]  }
 0x33c   : > { %5164 = vmatpush1.bf16.msra.mxu0 %v8290_v57  ;;  %v8362_v57 = vld [vmem:[%s9117_s23 + $0x260] ss:$8 sps:$4 sm:$0xff]  }
 0x33d   : > { %5203 = vmatpush1.bf16.msra.mxu1 %v8293_v43  ;;  %5165 = vmatprep.subr.bf16.mxu0 %v8298_v59  ;;  %v8365_v43 = vld [vmem:[%s9117_s23 + $0x180] ss:$8 sps:$4 sm:$0xff]   ;;  %v8370_v59 = vld [vmem:[%s9117_s23 + $0x254] ss:$8 sps:$4 sm:$0xff]  }
 0x33e   : > { %5204 = vmatprep.subr.bf16.mxu1 %v8301_v60  ;;  %v8373_v60 = vld [vmem:[%s9117_s23 + $0x374] ss:$8 sps:$4 sm:$0xff]  }
 0x340   : > { %5166 = vmatpush1.bf16.msra.mxu0 %v8296_v61  ;;  %v8368_v61 = vld [vmem:[%s9117_s23 + $0x250] ss:$8 sps:$4 sm:$0xff]  }
 0x341   : > { %5205 = vmatpush1.bf16.msra.mxu1 %v8299_v0  ;;  %5167 = vmatprep.subr.bf16.mxu0 %v8304_v1  ;;  %v8376_v0 = vld [vmem:[%s9117_s23 + $0x244] ss:$8 sps:$4 sm:$0xff]   ;;  %v8374_v1 = vld [vmem:[%s9117_s23 + $0x240] ss:$8 sps:$4 sm:$0xff]  }
 0x342   : > { %5206 = vmatprep.subr.bf16.mxu1 %v8307_v4  ;;  %v8377_v4 = vld [vmem:[%s9117_s23 + $0x360] ss:$8 sps:$4 sm:$0xff]  }
 0x344   : > { %5168 = vmatpush1.bf16.msra.mxu0 %v8302_v5  ;;  %v8382_v5 = vld [vmem:[%s9117_s23 + $0x234] ss:$8 sps:$4 sm:$0xff]  }
 0x345   : > { %5207 = vmatpush1.bf16.msra.mxu1 %v8305_v63  ;;  %5169 = vmatprep.subr.bf16.mxu0 %v8310_v6  ;;  %v8385_v63 = vld [vmem:[%s9117_s23 + $0x354] ss:$8 sps:$4 sm:$0xff]   ;;  %v8380_v6 = vld [vmem:[%s9117_s23 + $0x230] ss:$8 sps:$4 sm:$0xff]  }
 0x346   : > { %5208 = vmatprep.subr.bf16.mxu1 %v8313_v3  ;;  %v8388_v3 = vld [vmem:[%s9117_s23 + $0x224] ss:$8 sps:$4 sm:$0xff]  }
 0x348   : > { %5170 = vmatpush2.bf16.msra.mxu0 %v8308_v21  ;;  %v8391_v21 = vld [vmem:[%s9117_s23 + $0x344] ss:$8 sps:$4 sm:$0xff]  }
 0x349   : > { %5209 = vmatpush1.bf16.msra.mxu1 %v8311_v11  ;;  %5171 = vmatprep.subr.bf16.mxu0 %v8316_v12  ;;  %v8389_v11 = vld [vmem:[%s9117_s23 + $0x340] ss:$8 sps:$4 sm:$0xff]   ;;  %v8394_v12 = vld [vmem:[%s9117_s23 + $0x214] ss:$8 sps:$4 sm:$0xff]  }
 0x34a   : > { %5210 = vmatprep.subr.bf16.mxu1 %v8319_v13  ;;  %v8397_v13 = vld [vmem:[%s9117_s23 + $0x334] ss:$8 sps:$4 sm:$0xff]  }
 0x34c   : > { %5172 = vmatpush2.bf16.msra.mxu0 %v8314_v14  ;;  %v8392_v14 = vld [vmem:[%s9117_s23 + $0x210] ss:$8 sps:$4 sm:$0xff]  }
 0x34d   : > { %5211 = vmatpush1.bf16.msra.mxu1 %v8317_v17  ;;  %5173 = vmatprep.subr.bf16.mxu0 %v8322_v19  ;;  %v8395_v17 = vld [vmem:[%s9117_s23 + $0x330] ss:$8 sps:$4 sm:$0xff]   ;;  %v8400_v19 = vld [vmem:[%s9117_s23 + $0x204] ss:$8 sps:$4 sm:$0xff]  }
 0x34e   : > { %5212 = vmatprep.subr.bf16.mxu1 %v8325_v18  ;;  %v8403_v18 = vld [vmem:[%s9117_s23 + $0x324] ss:$8 sps:$4 sm:$0xff]  }
 0x350   : > { %5174 = vmatpush2.bf16.msra.mxu0 %v8320_v39  ;;  %v8398_v39 = vld [vmem:[%s9117_s23 + $0x200] ss:$8 sps:$4 sm:$0xff]  }
 0x351   : > { %5213 = vmatpush2.bf16.msra.mxu1 %v8323_v36  ;;  %5175 = vmatprep.subr.bf16.mxu0 %v8328_v48  ;;  %v8401_v36 = vld [vmem:[%s9117_s23 + $0x320] ss:$8 sps:$4 sm:$0xff]   ;;  %v8406_v48 = vld [vmem:[%s9117_s23 + $0x2f4] ss:$8 sps:$4 sm:$0xff]  }
 0x352   : > { %5214 = vmatprep.subr.bf16.mxu1 %v8331_v20  ;;  %v8409_v20 = vld [vmem:[%s9117_s23 + $0x314] ss:$8 sps:$4 sm:$0xff]  }
 0x354   : > { %5176 = vmatpush2.bf16.msra.mxu0 %v8326_v8  ;;  %v8404_v8 = vld [vmem:[%s9117_s23 + $0x2f0] ss:$8 sps:$4 sm:$0xff]  }
 0x355   : > { %5215 = vmatpush2.bf16.msra.mxu1 %v8329_v7  ;;  %5177 = vmatprep.subr.bf16.mxu0 %v8334_v25  ;;  %v8407_v7 = vld [vmem:[%s9117_s23 + $0x310] ss:$8 sps:$4 sm:$0xff]   ;;  %v8412_v25 = vld [vmem:[%s9117_s23 + $0x2e4] ss:$8 sps:$4 sm:$0xff]  }
 0x356   : > { %5216 = vmatprep.subr.bf16.mxu1 %v8337_v26  ;;  %v8415_v26 = vld [vmem:[%s9117_s23 + $0x304] ss:$8 sps:$4 sm:$0xff]  }
 0x358   : > { %5178 = vmatpush2.bf16.msra.mxu0 %v8332_v28  ;;  %v8410_v28 = vld [vmem:[%s9117_s23 + $0x2e0] ss:$8 sps:$4 sm:$0xff]  }
 0x359   : > { %5217 = vmatpush2.bf16.msra.mxu1 %v8335_v53  ;;  %5179 = vmatprep.subr.bf16.mxu0 %v8340_v58  ;;  %v8413_v53 = vld [vmem:[%s9117_s23 + $0x300] ss:$8 sps:$4 sm:$0xff]   ;;  %v8418_v58 = vld [vmem:[%s9117_s23 + $0x2d4] ss:$8 sps:$4 sm:$0xff]  }
 0x35a   : > { %5218 = vmatprep.subr.bf16.mxu1 %v8343_v29  ;;  %v8421_v29 = vld [vmem:[%s9117_s23 + $0x3f4] ss:$8 sps:$4 sm:$0xff]  }
 0x35c   : > { %5180 = vmatpush2.bf16.msra.mxu0 %v8338_v62  ;;  %v8416_v62 = vld [vmem:[%s9117_s23 + $0x2d0] ss:$8 sps:$4 sm:$0xff]  }
 0x35d   : > { %5219 = vmatpush2.bf16.msra.mxu1 %v8341_v40  ;;  %5181 = vmatprep.subr.bf16.mxu0 %v8346_v41  ;;  %v8419_v40 = vld [vmem:[%s9117_s23 + $0x3f0] ss:$8 sps:$4 sm:$0xff]   ;;  %v8424_v41 = vld [vmem:[%s9117_s23 + $0x2c4] ss:$8 sps:$4 sm:$0xff]  }
 0x35e   : > { %5220 = vmatprep.subr.bf16.mxu1 %v8349_v34  ;;  %v8427_v34 = vld [vmem:[%s9117_s23 + $0x3e4] ss:$8 sps:$4 sm:$0xff]  }
 0x360   : > { %5182 = vmatpush2.bf16.msra.mxu0 %v8344_v44  ;;  %v8422_v44 = vld [vmem:[%s9117_s23 + $0x2c0] ss:$8 sps:$4 sm:$0xff]  }
 0x361   : > { %5221 = vmatpush2.bf16.msra.mxu1 %v8347_v9  ;;  %5183 = vmatprep.subr.bf16.mxu0 %v8352_v2  ;;  %v8425_v9 = vld [vmem:[%s9117_s23 + $0x3e0] ss:$8 sps:$4 sm:$0xff]   ;;  %v8430_v2 = vld [vmem:[%s9117_s23 + $0x2b4] ss:$8 sps:$4 sm:$0xff]  }
 0x362   : > { %5222 = vmatprep.subr.bf16.mxu1 %v8355_v47  ;;  %v8433_v47 = vld [vmem:[%s9117_s23 + $0x3d4] ss:$8 sps:$4 sm:$0xff]  }
 0x364   : > { %5184 = vmatpush2.bf16.msra.mxu0 %v8350_v35  ;;  %v8428_v35 = vld [vmem:[%s9117_s23 + $0x2b0] ss:$8 sps:$4 sm:$0xff]  }
 0x365   : > { %5223 = vmatpush2.bf16.msra.mxu1 %v8353_v45  ;;  %5239 = vmatprep.subr.bf16.mxu0 %v8358_v54  ;;  %v8431_v45 = vld [vmem:[%s9117_s23 + $0x3d0] ss:$8 sps:$4 sm:$0xff]   ;;  %v8436_v54 = vld [vmem:[%s9117_s23 + $0x2a4] ss:$8 sps:$4 sm:$0xff]  }
 0x366   : > { %5224 = vmatprep.subr.bf16.mxu1 %v8361_v42  ;;  %v8439_v42 = vld [vmem:[%s9117_s23 + $0x3c4] ss:$8 sps:$4 sm:$0xff]  }
 0x367   : > { %5186 = vmatmul.mubr.bf16.vlgmr.msra.gmra.mxu0 %v9378_v52  ;;  %v8371_v52 = vld [vmem:[%s9117_s23 + $0x370] ss:$8 sps:$4 sm:$0xff]  }
 0x368   : > { %5240 = vmatpush1.bf16.msra.mxu0 %v8356_v51  ;;  %5271 = vmatprep.mubr.bf16.mxu0 %v9486_v22  ;;  %v8379_v22 = vld [vmem:[%s9117_s23 + $0x364] ss:$8 sps:$4 sm:$0xff]   ;;  %v8434_v51 = vld [vmem:[%s9117_s23 + $0x2a0] ss:$8 sps:$4 sm:$0xff]  }
 0x369   : > { %5225 = vmatpush2.bf16.msra.mxu1 %v8359_v10  ;;  %5241 = vmatprep.subr.bf16.mxu0 %v8364_v49  ;;  %v8437_v10 = vld [vmem:[%s9117_s23 + $0x3c0] ss:$8 sps:$4 sm:$0xff]   ;;  %v8442_v49 = vld [vmem:[%s9117_s23 + $0x294] ss:$8 sps:$4 sm:$0xff]  }
 0x36a   : > { %5226 = vmatprep.subr.bf16.mxu1 %v8367_v55  ;;  %v8445_v55 = vld [vmem:[%s9117_s23 + $0x3b4] ss:$8 sps:$4 sm:$0xff]  }
 0x36c   : > { %5242 = vmatpush1.bf16.msra.mxu0 %v8362_v57  ;;  %v8440_v57 = vld [vmem:[%s9117_s23 + $0x290] ss:$8 sps:$4 sm:$0xff]  }
 0x36d   : > { %5227 = vmatpush2.bf16.msra.mxu1 %v8365_v43  ;;  %5243 = vmatprep.subr.bf16.mxu0 %v8370_v59  ;;  %v8443_v43 = vld [vmem:[%s9117_s23 + $0x3b0] ss:$8 sps:$4 sm:$0xff]   ;;  %v8448_v59 = vld [vmem:[%s9117_s23 + $0x284] ss:$8 sps:$4 sm:$0xff]  }
 0x36e   : > { %5282 = vmatprep.subr.bf16.mxu1 %v8373_v60  ;;  %v8451_v60 = vld [vmem:[%s9117_s23 + $0x3a4] ss:$8 sps:$4 sm:$0xff]  }
 0x370   : > { %5244 = vmatpush1.bf16.msra.mxu0 %v8368_v61  ;;  %5229 = vmatmul.mubr.bf16.vlgmr.msra.gmra.mxu1 %v9465_v23  ;;  %v8383_v23 = vld [vmem:[%s9117_s23 + $0x350] ss:$8 sps:$4 sm:$0xff]   ;;  %v8446_v61 = vld [vmem:[%s9117_s23 + $0x280] ss:$8 sps:$4 sm:$0xff]  }
 0x371   : > { %5283 = vmatpush1.bf16.msra.mxu1 %v8371_v52  ;;  %5314 = vmatprep.mubr.bf16.mxu1 %v9468_v24  ;;  %v8386_v24 = vld [vmem:[%s9117_s23 + $0x220] ss:$8 sps:$4 sm:$0xff]  }
 0x372   : > { %5245 = vmatprep.subr.bf16.mxu0 %v8376_v0  ;;  %5284 = vmatprep.subr.bf16.mxu1 %v8379_v22  ;;  %v8449_v52 = vld [vmem:[%s9117_s23 + $0x3a0] ss:$8 sps:$4 sm:$0xff]   ;;  %v8454_v0 = vld [vmem:[%s9117_s23 + $0x474] ss:$8 sps:$4 sm:$0xff]  }
 0x373   : > { %v8457_v22 = vld [vmem:[%s9117_s23 + $0x394] ss:$8 sps:$4 sm:$0xff]  }
 0x374   : > { %5246 = vmatpush1.bf16.msra.mxu0 %v8374_v1  ;;  %v8452_v1 = vld [vmem:[%s9117_s23 + $0x470] ss:$8 sps:$4 sm:$0xff]  }
 0x375   : > { %5285 = vmatpush1.bf16.msra.mxu1 %v8377_v4  ;;  %5247 = vmatprep.subr.bf16.mxu0 %v8382_v5  ;;  %v8455_v4 = vld [vmem:[%s9117_s23 + $0x390] ss:$8 sps:$4 sm:$0xff]   ;;  %v8460_v5 = vld [vmem:[%s9117_s23 + $0x464] ss:$8 sps:$4 sm:$0xff]  }
 0x376   : > { %5286 = vmatprep.subr.bf16.mxu1 %v8385_v63  ;;  %v8463_v63 = vld [vmem:[%s9117_s23 + $0x384] ss:$8 sps:$4 sm:$0xff]  }
 0x378   : > { %5248 = vmatpush1.bf16.msra.mxu0 %v8380_v6  ;;  %v8458_v6 = vld [vmem:[%s9117_s23 + $0x460] ss:$8 sps:$4 sm:$0xff]  }
 0x379   : > { %5287 = vmatpush1.bf16.msra.mxu1 %v8383_v23  ;;  %5249 = vmatprep.subr.bf16.mxu0 %v8388_v3  ;;  %v8461_v23 = vld [vmem:[%s9117_s23 + $0x380] ss:$8 sps:$4 sm:$0xff]   ;;  %v8466_v3 = vld [vmem:[%s9117_s23 + $0x454] ss:$8 sps:$4 sm:$0xff]  }
 0x37a   : > { %5288 = vmatprep.subr.bf16.mxu1 %v8391_v21  ;;  %v8469_v21 = vld [vmem:[%s9117_s23 + $0x574] ss:$8 sps:$4 sm:$0xff]  }
 0x37c   : > { %5250 = vmatpush1.bf16.msra.mxu0 %v8386_v24  ;;  %v8464_v24 = vld [vmem:[%s9117_s23 + $0x450] ss:$8 sps:$4 sm:$0xff]  }
 0x37d   : > { %5289 = vmatpush1.bf16.msra.mxu1 %v8389_v11  ;;  %5251 = vmatprep.subr.bf16.mxu0 %v8394_v12  ;;  %v8472_v11 = vld [vmem:[%s9117_s23 + $0x444] ss:$8 sps:$4 sm:$0xff]   ;;  %v8470_v12 = vld [vmem:[%s9117_s23 + $0x440] ss:$8 sps:$4 sm:$0xff]  }
 0x37e   : > { %5290 = vmatprep.subr.bf16.mxu1 %v8397_v13  ;;  %v8473_v13 = vld [vmem:[%s9117_s23 + $0x560] ss:$8 sps:$4 sm:$0xff]  }
 0x380   : > { %5252 = vmatpush1.bf16.msra.mxu0 %v8392_v14  ;;  %v8478_v14 = vld [vmem:[%s9117_s23 + $0x434] ss:$8 sps:$4 sm:$0xff]  }
 0x381   : > { %5291 = vmatpush1.bf16.msra.mxu1 %v8395_v17  ;;  %5253 = vmatprep.subr.bf16.mxu0 %v8400_v19  ;;  %v8481_v17 = vld [vmem:[%s9117_s23 + $0x554] ss:$8 sps:$4 sm:$0xff]   ;;  %v8476_v19 = vld [vmem:[%s9117_s23 + $0x430] ss:$8 sps:$4 sm:$0xff]  }
 0x382   : > { %5292 = vmatprep.subr.bf16.mxu1 %v8403_v18  ;;  %v8484_v18 = vld [vmem:[%s9117_s23 + $0x424] ss:$8 sps:$4 sm:$0xff]  }
 0x384   : > { %5254 = vmatpush1.bf16.msra.mxu0 %v8398_v39  ;;  %v8487_v39 = vld [vmem:[%s9117_s23 + $0x544] ss:$8 sps:$4 sm:$0xff]  }
 0x385   : > { %5293 = vmatpush1.bf16.msra.mxu1 %v8401_v36  ;;  %5255 = vmatprep.subr.bf16.mxu0 %v8406_v48  ;;  %v8485_v36 = vld [vmem:[%s9117_s23 + $0x540] ss:$8 sps:$4 sm:$0xff]   ;;  %v8490_v48 = vld [vmem:[%s9117_s23 + $0x414] ss:$8 sps:$4 sm:$0xff]  }
 0x386   : > { %5294 = vmatprep.subr.bf16.mxu1 %v8409_v20  ;;  %v8493_v20 = vld [vmem:[%s9117_s23 + $0x534] ss:$8 sps:$4 sm:$0xff]  }
 0x388   : > { %5256 = vmatpush2.bf16.msra.mxu0 %v8404_v8  ;;  %v8488_v8 = vld [vmem:[%s9117_s23 + $0x410] ss:$8 sps:$4 sm:$0xff]  }
 0x389   : > { %5295 = vmatpush1.bf16.msra.mxu1 %v8407_v7  ;;  %5257 = vmatprep.subr.bf16.mxu0 %v8412_v25  ;;  %v8491_v7 = vld [vmem:[%s9117_s23 + $0x530] ss:$8 sps:$4 sm:$0xff]   ;;  %v8496_v25 = vld [vmem:[%s9117_s23 + $0x404] ss:$8 sps:$4 sm:$0xff]  }
 0x38a   : > { %5296 = vmatprep.subr.bf16.mxu1 %v8415_v26  ;;  %v8499_v26 = vld [vmem:[%s9117_s23 + $0x524] ss:$8 sps:$4 sm:$0xff]  }
 0x38c   : > { %5258 = vmatpush2.bf16.msra.mxu0 %v8410_v28  ;;  %v8494_v28 = vld [vmem:[%s9117_s23 + $0x400] ss:$8 sps:$4 sm:$0xff]  }
 0x38d   : > { %5297 = vmatpush1.bf16.msra.mxu1 %v8413_v53  ;;  %5259 = vmatprep.subr.bf16.mxu0 %v8418_v58  ;;  %v8497_v53 = vld [vmem:[%s9117_s23 + $0x520] ss:$8 sps:$4 sm:$0xff]   ;;  %v8502_v58 = vld [vmem:[%s9117_s23 + $0x4f4] ss:$8 sps:$4 sm:$0xff]  }
 0x38e   : > { %5298 = vmatprep.subr.bf16.mxu1 %v8421_v29  ;;  %v8505_v29 = vld [vmem:[%s9117_s23 + $0x514] ss:$8 sps:$4 sm:$0xff]  }
 0x390   : > { %5260 = vmatpush2.bf16.msra.mxu0 %v8416_v62  ;;  %v8500_v62 = vld [vmem:[%s9117_s23 + $0x4f0] ss:$8 sps:$4 sm:$0xff]  }
 0x391   : > { %5299 = vmatpush2.bf16.msra.mxu1 %v8419_v40  ;;  %5261 = vmatprep.subr.bf16.mxu0 %v8424_v41  ;;  %v8503_v40 = vld [vmem:[%s9117_s23 + $0x510] ss:$8 sps:$4 sm:$0xff]   ;;  %v8508_v41 = vld [vmem:[%s9117_s23 + $0x4e4] ss:$8 sps:$4 sm:$0xff]  }
 0x392   : > { %5300 = vmatprep.subr.bf16.mxu1 %v8427_v34  ;;  %v8511_v34 = vld [vmem:[%s9117_s23 + $0x504] ss:$8 sps:$4 sm:$0xff]  }
 0x394   : > { %5262 = vmatpush2.bf16.msra.mxu0 %v8422_v44  ;;  %v8506_v44 = vld [vmem:[%s9117_s23 + $0x4e0] ss:$8 sps:$4 sm:$0xff]  }
 0x395   : > { %5301 = vmatpush2.bf16.msra.mxu1 %v8425_v9  ;;  %5263 = vmatprep.subr.bf16.mxu0 %v8430_v2  ;;  %v8509_v9 = vld [vmem:[%s9117_s23 + $0x500] ss:$8 sps:$4 sm:$0xff]   ;;  %v8514_v2 = vld [vmem:[%s9117_s23 + $0x4d4] ss:$8 sps:$4 sm:$0xff]  }
 0x396   : > { %5302 = vmatprep.subr.bf16.mxu1 %v8433_v47  ;;  %v8517_v47 = vld [vmem:[%s9117_s23 + $0x5f4] ss:$8 sps:$4 sm:$0xff]  }
 0x398   : > { %5264 = vmatpush2.bf16.msra.mxu0 %v8428_v35  ;;  %v8512_v35 = vld [vmem:[%s9117_s23 + $0x4d0] ss:$8 sps:$4 sm:$0xff]  }
 0x399   : > { %5303 = vmatpush2.bf16.msra.mxu1 %v8431_v45  ;;  %5265 = vmatprep.subr.bf16.mxu0 %v8436_v54  ;;  %v8515_v45 = vld [vmem:[%s9117_s23 + $0x5f0] ss:$8 sps:$4 sm:$0xff]   ;;  %v8520_v54 = vld [vmem:[%s9117_s23 + $0x4c4] ss:$8 sps:$4 sm:$0xff]  }
 0x39a   : > { %5304 = vmatprep.subr.bf16.mxu1 %v8439_v42  ;;  %v8523_v42 = vld [vmem:[%s9117_s23 + $0x5e4] ss:$8 sps:$4 sm:$0xff]  }
 0x39c   : > { %5266 = vmatpush2.bf16.msra.mxu0 %v8434_v51  ;;  %v8518_v51 = vld [vmem:[%s9117_s23 + $0x4c0] ss:$8 sps:$4 sm:$0xff]  }
 0x39d   : > { %5305 = vmatpush2.bf16.msra.mxu1 %v8437_v10  ;;  %5267 = vmatprep.subr.bf16.mxu0 %v8442_v49  ;;  %v8521_v10 = vld [vmem:[%s9117_s23 + $0x5e0] ss:$8 sps:$4 sm:$0xff]   ;;  %v8526_v49 = vld [vmem:[%s9117_s23 + $0x4b4] ss:$8 sps:$4 sm:$0xff]  }
 0x39e   : > { %5306 = vmatprep.subr.bf16.mxu1 %v8445_v55  ;;  %v8529_v55 = vld [vmem:[%s9117_s23 + $0x5d4] ss:$8 sps:$4 sm:$0xff]  }
 0x3a0   : > { %5268 = vmatpush2.bf16.msra.mxu0 %v8440_v57  ;;  %v8524_v57 = vld [vmem:[%s9117_s23 + $0x4b0] ss:$8 sps:$4 sm:$0xff]  }
 0x3a1   : > { %5307 = vmatpush2.bf16.msra.mxu1 %v8443_v43  ;;  %5269 = vmatprep.subr.bf16.mxu0 %v8448_v59  ;;  %v8527_v43 = vld [vmem:[%s9117_s23 + $0x5d0] ss:$8 sps:$4 sm:$0xff]   ;;  %v8532_v59 = vld [vmem:[%s9117_s23 + $0x4a4] ss:$8 sps:$4 sm:$0xff]  }
 0x3a2   : > { %5308 = vmatprep.subr.bf16.mxu1 %v8451_v60  ;;  %v8535_v60 = vld [vmem:[%s9117_s23 + $0x5c4] ss:$8 sps:$4 sm:$0xff]  }
 0x3a4   : > { %5270 = vmatpush2.bf16.msra.mxu0 %v8446_v61  ;;  %v8530_v61 = vld [vmem:[%s9117_s23 + $0x4a0] ss:$8 sps:$4 sm:$0xff]  }
 0x3a5   : > { %5309 = vmatpush2.bf16.msra.mxu1 %v8449_v52  ;;  %5325 = vmatprep.subr.bf16.mxu0 %v8454_v0  ;;  %v8533_v52 = vld [vmem:[%s9117_s23 + $0x5c0] ss:$8 sps:$4 sm:$0xff]   ;;  %v8538_v0 = vld [vmem:[%s9117_s23 + $0x494] ss:$8 sps:$4 sm:$0xff]  }
 0x3a6   : > { %5310 = vmatprep.subr.bf16.mxu1 %v8457_v22  ;;  %v8541_v22 = vld [vmem:[%s9117_s23 + $0x5b4] ss:$8 sps:$4 sm:$0xff]  }
 0x3a7   : > { %5272 = vmatmul.mubr.bf16.vlgmr.msra.gmra.mxu0 %v9536_v46  ;;  %v8467_v46 = vld [vmem:[%s9117_s23 + $0x570] ss:$8 sps:$4 sm:$0xff]  }
 0x3a8   : > { %5326 = vmatpush1.bf16.msra.mxu0 %v8452_v1  ;;  %5357 = vmatprep.mubr.bf16.mxu0 %v9417_v27  ;;  %v8475_v27 = vld [vmem:[%s9117_s23 + $0x564] ss:$8 sps:$4 sm:$0xff]   ;;  %v8536_v1 = vld [vmem:[%s9117_s23 + $0x490] ss:$8 sps:$4 sm:$0xff]  }
 0x3a9   : > { %5311 = vmatpush2.bf16.msra.mxu1 %v8455_v4  ;;  %5327 = vmatprep.subr.bf16.mxu0 %v8460_v5  ;;  %v8539_v4 = vld [vmem:[%s9117_s23 + $0x5b0] ss:$8 sps:$4 sm:$0xff]   ;;  %v8544_v5 = vld [vmem:[%s9117_s23 + $0x484] ss:$8 sps:$4 sm:$0xff]  }
 0x3aa   : > { %5312 = vmatprep.subr.bf16.mxu1 %v8463_v63  ;;  %v8547_v63 = vld [vmem:[%s9117_s23 + $0x5a4] ss:$8 sps:$4 sm:$0xff]  }
 0x3ac   : > { %5328 = vmatpush1.bf16.msra.mxu0 %v8458_v6  ;;  %v8542_v6 = vld [vmem:[%s9117_s23 + $0x480] ss:$8 sps:$4 sm:$0xff]  }
 0x3ad   : > { %5313 = vmatpush2.bf16.msra.mxu1 %v8461_v23  ;;  %5329 = vmatprep.subr.bf16.mxu0 %v8466_v3  ;;  %v8545_v23 = vld [vmem:[%s9117_s23 + $0x5a0] ss:$8 sps:$4 sm:$0xff]   ;;  %v8550_v3 = vld [vmem:[%s9117_s23 + $0x674] ss:$8 sps:$4 sm:$0xff]  }
 0x3ae   : > { %5368 = vmatprep.subr.bf16.mxu1 %v8469_v21  ;;  %v8553_v21 = vld [vmem:[%s9117_s23 + $0x594] ss:$8 sps:$4 sm:$0xff]  }
 0x3b0   : > { %5330 = vmatpush1.bf16.msra.mxu0 %v8464_v24  ;;  %5315 = vmatmul.mubr.bf16.vlgmr.msra.gmra.mxu1 %v9403_v15  ;;  %v8479_v15 = vld [vmem:[%s9117_s23 + $0x550] ss:$8 sps:$4 sm:$0xff]  }
 0x3b1   : > { %5369 = vmatpush1.bf16.msra.mxu1 %v8467_v46  ;;  %5400 = vmatprep.mubr.bf16.mxu1 %v9574_v30  ;;  %v8482_v30 = vld [vmem:[%s9117_s23 + $0x420] ss:$8 sps:$4 sm:$0xff]   ;;  %v8548_v24 = vld [vmem:[%s9117_s23 + $0x670] ss:$8 sps:$4 sm:$0xff]  }
 0x3b2   : > { %5331 = vmatprep.subr.bf16.mxu0 %v8472_v11  ;;  %5370 = vmatprep.subr.bf16.mxu1 %v8475_v27  ;;  %v8551_v46 = vld [vmem:[%s9117_s23 + $0x590] ss:$8 sps:$4 sm:$0xff]   ;;  %v8556_v11 = vld [vmem:[%s9117_s23 + $0x664] ss:$8 sps:$4 sm:$0xff]  }
 0x3b3   : > { %v8559_v27 = vld [vmem:[%s9117_s23 + $0x584] ss:$8 sps:$4 sm:$0xff]  }
 0x3b4   : > { %5332 = vmatpush1.bf16.msra.mxu0 %v8470_v12  ;;  %v8554_v12 = vld [vmem:[%s9117_s23 + $0x660] ss:$8 sps:$4 sm:$0xff]  }
 0x3b5   : > { %5371 = vmatpush1.bf16.msra.mxu1 %v8473_v13  ;;  %5333 = vmatprep.subr.bf16.mxu0 %v8478_v14  ;;  %v8557_v13 = vld [vmem:[%s9117_s23 + $0x580] ss:$8 sps:$4 sm:$0xff]   ;;  %v8562_v14 = vld [vmem:[%s9117_s23 + $0x654] ss:$8 sps:$4 sm:$0xff]  }
 0x3b6   : > { %5372 = vmatprep.subr.bf16.mxu1 %v8481_v17  ;;  %v8565_v17 = vld [vmem:[%s9117_s23 + $0x774] ss:$8 sps:$4 sm:$0xff]  }
 0x3b8   : > { %5334 = vmatpush1.bf16.msra.mxu0 %v8476_v19  ;;  %v8560_v19 = vld [vmem:[%s9117_s23 + $0x650] ss:$8 sps:$4 sm:$0xff]  }
 0x3b9   : > { %5373 = vmatpush1.bf16.msra.mxu1 %v8479_v15  ;;  %5335 = vmatprep.subr.bf16.mxu0 %v8484_v18  ;;  %v8568_v15 = vld [vmem:[%s9117_s23 + $0x644] ss:$8 sps:$4 sm:$0xff]   ;;  %v8566_v18 = vld [vmem:[%s9117_s23 + $0x640] ss:$8 sps:$4 sm:$0xff]  }
 0x3ba   : > { %5374 = vmatprep.subr.bf16.mxu1 %v8487_v39  ;;  %v8569_v39 = vld [vmem:[%s9117_s23 + $0x760] ss:$8 sps:$4 sm:$0xff]  }
 0x3bc   : > { %5336 = vmatpush1.bf16.msra.mxu0 %v8482_v30  ;;  %v8574_v30 = vld [vmem:[%s9117_s23 + $0x634] ss:$8 sps:$4 sm:$0xff]  }
 0x3bd   : > { %5375 = vmatpush1.bf16.msra.mxu1 %v8485_v36  ;;  %5337 = vmatprep.subr.bf16.mxu0 %v8490_v48  ;;  %v8577_v36 = vld [vmem:[%s9117_s23 + $0x754] ss:$8 sps:$4 sm:$0xff]   ;;  %v8572_v48 = vld [vmem:[%s9117_s23 + $0x630] ss:$8 sps:$4 sm:$0xff]  }
 0x3be   : > { %5376 = vmatprep.subr.bf16.mxu1 %v8493_v20  ;;  %v8580_v20 = vld [vmem:[%s9117_s23 + $0x624] ss:$8 sps:$4 sm:$0xff]  }
 0x3c0   : > { %5338 = vmatpush1.bf16.msra.mxu0 %v8488_v8  ;;  %v8583_v8 = vld [vmem:[%s9117_s23 + $0x744] ss:$8 sps:$4 sm:$0xff]  }
 0x3c1   : > { %5377 = vmatpush1.bf16.msra.mxu1 %v8491_v7  ;;  %5339 = vmatprep.subr.bf16.mxu0 %v8496_v25  ;;  %v8578_v7 = vld [vmem:[%s9117_s23 + $0x620] ss:$8 sps:$4 sm:$0xff]  }
 0x3c2   : > { %5378 = vmatprep.subr.bf16.mxu1 %v8499_v26  ;;  %v8581_v25 = vld [vmem:[%s9117_s23 + $0x740] ss:$8 sps:$4 sm:$0xff]   ;;  %v8586_v26 = vld [vmem:[%s9117_s23 + $0x614] ss:$8 sps:$4 sm:$0xff]  }
 0x3c4   : > { %5340 = vmatpush1.bf16.msra.mxu0 %v8494_v28  ;;  %v8589_v28 = vld [vmem:[%s9117_s23 + $0x734] ss:$8 sps:$4 sm:$0xff]  }
 0x3c5   : > { %5379 = vmatpush1.bf16.msra.mxu1 %v8497_v53  ;;  %5341 = vmatprep.subr.bf16.mxu0 %v8502_v58  ;;  %v8584_v53 = vld [vmem:[%s9117_s23 + $0x610] ss:$8 sps:$4 sm:$0xff]  }
 0x3c6   : > { %5380 = vmatprep.subr.bf16.mxu1 %v8505_v29  ;;  %v8587_v58 = vld [vmem:[%s9117_s23 + $0x730] ss:$8 sps:$4 sm:$0xff]   ;;  %v8592_v29 = vld [vmem:[%s9117_s23 + $0x604] ss:$8 sps:$4 sm:$0xff]  }
 0x3c8   : > { %5342 = vmatpush2.bf16.msra.mxu0 %v8500_v62  ;;  %v8595_v62 = vld [vmem:[%s9117_s23 + $0x724] ss:$8 sps:$4 sm:$0xff]  }
 0x3c9   : > { %5381 = vmatpush1.bf16.msra.mxu1 %v8503_v40  ;;  %5343 = vmatprep.subr.bf16.mxu0 %v8508_v41  ;;  %v8590_v40 = vld [vmem:[%s9117_s23 + $0x600] ss:$8 sps:$4 sm:$0xff]  }
 0x3ca   : > { %5382 = vmatprep.subr.bf16.mxu1 %v8511_v34  ;;  %v8593_v41 = vld [vmem:[%s9117_s23 + $0x720] ss:$8 sps:$4 sm:$0xff]   ;;  %v8598_v34 = vld [vmem:[%s9117_s23 + $0x6f4] ss:$8 sps:$4 sm:$0xff]  }
 0x3cc   : > { %5344 = vmatpush2.bf16.msra.mxu0 %v8506_v44  ;;  %v8601_v44 = vld [vmem:[%s9117_s23 + $0x714] ss:$8 sps:$4 sm:$0xff]  }
 0x3cd   : > { %5383 = vmatpush1.bf16.msra.mxu1 %v8509_v9  ;;  %5345 = vmatprep.subr.bf16.mxu0 %v8514_v2  ;;  %v8596_v9 = vld [vmem:[%s9117_s23 + $0x6f0] ss:$8 sps:$4 sm:$0xff]  }
 0x3ce   : > { %5384 = vmatprep.subr.bf16.mxu1 %v8517_v47  ;;  %v8599_v2 = vld [vmem:[%s9117_s23 + $0x710] ss:$8 sps:$4 sm:$0xff]   ;;  %v8604_v47 = vld [vmem:[%s9117_s23 + $0x6e4] ss:$8 sps:$4 sm:$0xff]  }
 0x3d0   : > { %5346 = vmatpush2.bf16.msra.mxu0 %v8512_v35  ;;  %v8607_v35 = vld [vmem:[%s9117_s23 + $0x704] ss:$8 sps:$4 sm:$0xff]  }
 0x3d1   : > { %5385 = vmatpush2.bf16.msra.mxu1 %v8515_v45  ;;  %5347 = vmatprep.subr.bf16.mxu0 %v8520_v54  ;;  %v8602_v45 = vld [vmem:[%s9117_s23 + $0x6e0] ss:$8 sps:$4 sm:$0xff]  }
 0x3d2   : > { %5386 = vmatprep.subr.bf16.mxu1 %v8523_v42  ;;  %v8605_v54 = vld [vmem:[%s9117_s23 + $0x700] ss:$8 sps:$4 sm:$0xff]   ;;  %v8610_v42 = vld [vmem:[%s9117_s23 + $0x6d4] ss:$8 sps:$4 sm:$0xff]  }
 0x3d4   : > { %5348 = vmatpush2.bf16.msra.mxu0 %v8518_v51  ;;  %v8608_v51 = vld [vmem:[%s9117_s23 + $0x6d0] ss:$8 sps:$4 sm:$0xff]  }
 0x3d5   : > { %5387 = vmatpush2.bf16.msra.mxu1 %v8521_v10  ;;  %5349 = vmatprep.subr.bf16.mxu0 %v8526_v49  ;;  %v8613_v10 = vld [vmem:[%s9117_s23 + $0x6c4] ss:$8 sps:$4 sm:$0xff]   ;;  %v8611_v49 = vld [vmem:[%s9117_s23 + $0x6c0] ss:$8 sps:$4 sm:$0xff]  }
 0x3d6   : > { %5388 = vmatprep.subr.bf16.mxu1 %v8529_v55  ;;  %v8616_v55 = vld [vmem:[%s9117_s23 + $0x6b4] ss:$8 sps:$4 sm:$0xff]  }
 0x3d8   : > { %5350 = vmatpush2.bf16.msra.mxu0 %v8524_v57  ;;  %v8614_v57 = vld [vmem:[%s9117_s23 + $0x6b0] ss:$8 sps:$4 sm:$0xff]  }
 0x3d9   : > { %5389 = vmatpush2.bf16.msra.mxu1 %v8527_v43  ;;  %5351 = vmatprep.subr.bf16.mxu0 %v8532_v59  ;;  %v8619_v43 = vld [vmem:[%s9117_s23 + $0x6a4] ss:$8 sps:$4 sm:$0xff]   ;;  %v8617_v59 = vld [vmem:[%s9117_s23 + $0x6a0] ss:$8 sps:$4 sm:$0xff]  }
 0x3da   : > { %5390 = vmatprep.subr.bf16.mxu1 %v8535_v60  ;;  %v8622_v60 = vld [vmem:[%s9117_s23 + $0x694] ss:$8 sps:$4 sm:$0xff]  }
 0x3dc   : > { %5352 = vmatpush2.bf16.msra.mxu0 %v8530_v61  ;;  %v8620_v61 = vld [vmem:[%s9117_s23 + $0x690] ss:$8 sps:$4 sm:$0xff]  }
 0x3dd   : > { %5391 = vmatpush2.bf16.msra.mxu1 %v8533_v52  ;;  %5353 = vmatprep.subr.bf16.mxu0 %v8538_v0  ;;  %v8625_v52 = vld [vmem:[%s9117_s23 + $0x684] ss:$8 sps:$4 sm:$0xff]   ;;  %v3403_v0 = vpop.f32.mrf.mxu1 }
 0x3de   : > { %5392 = vmatprep.subr.bf16.mxu1 %v8541_v22 }
 0x3df   : > { %v3405_v22 = vpop.f32.mrf.mxu1 }
 0x3e0   : > { %5354 = vmatpush2.bf16.msra.mxu0 %v8536_v1  ;;  %v3446_v1 = vpop.f32.mrf.mxu0 }
 0x3e1   : > { %5393 = vmatpush2.bf16.msra.mxu1 %v8539_v4  ;;  %5355 = vmatprep.subr.bf16.mxu0 %v8544_v5  ;;  %v3407_v4 = vpop.f32.mrf.mxu1  ;;  %v3447_v56 = vadd.f32 %v3446_v1, %v3403_v0 }
 0x3e2   : > { %5394 = vmatprep.subr.bf16.mxu1 %v8547_v63  ;;  %v3448_v5 = vpop.f32.mrf.mxu0 }
 0x3e3   : > { %v3409_v63 = vpop.f32.mrf.mxu1 }
 0x3e4   : > { %5356 = vmatpush2.bf16.msra.mxu0 %v8542_v6  ;;  %v3450_v6 = vpop.f32.mrf.mxu0 }
 0x3e5   : > { %5395 = vmatpush2.bf16.msra.mxu1 %v8545_v23  ;;  %5411 = vmatprep.subr.bf16.mxu0 %v8550_v3  ;;  %v9935_v23 = vpop.f32.mrf.mxu1 }
 0x3e6   : > { %5396 = vmatprep.subr.bf16.mxu1 %v8553_v21  ;;  %v3452_v3 = vpop.f32.mrf.mxu0 }
 0x3e7   : > { %5358 = vmatmul.mubr.bf16.vlgmr.msra.gmra.mxu0 %v9480_v38  ;;  %v8563_v38 = vld [vmem:[%s9117_s23 + $0x770] ss:$8 sps:$4 sm:$0xff]   ;;  %v3491_v21 = vpop.f32.mrf.mxu1 }
 0x3e8   : > { %5412 = vmatpush1.bf16.msra.mxu0 %v8548_v24  ;;  %5443 = vmatprep.mubr.bf16.mxu0 %v9406_v16  ;;  %v8571_v16 = vld [vmem:[%s9117_s23 + $0x764] ss:$8 sps:$4 sm:$0xff]   ;;  %v9937_v24 = vpop.f32.mrf.mxu0 }
 0x3e9   : > { %5397 = vmatpush2.bf16.msra.mxu1 %v8551_v46  ;;  %5413 = vmatprep.subr.bf16.mxu0 %v8556_v11  ;;  %v3493_v46 = vpop.f32.mrf.mxu1 }
 0x3ea   : > { %5398 = vmatprep.subr.bf16.mxu1 %v8559_v27  ;;  %v3534_v11 = vpop.f32.mrf.mxu0 }
 0x3eb   : > { %v3495_v27 = vpop.f32.mrf.mxu1 }
 0x3ec   : > { %5414 = vmatpush1.bf16.msra.mxu0 %v8554_v12  ;;  %v3536_v12 = vpop.f32.mrf.mxu0 }
 0x3ed   : > { %5399 = vmatpush2.bf16.msra.mxu1 %v8557_v13  ;;  %5415 = vmatprep.subr.bf16.mxu0 %v8562_v14 }
 0x3ee   : > { %5454 = vmatprep.subr.bf16.mxu1 %v8565_v17 }
 0x3f0   : > { %5416 = vmatpush1.bf16.msra.mxu0 %v8560_v19  ;;  %5401 = vmatmul.mubr.bf16.vlgmr.msra.gmra.mxu1 %v9431_v32  ;;  %v8575_v32 = vld [vmem:[%s9117_s23 + $0x750] ss:$8 sps:$4 sm:$0xff]  }
 0x3f1   : > { %5455 = vmatpush1.bf16.msra.mxu1 %v8563_v38  ;;  %5417 = vmatprep.subr.bf16.mxu0 %v8568_v15 }
 0x3f2   : > { %5456 = vmatprep.subr.bf16.mxu1 %v8571_v16  ;;  %5486 = vmatprep.mubr.bf16.mxu1 %v8849_v33 }
 0x3f4   : > { %5418 = vmatpush1.bf16.msra.mxu0 %v8566_v18 }
 0x3f5   : > { %5457 = vmatpush1.bf16.msra.mxu1 %v8569_v39  ;;  %5419 = vmatprep.subr.bf16.mxu0 %v8574_v30 }
 0x3f6   : > { %5458 = vmatprep.subr.bf16.mxu1 %v8577_v36 }
 0x3f8   : > { %5420 = vmatpush1.bf16.msra.mxu0 %v8572_v48 }
 0x3f9   : > { %5459 = vmatpush1.bf16.msra.mxu1 %v8575_v32  ;;  %5421 = vmatprep.subr.bf16.mxu0 %v8580_v20 }
 0x3fa   : > { %5460 = vmatprep.subr.bf16.mxu1 %v8583_v8 }
 0x3fc   : > { %5422 = vmatpush1.bf16.msra.mxu0 %v8578_v7 }
 0x3fd   : > { %5461 = vmatpush1.bf16.msra.mxu1 %v8581_v25  ;;  %5423 = vmatprep.subr.bf16.mxu0 %v8586_v26 }
 0x3fe   : > { %5462 = vmatprep.subr.bf16.mxu1 %v8589_v28 }
 0x400   : > { %5424 = vmatpush1.bf16.msra.mxu0 %v8584_v53 }
 0x401   : > { %5463 = vmatpush1.bf16.msra.mxu1 %v8587_v58  ;;  %5425 = vmatprep.subr.bf16.mxu0 %v8592_v29 }
 0x402   : > { %5464 = vmatprep.subr.bf16.mxu1 %v8595_v62 }
 0x404   : > { %5426 = vmatpush1.bf16.msra.mxu0 %v8590_v40 }
 0x405   : > { %5465 = vmatpush1.bf16.msra.mxu1 %v8593_v41  ;;  %5427 = vmatprep.subr.bf16.mxu0 %v8598_v34 }
 0x406   : > { %5466 = vmatprep.subr.bf16.mxu1 %v8601_v44 }
 0x408   : > { %5428 = vmatpush2.bf16.msra.mxu0 %v8596_v9 }
 0x409   : > { %5467 = vmatpush1.bf16.msra.mxu1 %v8599_v2  ;;  %5429 = vmatprep.subr.bf16.mxu0 %v8604_v47 }
 0x40a   : > { %5468 = vmatprep.subr.bf16.mxu1 %v8607_v35 }
 0x40c   : > { %5430 = vmatpush2.bf16.msra.mxu0 %v8602_v45 }
 0x40d   : > { %5469 = vmatpush1.bf16.msra.mxu1 %v8605_v54  ;;  %5431 = vmatprep.subr.bf16.mxu0 %v8610_v42 }
 0x410   : > { %5432 = vmatpush2.bf16.msra.mxu0 %v8608_v51  ;;  %5487 = vmatmul.mubr.bf16.vlgmr.msra.gmra.mxu1 %v9475_v31  ;;  %v8623_v31 = vld [vmem:[%s9117_s23 + $0x680] ss:$8 sps:$4 sm:$0xff]   ;;  %s645_s23 = scalar_lea.vmem %s10171_s12, %s10062_s25 }
 0x411   : > { %5433 = vmatprep.subr.bf16.mxu0 %v8613_v10  ;;  %5540 = vmatprep.mubr.bf16.mxu1 %v8849_v33 }
 0x414   : > { %5434 = vmatpush2.bf16.msra.mxu0 %v8611_v49 }
 0x415   : > { %5435 = vmatprep.subr.bf16.mxu0 %v8616_v55  ;;  %v3449_v55 = vadd.f32 %v3448_v5, %v3405_v22 }
 0x417   : > { %v3492_v50 = vadd.f32 %v3491_v21, %v3449_v55 }
 0x418   : > { %5436 = vmatpush2.bf16.msra.mxu0 %v8614_v57  ;;  %v3451_v57 = vadd.f32 %v3450_v6, %v3407_v4 }
 0x419   : > { %5437 = vmatprep.subr.bf16.mxu0 %v8619_v43 }
 0x41c   : > { %5438 = vmatpush2.bf16.msra.mxu0 %v8617_v59 }
 0x41d   : > { %5439 = vmatprep.subr.bf16.mxu0 %v8622_v60 }
 0x420   : > { %5440 = vmatpush2.bf16.msra.mxu0 %v8620_v61  ;;  %v3453_v61 = vadd.f32 %v3452_v3, %v3409_v63 }
 0x421   : > { %5441 = vmatprep.subr.bf16.mxu0 %v8625_v52 }
 0x424   : > { %5442 = vmatpush2.bf16.msra.mxu0 %v8623_v31 }
 0x427   : > { %5444 = vmatmul.mubr.bf16.vlgmr.msra.gmra.mxu0 %v9425_v37  ;;  %v9939_v37 = vpop.f32.mrf.mxu1 }
 0x428   : > { %5585 = vmatprep.mubr.bf16.mxu0 %v8849_v33  ;;  %v3538_v33 = vpop.f32.mrf.mxu0 }
 0x429   : > { %v9941_v13 = vpop.f32.mrf.mxu1 }
 0x42a   : > { %v9943_v14 = vpop.f32.mrf.mxu0 }
 0x42b   : > { %v9945_v17 = vpop.f32.mrf.mxu1 }
 0x42c   : > { %v9947_v19 = vpop.f32.mrf.mxu0 }
 0x42d   : > { %v9949_v38 = vpop.f32.mrf.mxu1 }
 0x42e   : > { %v9951_v15 = vpop.f32.mrf.mxu0 }
 0x42f   : > { %v9953_v16 = vpop.f32.mrf.mxu1 }
 0x430   : > { %10181 = vst [vmem:[#allocation4_spill] sm:$0xff] %v9953_v16  ;;  %v9955_v18 = vpop.f32.mrf.mxu0 }
 0x431   : > { %v9959_v30 = vpop.f32.mrf.mxu1 }
 0x432   : > { %v9957_v39 = vpop.f32.mrf.mxu0  ;;  %10183 = vst [vmem:[#allocation6_spill] sm:$0xff] %v9959_v30 }
 0x433   : > { %10182 = vst [vmem:[#allocation5_spill] sm:$0xff] %v9957_v39  ;;  %v9963_v48 = vpop.f32.mrf.mxu1  ;;  %v3494_v39 = vadd.f32 %v3493_v46, %v3451_v57 }
 0x434   : > { %v9961_v36 = vpop.f32.mrf.mxu0  ;;  %10185 = vst [vmem:[#allocation8_spill] sm:$0xff] %v9963_v48  ;;  %v3490_v48 = vadd.f32 %v9935_v23, %v3447_v56 }
 0x435   : > { %10184 = vst [vmem:[#allocation7_spill] sm:$0xff] %v9961_v36  ;;  %v9967_v20 = vpop.f32.mrf.mxu1  ;;  %v3537_v22 = vadd.f32 %v3536_v12, %v3494_v39 }
 0x436   : > { %v9965_v32 = vpop.f32.mrf.mxu0  ;;  %10187 = vst [vmem:[#allocation10_spill] sm:$0xff] %v9967_v20  ;;  %v3533_v0 = vadd.f32 %v9937_v24, %v3490_v48 }
 0x437   : > { %10186 = vst [vmem:[#allocation9_spill] sm:$0xff] %v9965_v32  ;;  %v5230_v8 = vpop.f32.mrf.mxu1  ;;  %v3496_v32 = vadd.f32 %v3495_v27, %v3453_v61  ;;  %v3580_v21 = vadd.f32 %v9945_v17, %v3537_v22  ;;  %v5549_v22 = vld [vmem:[%s10163_s4] sm:$0xf] }
 0x438   : > { %v9969_v7 = vpop.f32.mrf.mxu0 }
 0x439   : > { %10188 = vst [vmem:[#allocation11_spill] sm:$0xff] %v9969_v7  ;;  %v5232_v26 = vpop.f32.mrf.mxu1  ;;  %v3539_v6 = vadd.f32 %v3538_v33, %v3496_v32  ;;  %v3623_v33 = vadd.f32 %v9951_v15, %v3580_v21  ;;  %v8638_v21 = vld [vmem:[%s9196_s16 + $0x50] ss:$8 sps:$4 sm:$0xff]  }
 0x43a   : > { %v5187_v25 = vpop.f32.mrf.mxu0 }
 0x43b   : > { %v5234_v53 = vpop.f32.mrf.mxu1  ;;  %v5231_v43 = vadd.f32 %v5230_v8, %v5187_v25  ;;  %v10189_v32 = vld [vmem:[#allocation8_spill] sm:$0xff] }
 0x43c   : > { %v5189_v28 = vpop.f32.mrf.mxu0 }
 0x43d   : > { %v5236_v29 = vpop.f32.mrf.mxu1  ;;  %v5233_v49 = vadd.f32 %v5232_v26, %v5189_v28  ;;  %v3535_v26 = vadd.f32 %v3534_v11, %v3492_v50  ;;  %v3582_v28 = vadd.f32 %v9949_v38, %v3539_v6  ;;  %v3576_v11 = vadd.f32 %v9939_v37, %v3533_v0  ;;  %v8634_v6 = vld [vmem:[%s9196_s16 + $0x64] ss:$8 sps:$4 sm:$0xff]   ;;  %v8640_v0 = vld [vmem:[%s9196_s16 + $0x54] ss:$8 sps:$4 sm:$0xff]  }
 0x43e   : > { %v5191_v58 = vpop.f32.mrf.mxu0  ;;  %v3666_v38 = vadd.f32 %v10189_v32, %v3623_v33  ;;  %v8658_v33 = vld [vmem:[%s9196_s16 + $0x24] ss:$8 sps:$4 sm:$0xff]  }
 0x43f   : > { %v5235_v52 = vadd.f32 %v5234_v53, %v5191_v58  ;;  %v3578_v1 = vadd.f32 %v9941_v13, %v3535_v26  ;;  %v3625_v13 = vadd.f32 %v9955_v18, %v3582_v28  ;;  %v3619_v48 = vadd.f32 %v9943_v14, %v3576_v11  ;;  %v10190_v58 = vld [vmem:[#allocation6_spill] sm:$0xff]  ;;  %v10193_v14 = vld [vmem:[#allocation9_spill] sm:$0xff] }
 0x440   : > { %v5193_v40 = vpop.f32.mrf.mxu0  ;;  %v8644_v28 = vld [vmem:[%s9196_s16 + $0x40] ss:$8 sps:$4 sm:$0xff]   ;;  %v8650_v11 = vld [vmem:[%s9196_s16 + $0x30] ss:$8 sps:$4 sm:$0xff]   ;;  %v8670_v32 = vld [vmem:[%s9196_s16 + $0x4] ss:$8 sps:$4 sm:$0xff]  }
 0x441   : > { %v5237_v16 = vadd.f32 %v5236_v29, %v5193_v40  ;;  %v3621_v12 = vadd.f32 %v9947_v19, %v3578_v1  ;;  %v10191_v29 = vld [vmem:[#allocation10_spill] sm:$0xff]  ;;  %v10192_v40 = vld [vmem:[#allocation4_spill] sm:$0xff] }
 0x442   : > { %v3668_v19 = vadd.f32 %v10191_v29, %v3625_v13  ;;  %v8643_v1 = vld [vmem:[%s9196_s16 + $0x154] ss:$8 sps:$4 sm:$0xff]   ;;  %v8659_v13 = vld [vmem:[%s9196_s16 + $0x120] ss:$8 sps:$4 sm:$0xff]   ;;  %v8677_v29 = vld [vmem:[%s9196_s16 + $0x1f0] ss:$8 sps:$4 sm:$0xff]  }
 0x443   : > { %v3664_v37 = vadd.f32 %v10190_v58, %v3621_v12  ;;  %v8653_v12 = vld [vmem:[%s9196_s16 + $0x130] ss:$8 sps:$4 sm:$0xff]   ;;  %v8679_v58 = vld [vmem:[%s9196_s16 + $0x1f4] ss:$8 sps:$4 sm:$0xff]  }
 0x467   : > { %v5273_v41 = vpop.f32.mrf.mxu0 }
 0x468   : > { %v5274_v7 = vadd.f32 %v5273_v41, %v5231_v43  ;;  %v3662_v41 = vadd.f32 %v10192_v40, %v3619_v48  ;;  %v8665_v48 = vld [vmem:[%s9196_s16 + $0x110] ss:$8 sps:$4 sm:$0xff]   ;;  %v8683_v40 = vld [vmem:[%s9196_s16 + $0x1e0] ss:$8 sps:$4 sm:$0xff]  }
 0x469   : > { %v5275_v44 = vpop.f32.mrf.mxu0 }
 0x46a   : > { %v5276_v31 = vadd.f32 %v5275_v44, %v5233_v49  ;;  %v10196_v49 = vld [vmem:[#allocation5_spill] sm:$0xff] }
 0x46b   : > { %v5277_v2 = vpop.f32.mrf.mxu0  ;;  %v3705_v55 = vadd.f32 %v10196_v49, %v3662_v41  ;;  %v8688_v41 = vld [vmem:[%s9196_s16 + $0xd4] ss:$8 sps:$4 sm:$0xff]   ;;  %v8704_v49 = vld [vmem:[%s9196_s16 + $0xa0] ss:$8 sps:$4 sm:$0xff]  }
 0x46c   : > { %v5278_v20 = vadd.f32 %v5277_v2, %v5235_v52  ;;  %v3709_v2 = vadd.f32 %v10193_v14, %v3666_v38  ;;  %v8628_v52 = vld [vmem:[%s9196_s16 + $0x74] ss:$8 sps:$4 sm:$0xff]   ;;  %v8673_v38 = vld [vmem:[%s9196_s16 + $0x104] ss:$8 sps:$4 sm:$0xff]  }
 0x46d   : > { %v5279_v45 = vpop.f32.mrf.mxu0  ;;  %v8697_v14 = vld [vmem:[%s9196_s16 + $0x1c4] ss:$8 sps:$4 sm:$0xff]  }
 0x46e   : > { %v5280_v8 = vadd.f32 %v5279_v45, %v5237_v16  ;;  %v10194_v45 = vld [vmem:[#allocation7_spill] sm:$0xff] }
 0x470   : > { %v5316_v62 = vpop.f32.mrf.mxu1 }
 0x471   : > { %v5317_v4 = vadd.f32 %v5316_v62, %v5274_v7 }
 0x472   : > { %v5318_v34 = vpop.f32.mrf.mxu1 }
 0x473   : > { %v5319_v30 = vadd.f32 %v5318_v34, %v5276_v31  ;;  %v8631_v31 = vld [vmem:[%s9196_s16 + $0x174] ss:$8 sps:$4 sm:$0xff]  }
 0x474   : > { %v5320_v9 = vpop.f32.mrf.mxu1 }
 0x475   : > { %v5321_v63 = vadd.f32 %v5320_v9, %v5278_v20 }
 0x476   : > { %v5322_v47 = vpop.f32.mrf.mxu1 }
 0x477   : > { %v5323_v56 = vadd.f32 %v5322_v47, %v5280_v8  ;;  %v8637_v8 = vld [vmem:[%s9196_s16 + $0x164] ss:$8 sps:$4 sm:$0xff]  }
 0x4a7   : > { %v5359_v54 = vpop.f32.mrf.mxu0 }
 0x4a8   : > { %v5360_v46 = vadd.f32 %v5359_v54, %v5317_v4  ;;  %v3707_v54 = vadd.f32 %v10194_v45, %v3664_v37  ;;  %v8626_v4 = vld [vmem:[%s9196_s16 + $0x70] ss:$8 sps:$4 sm:$0xff]   ;;  %v8703_v45 = vld [vmem:[%s9196_s16 + $0x1b4] ss:$8 sps:$4 sm:$0xff]  }
 0x4a9   : > { %v5361_v51 = vpop.f32.mrf.mxu0  ;;  %v8674_v37 = vld [vmem:[%s9196_s16 + $0xf0] ss:$8 sps:$4 sm:$0xff]  }
 0x4aa   : > { %v5362_v3 = vadd.f32 %v5361_v51, %v5319_v30 }
 0x4ab   : > { %v5363_v59 = vpop.f32.mrf.mxu0 }
 0x4ac   : > { %v5364_v50 = vadd.f32 %v5363_v59, %v5321_v63  ;;  %v8632_v63 = vld [vmem:[%s9196_s16 + $0x60] ss:$8 sps:$4 sm:$0xff]  }
 0x4ad   : > { %v5365_v5 = vpop.f32.mrf.mxu0 }
 0x4ae   : > { %v5366_v39 = vadd.f32 %v5365_v5, %v5323_v56  ;;  %v8629_v5 = vld [vmem:[%s9196_s16 + $0x170] ss:$8 sps:$4 sm:$0xff]   ;;  %v8647_v56 = vld [vmem:[%s9196_s16 + $0x140] ss:$8 sps:$4 sm:$0xff]  }
 0x4b0   : > { %v5402_v35 = vpop.f32.mrf.mxu1 }
 0x4b1   : > { %v5403_v16 = vadd.f32 %v5402_v35, %v5360_v46  ;;  %v8641_v46 = vld [vmem:[%s9196_s16 + $0x150] ss:$8 sps:$4 sm:$0xff]  }
 0x4b2   : > { %v5404_v42 = vpop.f32.mrf.mxu1 }
 0x4b3   : > { %v5405_v23 = vadd.f32 %v5404_v42, %v5362_v3  ;;  %v10195_v42 = vld [vmem:[#allocation11_spill] sm:$0xff] }
 0x4b4   : > { %v5406_v10 = vpop.f32.mrf.mxu1  ;;  %v3711_v51 = vadd.f32 %v10195_v42, %v3668_v19  ;;  %v8635_v3 = vld [vmem:[%s9196_s16 + $0x160] ss:$8 sps:$4 sm:$0xff]   ;;  %v8682_v19 = vld [vmem:[%s9196_s16 + $0xe4] ss:$8 sps:$4 sm:$0xff]   ;;  %v8701_v42 = vld [vmem:[%s9196_s16 + $0x1b0] ss:$8 sps:$4 sm:$0xff]  }
 0x4b5   : > { %v5407_v17 = vadd.f32 %v5406_v10, %v5364_v50  ;;  %v8652_v50 = vld [vmem:[%s9196_s16 + $0x34] ss:$8 sps:$4 sm:$0xff]  }
 0x4b6   : > { %v5408_v60 = vpop.f32.mrf.mxu1 }
 0x4b7   : > { %v5409_v62 = vadd.f32 %v5408_v60, %v5366_v39  ;;  %v8664_v39 = vld [vmem:[%s9196_s16 + $0x14] ss:$8 sps:$4 sm:$0xff]  }
 0x4d0   : > { %v5488_v36 = vpop.f32.mrf.mxu1 }
 0x4d2   : > { %v5490_v27 = vpop.f32.mrf.mxu1 }
 0x4d4   : > { %v5492_v20 = vpop.f32.mrf.mxu1 }
 0x4d6   : > { %v5494_v47 = vpop.f32.mrf.mxu1 }
 0x4e7   : > { %v5445_v25 = vpop.f32.mrf.mxu0 }
 0x4e8   : > { %v5446_v7 = vadd.f32 %v5445_v25, %v5403_v16  ;;  %v8649_v25 = vld [vmem:[%s9196_s16 + $0x144] ss:$8 sps:$4 sm:$0xff]  }
 0x4e9   : > { %v5447_v24 = vpop.f32.mrf.mxu0  ;;  %v8661_v16 = vld [vmem:[%s9196_s16 + $0x124] ss:$8 sps:$4 sm:$0xff]  }
 0x4ea   : > { %v5448_v30 = vadd.f32 %v5447_v24, %v5405_v23  ;;  %v5489_v35 = vadd.f32 %v5488_v36, %v5446_v7  ;;  %v5503_v36 = vld [vmem:[%s10162_s3] sm:$0xf]  ;;  %v8655_v23 = vld [vmem:[%s9196_s16 + $0x134] ss:$8 sps:$4 sm:$0xff]  }
 0x4eb   : > { %v5449_v53 = vpop.f32.mrf.mxu0  ;;  %v8656_v24 = vld [vmem:[%s9196_s16 + $0x20] ss:$8 sps:$4 sm:$0xff]  }
 0x4ec   : > { %v5450_v15 = vadd.f32 %v5449_v53, %v5407_v17  ;;  %v5491_v18 = vadd.f32 %v5490_v27, %v5448_v30  ;;  %v5497_v60 = vmax.f32 %v3705_v55, %v5489_v35  ;;  %v8646_v27 = vld [vmem:[%s9196_s16 + $0x44] ss:$8 sps:$4 sm:$0xff]   ;;  %v8667_v17 = vld [vmem:[%s9196_s16 + $0x114] ss:$8 sps:$4 sm:$0xff]   ;;  %v8662_v30 = vld [vmem:[%s9196_s16 + $0x10] ss:$8 sps:$4 sm:$0xff]  }
 0x4ed   : > { %v5451_v34 = vpop.f32.mrf.mxu0  ;;  %v8671_v7 = vld [vmem:[%s9196_s16 + $0x100] ss:$8 sps:$4 sm:$0xff]   ;;  %v8676_v53 = vld [vmem:[%s9196_s16 + $0xf4] ss:$8 sps:$4 sm:$0xff]  }
 0x4ee   : > { %v5493_v44 = vadd.f32 %v5492_v20, %v5450_v15  ;;  %v5452_v9 = vadd.f32 %v5451_v34, %v5409_v62  ;;  %v5498_v43 = vmax.f32 %v3707_v54, %v5491_v18  ;;  %v8668_v20 = vld [vmem:[%s9196_s16] ss:$8 sps:$4 sm:$0xff]   ;;  %v8685_v62 = vld [vmem:[%s9196_s16 + $0x1e4] ss:$8 sps:$4 sm:$0xff]   ;;  %v8691_v34 = vld [vmem:[%s9196_s16 + $0x1d4] ss:$8 sps:$4 sm:$0xff]  }
 0x4ef   : > { %v8680_v15 = vld [vmem:[%s9196_s16 + $0xe0] ss:$8 sps:$4 sm:$0xff]   ;;  %v8686_v18 = vld [vmem:[%s9196_s16 + $0xd0] ss:$8 sps:$4 sm:$0xff]   ;;  %v8700_v35 = vld [vmem:[%s9196_s16 + $0xb4] ss:$8 sps:$4 sm:$0xff]  }
 0x4f0   : > { %v5495_v10 = vadd.f32 %v5494_v47, %v5452_v9  ;;  %v5499_v57 = vmax.f32 %v3709_v2, %v5493_v44  ;;  %v8689_v44 = vld [vmem:[%s9196_s16 + $0x1d0] ss:$8 sps:$4 sm:$0xff]   ;;  %v8694_v9 = vld [vmem:[%s9196_s16 + $0xc4] ss:$8 sps:$4 sm:$0xff]   ;;  %v8692_v2 = vld [vmem:[%s9196_s16 + $0xc0] ss:$8 sps:$4 sm:$0xff]  }
 0x4f1   : > { %v8695_v47 = vld [vmem:[%s9196_s16 + $0x1c0] ss:$8 sps:$4 sm:$0xff]   ;;  %v8698_v54 = vld [vmem:[%s9196_s16 + $0xb0] ss:$8 sps:$4 sm:$0xff]  }
 0x4f2   : > { %v5500_v59 = vmax.f32 %v3711_v51, %v5495_v10  ;;  %v5501_v26 = vpack.c.bf16 %v5499_v57, %v5497_v60  ;;  %v8706_v51 = vld [vmem:[%s9196_s16 + $0xa4] ss:$8 sps:$4 sm:$0xff]   ;;  %v8707_v55 = vld [vmem:[%s9196_s16 + $0x1a0] ss:$8 sps:$4 sm:$0xff]   ;;  %v8710_v57 = vld [vmem:[%s9196_s16 + $0x90] ss:$8 sps:$4 sm:$0xff]  }
 0x4f3   : > { %v8709_v10 = vld [vmem:[%s9196_s16 + $0x1a4] ss:$8 sps:$4 sm:$0xff]   ;;  %v8715_v60 = vld [vmem:[%s9196_s16 + $0x194] ss:$8 sps:$4 sm:$0xff]  }
 0x4f4   : > { %v5502_v61 = vpack.c.bf16 %v5500_v59, %v5498_v43  ;;  %v8712_v43 = vld [vmem:[%s9196_s16 + $0x94] ss:$8 sps:$4 sm:$0xff]   ;;  %v8713_v59 = vld [vmem:[%s9196_s16 + $0x190] ss:$8 sps:$4 sm:$0xff]  }
 0x4f6   : > { %5522 = vmatprep.subr.bf16.mxu1 %v5502_v61  ;;  %5567 = vmatprep.subr.bf16.mxu0 %v5502_v61  ;;  %v8716_v61 = vld [vmem:[%s9196_s16 + $0x80] ss:$8 sps:$4 sm:$0xff]  }
 0x4f7   : > { %5523 = vmatpush1.bf16.msra.mxu1 %v5501_v26  ;;  %5568 = vmatpush1.bf16.msra.mxu0 %v5501_v26  ;;  %v8724_v26 = vld [vmem:[%s9196_s16 + $0x374] ss:$8 sps:$4 sm:$0xff]  }
 0x4f8   : > { %6044 = vmatprep.subr.bf16.mxu0 %v8628_v52  ;;  %5843 = vmatprep.subr.bf16.mxu1 %v8631_v31  ;;  %v8718_v52 = vld [vmem:[%s9196_s16 + $0x84] ss:$8 sps:$4 sm:$0xff]  }
 0x4f9   : > { %v8721_v31 = vld [vmem:[%s9196_s16 + $0x184] ss:$8 sps:$4 sm:$0xff]  }
 0x4fa   : > { %7509 = vmatmul.mubr.msk.bf16.vlgmr.msra.gmra.mxu1 %vm5504_vm14, %v5503_v36  ;;  %7510 = vmatmul.mubr.msk.bf16.vlgmr.msra.gmra.mxu0 %vm5504_vm14, %v5549_v22  ;;  %v8719_v36 = vld [vmem:[%s9196_s16 + $0x180] ss:$8 sps:$4 sm:$0xff]   ;;  %v8727_v22 = vld [vmem:[%s9196_s16 + $0x274] ss:$8 sps:$4 sm:$0xff]  }
 0x4fb   : > { %6045 = vmatpush1.bf16.msra.mxu0 %v8626_v4  ;;  %5844 = vmatpush1.bf16.msra.mxu1 %v8629_v5  ;;  %v5596_v4 = vld [vmem:[%s636_s28] sm:$0x3]  ;;  %s657_s28 = scalar_lea.vmem %s10174_s15, %s10062_s25 }
 0x4fc   : > { %6046 = vmatprep.subr.bf16.mxu0 %v8634_v6  ;;  %5845 = vmatprep.subr.bf16.mxu1 %v8637_v8  ;;  %v10197_v5 = vld [vmem:[#allocation2_spill] sm:$0xff] }
 0x4fd   : > { %v5601_v6 = vrot.slane %v5596_v4, %v10197_v5 }
 0x4ff   : > { %6047 = vmatpush1.bf16.msra.mxu0 %v8632_v63  ;;  %5846 = vmatpush1.bf16.msra.mxu1 %v8635_v3 }
 0x500   : > { %6048 = vmatprep.subr.bf16.mxu0 %v8640_v0  ;;  %5847 = vmatprep.subr.bf16.mxu1 %v8643_v1  ;;  %v10198_v0 = vld [vmem:[#allocation3_spill] sm:$0xff] }
 0x501   : > { %v5605_v1 = vrot.slane %v5596_v4, %v10198_v0  ;;  %v8790_v4 = vld [vmem:[%s9196_s16 + $0x3c4] ss:$8 sps:$4 sm:$0xff]  }
 0x503   : > { %6049 = vmatpush1.bf16.msra.mxu0 %v8638_v21  ;;  %5848 = vmatpush1.bf16.msra.mxu1 %v8641_v46 }
 0x504   : > { %6050 = vmatprep.subr.bf16.mxu0 %v8646_v27  ;;  %5849 = vmatprep.subr.bf16.mxu1 %v8649_v25 }
 0x507   : > { %6051 = vmatpush1.bf16.msra.mxu0 %v8644_v28  ;;  %5850 = vmatpush1.bf16.msra.mxu1 %v8647_v56 }
 0x508   : > { %6052 = vmatprep.subr.bf16.mxu0 %v8652_v50  ;;  %5851 = vmatprep.subr.bf16.mxu1 %v8655_v23 }
 0x50b   : > { %6053 = vmatpush1.bf16.msra.mxu0 %v8650_v11  ;;  %5852 = vmatpush1.bf16.msra.mxu1 %v8653_v12 }
 0x50c   : > { %6054 = vmatprep.subr.bf16.mxu0 %v8658_v33  ;;  %5853 = vmatprep.subr.bf16.mxu1 %v8661_v16  ;;  %v8722_v16 = vld [vmem:[%s9196_s16 + $0x370] ss:$8 sps:$4 sm:$0xff]  }
 0x50f   : > { %6055 = vmatpush1.bf16.msra.mxu0 %v8656_v24  ;;  %5854 = vmatpush1.bf16.msra.mxu1 %v8659_v13  ;;  %v8730_v24 = vld [vmem:[%s9196_s16 + $0x364] ss:$8 sps:$4 sm:$0xff]  }
 0x510   : > { %6056 = vmatprep.subr.bf16.mxu0 %v8664_v39  ;;  %5855 = vmatprep.subr.bf16.mxu1 %v8667_v17  ;;  %v8725_v39 = vld [vmem:[%s9196_s16 + $0x270] ss:$8 sps:$4 sm:$0xff]  }
 0x513   : > { %6057 = vmatpush1.bf16.msra.mxu0 %v8662_v30  ;;  %5856 = vmatpush1.bf16.msra.mxu1 %v8665_v48  ;;  %v8733_v30 = vld [vmem:[%s9196_s16 + $0x264] ss:$8 sps:$4 sm:$0xff]  }
 0x514   : > { %6058 = vmatprep.subr.bf16.mxu0 %v8670_v32  ;;  %5857 = vmatprep.subr.bf16.mxu1 %v8673_v38  ;;  %v8728_v32 = vld [vmem:[%s9196_s16 + $0x360] ss:$8 sps:$4 sm:$0xff]  }
 0x517   : > { %6059 = vmatpush1.bf16.msra.mxu0 %v8668_v20  ;;  %5858 = vmatpush1.bf16.msra.mxu1 %v8671_v7  ;;  %v8736_v20 = vld [vmem:[%s9196_s16 + $0x354] ss:$8 sps:$4 sm:$0xff]   ;;  %v8731_v7 = vld [vmem:[%s9196_s16 + $0x260] ss:$8 sps:$4 sm:$0xff]  }
 0x518   : > { %6060 = vmatprep.subr.bf16.mxu0 %v8676_v53  ;;  %5859 = vmatprep.subr.bf16.mxu1 %v8679_v58  ;;  %v8739_v53 = vld [vmem:[%s9196_s16 + $0x254] ss:$8 sps:$4 sm:$0xff]   ;;  %v8734_v58 = vld [vmem:[%s9196_s16 + $0x350] ss:$8 sps:$4 sm:$0xff]  }
 0x51b   : > { %6061 = vmatpush2.bf16.msra.mxu0 %v8674_v37  ;;  %5860 = vmatpush2.bf16.msra.mxu1 %v8677_v29  ;;  %v8742_v37 = vld [vmem:[%s9196_s16 + $0x344] ss:$8 sps:$4 sm:$0xff]   ;;  %v8737_v29 = vld [vmem:[%s9196_s16 + $0x250] ss:$8 sps:$4 sm:$0xff]  }
 0x51c   : > { %6062 = vmatprep.subr.bf16.mxu0 %v8682_v19  ;;  %5861 = vmatprep.subr.bf16.mxu1 %v8685_v62  ;;  %v8745_v19 = vld [vmem:[%s9196_s16 + $0x244] ss:$8 sps:$4 sm:$0xff]   ;;  %v8740_v62 = vld [vmem:[%s9196_s16 + $0x340] ss:$8 sps:$4 sm:$0xff]  }
 0x51f   : > { %6063 = vmatpush2.bf16.msra.mxu0 %v8680_v15  ;;  %5862 = vmatpush2.bf16.msra.mxu1 %v8683_v40  ;;  %v8748_v15 = vld [vmem:[%s9196_s16 + $0x334] ss:$8 sps:$4 sm:$0xff]   ;;  %v8743_v40 = vld [vmem:[%s9196_s16 + $0x240] ss:$8 sps:$4 sm:$0xff]  }
 0x520   : > { %6064 = vmatprep.subr.bf16.mxu0 %v8688_v41  ;;  %5863 = vmatprep.subr.bf16.mxu1 %v8691_v34  ;;  %v8751_v41 = vld [vmem:[%s9196_s16 + $0x234] ss:$8 sps:$4 sm:$0xff]   ;;  %v8746_v34 = vld [vmem:[%s9196_s16 + $0x330] ss:$8 sps:$4 sm:$0xff]  }
 0x523   : > { %6065 = vmatpush2.bf16.msra.mxu0 %v8686_v18  ;;  %5864 = vmatpush2.bf16.msra.mxu1 %v8689_v44  ;;  %v8754_v18 = vld [vmem:[%s9196_s16 + $0x324] ss:$8 sps:$4 sm:$0xff]   ;;  %v8749_v44 = vld [vmem:[%s9196_s16 + $0x230] ss:$8 sps:$4 sm:$0xff]  }
 0x524   : > { %6066 = vmatprep.subr.bf16.mxu0 %v8694_v9  ;;  %5865 = vmatprep.subr.bf16.mxu1 %v8697_v14  ;;  %v8757_v9 = vld [vmem:[%s9196_s16 + $0x224] ss:$8 sps:$4 sm:$0xff]   ;;  %v8752_v14 = vld [vmem:[%s9196_s16 + $0x320] ss:$8 sps:$4 sm:$0xff]  }
 0x527   : > { %6067 = vmatpush2.bf16.msra.mxu0 %v8692_v2  ;;  %5866 = vmatpush2.bf16.msra.mxu1 %v8695_v47  ;;  %v8760_v2 = vld [vmem:[%s9196_s16 + $0x314] ss:$8 sps:$4 sm:$0xff]   ;;  %v8755_v47 = vld [vmem:[%s9196_s16 + $0x220] ss:$8 sps:$4 sm:$0xff]  }
 0x528   : > { %6068 = vmatprep.subr.bf16.mxu0 %v8700_v35  ;;  %5867 = vmatprep.subr.bf16.mxu1 %v8703_v45  ;;  %v8763_v35 = vld [vmem:[%s9196_s16 + $0x214] ss:$8 sps:$4 sm:$0xff]   ;;  %v8758_v45 = vld [vmem:[%s9196_s16 + $0x310] ss:$8 sps:$4 sm:$0xff]  }
 0x52b   : > { %6069 = vmatpush2.bf16.msra.mxu0 %v8698_v54  ;;  %5868 = vmatpush2.bf16.msra.mxu1 %v8701_v42  ;;  %v8766_v54 = vld [vmem:[%s9196_s16 + $0x304] ss:$8 sps:$4 sm:$0xff]   ;;  %v8761_v42 = vld [vmem:[%s9196_s16 + $0x210] ss:$8 sps:$4 sm:$0xff]  }
 0x52c   : > { %6070 = vmatprep.subr.bf16.mxu0 %v8706_v51  ;;  %5869 = vmatprep.subr.bf16.mxu1 %v8709_v10  ;;  %v8769_v51 = vld [vmem:[%s9196_s16 + $0x204] ss:$8 sps:$4 sm:$0xff]   ;;  %v8764_v10 = vld [vmem:[%s9196_s16 + $0x300] ss:$8 sps:$4 sm:$0xff]  }
 0x52f   : > { %6071 = vmatpush2.bf16.msra.mxu0 %v8704_v49  ;;  %5870 = vmatpush2.bf16.msra.mxu1 %v8707_v55  ;;  %v8772_v49 = vld [vmem:[%s9196_s16 + $0x3f4] ss:$8 sps:$4 sm:$0xff]   ;;  %v8767_v55 = vld [vmem:[%s9196_s16 + $0x200] ss:$8 sps:$4 sm:$0xff]  }
 0x530   : > { %6072 = vmatprep.subr.bf16.mxu0 %v8712_v43  ;;  %5871 = vmatprep.subr.bf16.mxu1 %v8715_v60  ;;  %v8770_v43 = vld [vmem:[%s9196_s16 + $0x3f0] ss:$8 sps:$4 sm:$0xff]  }
 0x531   : > { %v8773_v60 = vld [vmem:[%s9196_s16 + $0x2f0] ss:$8 sps:$4 sm:$0xff]  }
 0x533   : > { %6073 = vmatpush2.bf16.msra.mxu0 %v8710_v57  ;;  %5872 = vmatpush2.bf16.msra.mxu1 %v8713_v59  ;;  %v8775_v57 = vld [vmem:[%s9196_s16 + $0x2f4] ss:$8 sps:$4 sm:$0xff]   ;;  %v8778_v59 = vld [vmem:[%s9196_s16 + $0x3e4] ss:$8 sps:$4 sm:$0xff]  }
 0x534   : > { %6074 = vmatprep.subr.bf16.mxu0 %v8718_v52  ;;  %5873 = vmatprep.subr.bf16.mxu1 %v8721_v31  ;;  %v8776_v52 = vld [vmem:[%s9196_s16 + $0x3e0] ss:$8 sps:$4 sm:$0xff]   ;;  %v8784_v31 = vld [vmem:[%s9196_s16 + $0x3d4] ss:$8 sps:$4 sm:$0xff]  }
 0x537   : > { %6075 = vmatpush2.bf16.msra.mxu0 %v8716_v61  ;;  %5874 = vmatpush2.bf16.msra.mxu1 %v8719_v36  ;;  %v8781_v61 = vld [vmem:[%s9196_s16 + $0x2e4] ss:$8 sps:$4 sm:$0xff]   ;;  %v8787_v36 = vld [vmem:[%s9196_s16 + $0x2d4] ss:$8 sps:$4 sm:$0xff]  }
 0x538   : > { %6522 = vmatprep.subr.bf16.mxu0 %v8724_v26  ;;  %6282 = vmatprep.subr.bf16.mxu1 %v8727_v22  ;;  %v8779_v26 = vld [vmem:[%s9196_s16 + $0x2e0] ss:$8 sps:$4 sm:$0xff]   ;;  %v8782_v22 = vld [vmem:[%s9196_s16 + $0x3d0] ss:$8 sps:$4 sm:$0xff]  }
 0x5ba   : > { %v5542_v8 = vpop.f32.mrf.mxu1  ;;  %v5587_v63 = vpop.f32.mrf.mxu0 }
 0x5bb   : > { %v5594_v3 = vmax.f32 %v5542_v8, %v5587_v63  ;;  %v8793_v8 = vld [vmem:[%s9196_s16 + $0x2c4] ss:$8 sps:$4 sm:$0xff]   ;;  %v8788_v63 = vld [vmem:[%s9196_s16 + $0x3c0] ss:$8 sps:$4 sm:$0xff]  }
 0x5bc   : > { %v5544_v21 = vpop.f32.mrf.mxu1  ;;  %v5589_v46 = vpop.f32.mrf.mxu0 }
 0x5bd   : > { %v5608_v27 = vadd.f32 %v5601_v6, %v5594_v3  ;;  %v5595_v25 = vmax.f32 %v5544_v21, %v5589_v46  ;;  %v8785_v6 = vld [vmem:[%s9196_s16 + $0x2d0] ss:$8 sps:$4 sm:$0xff]   ;;  %v8796_v3 = vld [vmem:[%s9196_s16 + $0x3b4] ss:$8 sps:$4 sm:$0xff]  }
 0x5be   : > { %v5546_v28 = vpop.f32.mrf.mxu1  ;;  %v5591_v56 = vpop.f32.mrf.mxu0  ;;  %v8799_v21 = vld [vmem:[%s9196_s16 + $0x2b4] ss:$8 sps:$4 sm:$0xff]   ;;  %v8794_v46 = vld [vmem:[%s9196_s16 + $0x3b0] ss:$8 sps:$4 sm:$0xff]  }
 0x5bf   : > { %v5609_v50 = vadd.f32 %v5605_v1, %v5595_v25  ;;  %v10070_v23 = vpack.c.bf16 %v5608_v27, %v5608_v27  ;;  %v8791_v1 = vld [vmem:[%s9196_s16 + $0x2c0] ss:$8 sps:$4 sm:$0xff]   ;;  %v8802_v27 = vld [vmem:[%s9196_s16 + $0x3a4] ss:$8 sps:$4 sm:$0xff]   ;;  %v8797_v25 = vld [vmem:[%s9196_s16 + $0x2b0] ss:$8 sps:$4 sm:$0xff]  }
 0x5c0   : > { %v5547_v11 = vpop.f32.mrf.mxu1  ;;  %v5592_v12 = vpop.f32.mrf.mxu0  ;;  %v8805_v28 = vld [vmem:[%s9196_s16 + $0x2a4] ss:$8 sps:$4 sm:$0xff]   ;;  %v8800_v56 = vld [vmem:[%s9196_s16 + $0x3a0] ss:$8 sps:$4 sm:$0xff]  }
 0x5c1   : > { %v5611_v33 = vpack.c.bf16 %v5609_v50, %v5609_v50  ;;  %v5679_v17 = vrot.slane %v10070_v23, 1  ;;  %v8808_v50 = vld [vmem:[%s9196_s16 + $0x394] ss:$8 sps:$4 sm:$0xff]   ;;  %v8803_v11 = vld [vmem:[%s9196_s16 + $0x2a0] ss:$8 sps:$4 sm:$0xff]  }
 0x5c2   : > { %v8811_v12 = vld [vmem:[%s9196_s16 + $0x294] ss:$8 sps:$4 sm:$0xff]  }
 0x5c3   : > { %6076 = vmatprep.mubr.bf16.mxu0 %v5611_v33  ;;  %v5680_v13 = vrot.slane %v5611_v33, 1  ;;  %v6359_v48 = vrot.slane %v5611_v33, 3  ;;  %v6119_v38 = vrot.slane %v5611_v33, 2  ;;  %v8806_v33 = vld [vmem:[%s9196_s16 + $0x390] ss:$8 sps:$4 sm:$0xff]  }
 0x5c4   : > { %6077 = vmatmul.mubr.bf16.vlgmr.msra.gmra.mxu0 %v10070_v23 }
 0x5c5   : > { %6523 = vmatpush1.bf16.msra.mxu0 %v8722_v16  ;;  %5875 = vmatprep.mubr.bf16.mxu1 %v5680_v13  ;;  %v8814_v16 = vld [vmem:[%s9196_s16 + $0x384] ss:$8 sps:$4 sm:$0xff]  }
 0x5c6   : > { %5876 = vmatmul.mubr.bf16.vlgmr.msra.gmra.mxu1 %v5679_v17  ;;  %6524 = vmatprep.subr.bf16.mxu0 %v8730_v24  ;;  %v8809_v24 = vld [vmem:[%s9196_s16 + $0x290] ss:$8 sps:$4 sm:$0xff]   ;;  %v8817_v13 = vld [vmem:[%s9196_s16 + $0x284] ss:$8 sps:$4 sm:$0xff]   ;;  %v8815_v17 = vld [vmem:[%s9196_s16 + $0x280] ss:$8 sps:$4 sm:$0xff]  }
 0x5c7   : > { %6283 = vmatpush1.bf16.msra.mxu1 %v8725_v39  ;;  %6314 = vmatprep.mubr.bf16.mxu1 %v6119_v38  ;;  %v8812_v39 = vld [vmem:[%s9196_s16 + $0x380] ss:$8 sps:$4 sm:$0xff]   ;;  %v8819_v38 = vld [vmem:[%s650_s21 + $0x38] sm:$0xff]  }
 0x5c8   : > { %6284 = vmatprep.subr.bf16.mxu1 %v8733_v30  ;;  %6554 = vmatprep.mubr.bf16.mxu0 %v6359_v48  ;;  %v6358_v30 = vrot.slane %v10070_v23, 3  ;;  %v6118_v48 = vrot.slane %v10070_v23, 2  ;;  %v8826_v23 = vld [vmem:[%s650_s21 + $0x58] sm:$0xff]  }
 0x5c9   : > { %6525 = vmatpush1.bf16.msra.mxu0 %v8728_v32  ;;  %v8818_v32 = vld [vmem:[%s650_s21 + $0x78] sm:$0xff]  }
 0x5ca   : > { %6526 = vmatprep.subr.bf16.mxu0 %v8736_v20  ;;  %v8820_v20 = vld [vmem:[%s650_s21 + $0x70] sm:$0xff]  }
 0x5cb   : > { %6285 = vmatpush1.bf16.msra.mxu1 %v8731_v7  ;;  %v8821_v7 = vld [vmem:[%s650_s21 + $0x30] sm:$0xff]  }
 0x5cc   : > { %6286 = vmatprep.subr.bf16.mxu1 %v8739_v53  ;;  %v8822_v53 = vld [vmem:[%s650_s21 + $0x68] sm:$0xff]  }
 0x5cd   : > { %6527 = vmatpush1.bf16.msra.mxu0 %v8734_v58  ;;  %v8823_v58 = vld [vmem:[%s650_s21 + $0x28] sm:$0xff]  }
 0x5ce   : > { %6528 = vmatprep.subr.bf16.mxu0 %v8742_v37  ;;  %v8824_v37 = vld [vmem:[%s650_s21 + $0x60] sm:$0xff]  }
 0x5cf   : > { %6287 = vmatpush1.bf16.msra.mxu1 %v8737_v29  ;;  %v8825_v29 = vld [vmem:[%s650_s21 + $0x20] sm:$0xff]  }
 0x5d0   : > { %6288 = vmatprep.subr.bf16.mxu1 %v8745_v19  ;;  %v8827_v19 = vld [vmem:[%s650_s21 + $0x18] sm:$0xff]  }
 0x5d1   : > { %6529 = vmatpush1.bf16.msra.mxu0 %v8740_v62  ;;  %v8828_v62 = vld [vmem:[%s650_s21 + $0x50] sm:$0xff]  }
 0x5d2   : > { %6530 = vmatprep.subr.bf16.mxu0 %v8748_v15  ;;  %v8829_v15 = vld [vmem:[%s650_s21 + $0x10] sm:$0xff]  }
 0x5d3   : > { %6289 = vmatpush1.bf16.msra.mxu1 %v8743_v40  ;;  %v8830_v40 = vld [vmem:[%s650_s21 + $0x48] sm:$0xff]  }
 0x5d4   : > { %6290 = vmatprep.subr.bf16.mxu1 %v8751_v41  ;;  %v8831_v41 = vld [vmem:[%s650_s21 + $0x8] sm:$0xff]  }
 0x5d5   : > { %6531 = vmatpush1.bf16.msra.mxu0 %v8746_v34  ;;  %v8832_v34 = vld [vmem:[%s650_s21 + $0x40] sm:$0xff]  }
 0x5d6   : > { %6532 = vmatprep.subr.bf16.mxu0 %v8754_v18  ;;  %v8833_v18 = vld [vmem:[%s650_s21] sm:$0xff]  }
 0x5d7   : > { %6291 = vmatpush1.bf16.msra.mxu1 %v8749_v44 }
 0x5d8   : > { %6292 = vmatprep.subr.bf16.mxu1 %v8757_v9 }
 0x5d9   : > { %6533 = vmatpush1.bf16.msra.mxu0 %v8752_v14 }
 0x5da   : > { %6534 = vmatprep.subr.bf16.mxu0 %v8760_v2 }
 0x5db   : > { %6293 = vmatpush1.bf16.msra.mxu1 %v8755_v47 }
 0x5dc   : > { %6294 = vmatprep.subr.bf16.mxu1 %v8763_v35 }
 0x5dd   : > { %6535 = vmatpush1.bf16.msra.mxu0 %v8758_v45 }
 0x5de   : > { %6536 = vmatprep.subr.bf16.mxu0 %v8766_v54 }
 0x5df   : > { %6295 = vmatpush1.bf16.msra.mxu1 %v8761_v42 }
 0x5e0   : > { %6296 = vmatprep.subr.bf16.mxu1 %v8769_v51 }
 0x5e1   : > { %6537 = vmatpush1.bf16.msra.mxu0 %v8764_v10  ;;  %v6565_v10 = vld [vmem:[%s645_s23] sm:$0x3] }
 0x5e2   : > { %6538 = vmatprep.subr.bf16.mxu0 %v8772_v49 }
 0x5e3   : > { %6297 = vmatpush1.bf16.msra.mxu1 %v8767_v55 }
 0x5e4   : > { %6298 = vmatprep.subr.bf16.mxu1 %v8775_v57 }
 0x5e5   : > { %6539 = vmatpush2.bf16.msra.mxu0 %v8770_v43 }
 0x5e6   : > { %6540 = vmatprep.subr.bf16.mxu0 %v8778_v59  ;;  %v6570_v59 = vrot.slane %v6565_v10, %v10197_v5 }
 0x5e7   : > { %6299 = vmatpush2.bf16.msra.mxu1 %v8773_v60 }
 0x5e8   : > { %6300 = vmatprep.subr.bf16.mxu1 %v8781_v61 }
 0x5e9   : > { %6541 = vmatpush2.bf16.msra.mxu0 %v8776_v52 }
 0x5ea   : > { %6542 = vmatprep.subr.bf16.mxu0 %v8784_v31 }
 0x5eb   : > { %6301 = vmatpush2.bf16.msra.mxu1 %v8779_v26  ;;  %v6574_v26 = vrot.slane %v6565_v10, %v10198_v0 }
 0x5ec   : > { %6302 = vmatprep.subr.bf16.mxu1 %v8787_v36 }
 0x5ed   : > { %6543 = vmatpush2.bf16.msra.mxu0 %v8782_v22 }
 0x5ee   : > { %6544 = vmatprep.subr.bf16.mxu0 %v8790_v4 }
 0x5ef   : > { %6303 = vmatpush2.bf16.msra.mxu1 %v8785_v6 }
 0x5f0   : > { %6304 = vmatprep.subr.bf16.mxu1 %v8793_v8 }
 0x5f1   : > { %6545 = vmatpush2.bf16.msra.mxu0 %v8788_v63 }
 0x5f2   : > { %6546 = vmatprep.subr.bf16.mxu0 %v8796_v3 }
 0x5f3   : > { %6305 = vmatpush2.bf16.msra.mxu1 %v8791_v1 }
 0x5f4   : > { %6306 = vmatprep.subr.bf16.mxu1 %v8799_v21 }
 0x5f5   : > { %6547 = vmatpush2.bf16.msra.mxu0 %v8794_v46  ;;  %v7735_v46 = vld [vmem:[%s653_s26] ss:$0 sm:$0xff] }
 0x5f6   : > { %6548 = vmatprep.subr.bf16.mxu0 %v8802_v27 }
 0x5f7   : > { %6307 = vmatpush2.bf16.msra.mxu1 %v8797_v25 }
 0x5f8   : > { %6308 = vmatprep.subr.bf16.mxu1 %v8805_v28 }
 0x5f9   : > { %6549 = vmatpush2.bf16.msra.mxu0 %v8800_v56 }
 0x5fa   : > { %6550 = vmatprep.subr.bf16.mxu0 %v8808_v50 }
 0x5fb   : > { %6309 = vmatpush2.bf16.msra.mxu1 %v8803_v11 }
 0x5fc   : > { %6310 = vmatprep.subr.bf16.mxu1 %v8811_v12 }
 0x5fd   : > { %6551 = vmatpush2.bf16.msra.mxu0 %v8806_v33 }
 0x5fe   : > { %6552 = vmatprep.subr.bf16.mxu0 %v8814_v16 }
 0x5ff   : > { %6311 = vmatpush2.bf16.msra.mxu1 %v8809_v24 }
 0x600   : > { %6312 = vmatprep.subr.bf16.mxu1 %v8817_v13 }
 0x601   : > { %6553 = vmatpush2.bf16.msra.mxu0 %v8812_v39 }
 0x603   : > { %6313 = vmatpush2.bf16.msra.mxu1 %v8815_v17 }
 0x604   : > { %6555 = vmatmul.mubr.bf16.vlgmr.msra.gmra.mxu0 %v6358_v30  ;;  %7766 = vmatprep.subr.bf16.mxu1 %v8818_v32 }
 0x606   : > { %6315 = vmatmul.mubr.bf16.vlgmr.msra.gmra.mxu1 %v6118_v48 }
 0x607   : > { %7767 = vmatpush3.bf16.msra.mxu1 %v8819_v38 }
 0x608   : > { %7768 = vmatprep.subr.bf16.mxu1 %v8820_v20 }
 0x60b   : > { %7769 = vmatpush3.bf16.msra.mxu1 %v8821_v7 }
 0x60c   : > { %7770 = vmatprep.subr.bf16.mxu1 %v8822_v53 }
 0x60f   : > { %7771 = vmatpush3.bf16.msra.mxu1 %v8823_v58 }
 0x610   : > { %7772 = vmatprep.subr.bf16.mxu1 %v8824_v37 }
 0x613   : > { %7773 = vmatpush3.bf16.msra.mxu1 %v8825_v29 }
 0x614   : > { %7774 = vmatprep.subr.bf16.mxu1 %v8826_v23 }
 0x617   : > { %7775 = vmatpush3.bf16.msra.mxu1 %v8827_v19 }
 0x618   : > { %7776 = vmatprep.subr.bf16.mxu1 %v8828_v62 }
 0x61b   : > { %7777 = vmatpush3.bf16.msra.mxu1 %v8829_v15 }
 0x61c   : > { %7778 = vmatprep.subr.bf16.mxu1 %v8830_v40 }
 0x61f   : > { %7779 = vmatpush3.bf16.msra.mxu1 %v8831_v41 }
 0x620   : > { %7780 = vmatprep.subr.bf16.mxu1 %v8832_v34 }
 0x623   : > { %7781 = vmatpush3.bf16.msra.mxu1 %v8833_v18 }
 0x684   : > { %v6078_v44 = vpop.f32.mrf.mxu0 }
 0x686   : > { %v5877_v9 = vpop.f32.mrf.mxu1  ;;  %v6080_v14 = vpop.f32.mrf.mxu0 }
 0x687   : > { %v6079_v2 = vadd.f32 %v6078_v44, %v5877_v9 }
 0x688   : > { %v5879_v47 = vpop.f32.mrf.mxu1  ;;  %v6082_v35 = vpop.f32.mrf.mxu0 }
 0x689   : > { %v6081_v57 = vadd.f32 %v6080_v14, %v5879_v47 }
 0x68a   : > { %v5881_v45 = vpop.f32.mrf.mxu1  ;;  %v6083_v54 = vpop.f32.mrf.mxu0 }
 0x68c   : > { %v5882_v42 = vpop.f32.mrf.mxu1 }
 0x6c4   : > { %v6556_v51 = vpop.f32.mrf.mxu0 }
 0x6c6   : > { %v6316_v49 = vpop.f32.mrf.mxu1  ;;  %v6558_v55 = vpop.f32.mrf.mxu0 }
 0x6c7   : > { %v6323_v43 = vadd.f32 %v6316_v49, %v6079_v2 }
 0x6c8   : > { %v6318_v60 = vpop.f32.mrf.mxu1  ;;  %v6560_v61 = vpop.f32.mrf.mxu0 }
 0x6c9   : > { %v6563_v52 = vadd.f32 %v6556_v51, %v6323_v43  ;;  %v6324_v31 = vadd.f32 %v6318_v60, %v6081_v57 }
 0x6ca   : > { %v6320_v36 = vpop.f32.mrf.mxu1  ;;  %v6561_v22 = vpop.f32.mrf.mxu0 }
 0x6cb   : > { %v6564_v4 = vadd.f32 %v6558_v55, %v6324_v31  ;;  %v6577_v6 = vadd.f32 %v6570_v59, %v6563_v52 }
 0x6cc   : > { %v6321_v8 = vpop.f32.mrf.mxu1 }
 0x6cd   : > { %v6578_v63 = vadd.f32 %v6574_v26, %v6564_v4  ;;  %v6579_v1 = vpack.c.bf16 %v6577_v6, %v6577_v6 }
 0x6cf   : > { %v6580_v3 = vpack.c.bf16 %v6578_v63, %v6578_v63 }
 0x6d1   : > { %6748 = vmatprep.mubr.bf16.mxu1 %v6580_v3 }
 0x6d2   : > { %6749 = vmatmul.mubr.bf16.vlgmr.msra.gmra.mxu1 %v6579_v1 }
 0x792   : > { %v7782_v5 = vpop.f32.mrf.mxu1 }
 0x794   : > { %v7783_v21 = vpop.f32.mrf.mxu1 }
 0x795   : > { %v7784_v27 = vadd.f32 %v7783_v21, %v7782_v5 }
 0x796   : > { %v7785_v25 = vpop.f32.mrf.mxu1 }
 0x797   : > { %v6751_v0 = vadd.f32 %v7784_v27, %v7735_v46 }
 0x798   : > { %v7786_v28 = vpop.f32.mrf.mxu1 }
 0x799   : > { %v6757_v56 = vsel %vm6756_vm15, %v6751_v0, -inf }
 0x79a   : > { %6758 = vmax.xlane.f32.xlu0 %v6757_v56 }
 0x823   : > { %v6759_v50 = vpop.xlane.xlu0 %6758 }
 0x824   : > { %v6760_v11 = vsub.f32 %v6751_v0, %v6759_v50 }
 0x826   : > { %v6761_v12 = vmul.f32 1.442695, %v6760_v11 }
 0x828   : > { %8834 = vpow2.f32 %v6761_v12 }
 0x835   : > { %v8835_v33 = vpop.eup %8834 }
 0x836   : > { %v6763_v16 = vsel %vm6756_vm15, %v8835_v33, 0.0 }
 0x837   : > { %6764 = vadd.xlane.f32.xlu1 %v6763_v16 }
 0x8c0   : > { %v6765_v24 = vpop.xlane.xlu1 %6764 }
 0x8c1   : > { %8836 = vrcp.f32 %v6765_v24 }
 0x8ce   : > { %v8837_v13 = vpop.eup %8836 }
 0x8cf   : > { %v6767_v39 = vmul.f32 %v8837_v13, %v8835_v33 }
 0x8d1   : > { %6768 = vst [vmem:[%s657_s28] sm:$0x3] %v6767_v39 }
 0x8d2 PF: > { %s25_s18 = sadd.s32 1, %s8846_s18  }
 0x8d3   : > { %p22_p4 = scmp.ge.s32.totalorder %s25_s18, 4  }
 0x8d5   :  { %24 = sbr.rel (!%p22_p4) target bundleno = 1 (0x1), region = 140 }

</bundles_post_ra>
